<compile_context>
chip_gen: v6e
topology: v6e:2x2x1
jax: 0.10.0
libtpu: 0.0.40
codegen_flags: <defaults>
</compile_context>

<pallas_src>
import jax
import jax.numpy as jnp
from jax.experimental import pallas as pl
from jax.experimental.pallas import tpu as pltpu

EPS = 1e-5
TN = 256          # lane tile of the final layer (multiple of 256 -> lane-dense stores)
K_PAD = 128       # latent dim padded to a full lane width


# ----------------------------------------------------------------------------
# Fused kernel.
# Grid = (cores, tiles_per_core) over 256-lane tiles of the final output.
# The hidden stack runs once per core into a persistent VMEM scratch; each grid
# step then does one lane-dense tile of  h @ W4 + b4 -> sigmoid.
# ----------------------------------------------------------------------------
def _bn_relu(y, gamma, beta):
    mean = jnp.mean(y, axis=0, keepdims=True)                       # batch mean
    var = jnp.mean(jnp.square(y - mean), axis=0, keepdims=True)     # biased var
    y = (y - mean) * jax.lax.rsqrt(var + EPS) * gamma + beta
    return jnp.maximum(y, 0.0)                                      # ReLU


def fused_generator_kernel(x_ref,
                           w1_ref, g1_ref, be1_ref,
                           w2_ref, g2_ref, be2_ref,
                           w3_ref, g3_ref, be3_ref,
                           w4_ref, b4_ref,
                           o_ref,
                           h_ref):
    # Hidden stack: computed once (first inner step) per core; stays in VMEM.
    # Pre-BN Linear biases are omitted: they cancel exactly in (y - mean).
    @pl.when(pl.program_id(1) == 0)
    def _():
        def gen_block(h, w_ref, g_ref, be_ref):
            y = jnp.dot(h.astype(jnp.bfloat16), w_ref[...],
                        preferred_element_type=jnp.float32)
            return _bn_relu(y, g_ref[...], be_ref[...])

        h = gen_block(x_ref[...], w1_ref, g1_ref, be1_ref)
        h = gen_block(h, w2_ref, g2_ref, be2_ref)
        h = gen_block(h, w3_ref, g3_ref, be3_ref)
        h_ref[...] = h

    # Final layer, one 256-lane tile: Linear + Sigmoid, lane-dense store.
    y = jnp.dot(h_ref[...].astype(jnp.bfloat16), w4_ref[...],
                preferred_element_type=jnp.float32) + b4_ref[...]
    o_ref[...] = jax.nn.sigmoid(y)


def _num_tensorcores():
    """Best-effort TensorCore count (2 on v7x, 1 on v5e/v6e). Falls back to 1."""
    try:
        info = pltpu.get_tpu_info()
        for name in ("num_cores", "core_count", "num_tensorcores",
                     "tensorcores_per_chip"):
            v = getattr(info, name, None)
            if isinstance(v, int) and 1 <= v <= 8:
                return v
    except Exception:
        pass
    return 1


def linear_generator_forward(packed, x):
    B = x.shape[0]
    w1, g1, be1 = packed["l1"]
    w2, g2, be2 = packed["l2"]
    w3, g3, be3 = packed["l3"]
    w4, b4 = packed["l4"]
    n_pad = w4.shape[1]
    n_tiles = n_pad // TN
    hidden = w3.shape[1]

    # Lane-dense, bf16 latent input (zero-pad 64 -> 128; zeros are exact no-ops).
    xp = jnp.pad(x, ((0, 0), (0, K_PAD - x.shape[1]))).astype(jnp.bfloat16)

    # Split the output tiles across cores only if >1 TensorCore is present, so
    # single-TC chips never serially recompute the hidden stack.
    cores = _num_tensorcores()
    if n_tiles % cores != 0:
        cores = 1
    tpc = n_tiles // cores                       # tiles per core

    def full(a):        # whole-array block, fixed block index -> never re-DMA'd
        return pl.BlockSpec(a.shape, lambda c, t: (0,) * a.ndim)

    out = pl.pallas_call(
        fused_generator_kernel,
        out_shape=jax.ShapeDtypeStruct((B, n_pad), jnp.float32),
        grid_spec=pltpu.PrefetchScalarGridSpec(
            num_scalar_prefetch=0,
            grid=(cores, tpc),
            in_specs=[
                full(xp),
                full(w1), full(g1), full(be1),
                full(w2), full(g2), full(be2),
                full(w3), full(g3), full(be3),
                # Final-layer weight/bias stream per 256-lane tile so their DMA
                # overlaps the hidden-stack compute instead of the prologue.
                pl.BlockSpec((w4.shape[0], TN), lambda c, t: (0, c * tpc + t)),
                pl.BlockSpec((1, TN), lambda c, t: (0, c * tpc + t)),
            ],
            out_specs=pl.BlockSpec((B, TN), lambda c, t: (0, c * tpc + t)),
            scratch_shapes=[pltpu.VMEM((B, hidden), jnp.float32)],
        ),
        compiler_params=pltpu.CompilerParams(
            dimension_semantics=("parallel", "arbitrary")),
    )(xp, w1, g1, be1, w2, g2, be2, w3, g3, be3, w4, b4)
    return out[:, :packed["n_out"]]               # drop lane padding


# ----------------------------------------------------------------------------
# Parameter init (mirrors torch defaults: Linear W,b ~ U(+-1/sqrt(fan_in));
# BN gamma=1, beta=0) and packing into kernel-ready form (bf16 weights,
# K-padded first layer, lane-padded final layer, dead pre-BN biases dropped).
# ----------------------------------------------------------------------------
def init_params(key, input_dim, output_dim):
    dims = [input_dim, 256, 512, 1024, output_dim]
    params = []
    for i in range(4):
        fan_in, fan_out = dims[i], dims[i + 1]
        key, kw, kb = jax.random.split(key, 3)
        bound = 1.0 / jnp.sqrt(fan_in)
        w = jax.random.uniform(kw, (fan_in, fan_out), jnp.float32, -bound, bound)
        b = jax.random.uniform(kb, (1, fan_out), jnp.float32, -bound, bound)
        if i < 3:
            gamma = jnp.ones((1, fan_out), jnp.float32)
            beta = jnp.zeros((1, fan_out), jnp.float32)
            params.append((w, b, gamma, beta))
        else:
            params.append((w, b))
    return params


def pack_params(params):
    (w1, _b1, g1, be1), (w2, _b2, g2, be2), (w3, _b3, g3, be3), (w4, b4) = params
    # b1..b3 are mathematically dead under training-mode BatchNorm -> dropped.
    n_out = w4.shape[1]
    n_pad = pl.cdiv(n_out, TN) * TN
    w1p = jnp.pad(w1, ((0, K_PAD - w1.shape[0]), (0, 0)))      # pad K: 64 -> 128
    w4p = jnp.pad(w4, ((0, 0), (0, n_pad - n_out)))            # pad N: 784 -> 1024
    b4p = jnp.pad(b4, ((0, 0), (0, n_pad - n_out)))
    return {
        "l1": (w1p.astype(jnp.bfloat16), g1, be1),
        "l2": (w2.astype(jnp.bfloat16), g2, be2),
        "l3": (w3.astype(jnp.bfloat16), g3, be3),
        "l4": (w4p.astype(jnp.bfloat16), b4p),
        "n_out": n_out,
    }


# Pure-JAX reference at the same precision as the kernel (bf16-input /
# f32-accumulate matmuls).  The pre-BN biases are dropped here too: under
# training-mode BatchNorm they cancel exactly in (y - mean), so the function
# is identical to the torch module's forward.
def reference_forward(params, x):
    h = x
    for (w, _b, gamma, beta) in params[:3]:
        y = jnp.dot(h.astype(jnp.bfloat16), w.astype(jnp.bfloat16),
                    preferred_element_type=jnp.float32)
        mean = jnp.mean(y, axis=0, keepdims=True)
        var = jnp.mean(jnp.square(y - mean), axis=0, keepdims=True)
        y = (y - mean) * jax.lax.rsqrt(var + EPS) * gamma + beta
        h = jnp.maximum(y, 0.0)
    w, b = params[3]
    y = jnp.dot(h.astype(jnp.bfloat16), w.astype(jnp.bfloat16),
                preferred_element_type=jnp.float32) + b
    return jax.nn.sigmoid(y)


if __name__ == "__main__":
    key = jax.random.PRNGKey(0)
    batch = 8          # multiple of 8 (sublane) for clean tiling
    input_dim = 64     # latent noise dimension (kernel pads to 128 lanes)
    output_dim = 784   # e.g. 28x28 flattened image

    kp, kx = jax.random.split(key)
    params = init_params(kp, input_dim, output_dim)
    packed = pack_params(params)
    x = jax.random.normal(kx, (batch, input_dim), jnp.float32)

    out = jax.block_until_ready(linear_generator_forward(packed, x))
    ref = reference_forward(params, x)

    assert out.shape == (batch, output_dim)
    assert jnp.allclose(out, ref, atol=2e-3, rtol=2e-3), \
        float(jnp.max(jnp.abs(out - ref)))

    print("KERNEL_OK")
</pallas_src>

<mosaic_0001>
module attributes {stable_mosaic.version = 11 : i64} {
  func.func @fused_generator_kernel(%arg0: i32, %arg1: i32, %arg2: memref<8x128xbf16, #tpu.memory_space<vmem>>, %arg3: memref<128x256xbf16, #tpu.memory_space<vmem>>, %arg4: memref<1x256xf32, #tpu.memory_space<vmem>>, %arg5: memref<1x256xf32, #tpu.memory_space<vmem>>, %arg6: memref<256x512xbf16, #tpu.memory_space<vmem>>, %arg7: memref<1x512xf32, #tpu.memory_space<vmem>>, %arg8: memref<1x512xf32, #tpu.memory_space<vmem>>, %arg9: memref<512x1024xbf16, #tpu.memory_space<vmem>>, %arg10: memref<1x1024xf32, #tpu.memory_space<vmem>>, %arg11: memref<1x1024xf32, #tpu.memory_space<vmem>>, %arg12: memref<1024x256xbf16, #tpu.memory_space<vmem>>, %arg13: memref<1x256xf32, #tpu.memory_space<vmem>>, %arg14: memref<8x256xf32, #tpu.memory_space<vmem>>, %arg15: memref<8x1024xf32, #tpu.memory_space<vmem>>) attributes {dimension_semantics = [#tpu.dimension_semantics<parallel>, #tpu.dimension_semantics<arbitrary>], iteration_bounds = array<i64: 1, 4>, scalar_prefetch = 0 : i64, scratch_operands = 1 : i64, tpu.core_type = #tpu.core_type<tc>, window_params = [{pipeline_mode = #tpu.pipeline_mode<synchronous>, transform_indices = @transform_0, window_bounds = array<i64: 8, 128>}, {pipeline_mode = #tpu.pipeline_mode<synchronous>, transform_indices = @transform_1, window_bounds = array<i64: 128, 256>}, {pipeline_mode = #tpu.pipeline_mode<synchronous>, transform_indices = @transform_2, window_bounds = array<i64: 1, 256>}, {pipeline_mode = #tpu.pipeline_mode<synchronous>, transform_indices = @transform_3, window_bounds = array<i64: 1, 256>}, {pipeline_mode = #tpu.pipeline_mode<synchronous>, transform_indices = @transform_4, window_bounds = array<i64: 256, 512>}, {pipeline_mode = #tpu.pipeline_mode<synchronous>, transform_indices = @transform_5, window_bounds = array<i64: 1, 512>}, {pipeline_mode = #tpu.pipeline_mode<synchronous>, transform_indices = @transform_6, window_bounds = array<i64: 1, 512>}, {pipeline_mode = #tpu.pipeline_mode<synchronous>, transform_indices = @transform_7, window_bounds = array<i64: 512, 1024>}, {pipeline_mode = #tpu.pipeline_mode<synchronous>, transform_indices = @transform_8, window_bounds = array<i64: 1, 1024>}, {pipeline_mode = #tpu.pipeline_mode<synchronous>, transform_indices = @transform_9, window_bounds = array<i64: 1, 1024>}, {transform_indices = @transform_10, window_bounds = array<i64: 1024, 256>}, {transform_indices = @transform_11, window_bounds = array<i64: 1, 256>}, {transform_indices = @transform_12, window_bounds = array<i64: 8, 256>}]} {
    %c0_i32 = arith.constant 0 : i32
    %0 = arith.cmpi eq, %arg1, %c0_i32 : i32
    %1 = arith.extui %0 : i1 to i32
    %c0_i32_0 = arith.constant 0 : i32
    %2 = arith.cmpi ne, %1, %c0_i32_0 : i32
    scf.if %2 {
      %c0_9 = arith.constant 0 : index
      %c0_10 = arith.constant 0 : index
      %16 = vector.load %arg2[%c0_9, %c0_10] : memref<8x128xbf16, #tpu.memory_space<vmem>>, vector<8x128xbf16>
      %c0_11 = arith.constant 0 : index
      %c0_12 = arith.constant 0 : index
      %17 = vector.load %arg3[%c0_11, %c0_12] : memref<128x256xbf16, #tpu.memory_space<vmem>>, vector<128x256xbf16>
      %cst_13 = arith.constant dense<0.000000e+00> : vector<8x256xf32>
      %18 = tpu.matmul %16, %17, %cst_13 {dimension_numbers = #tpu.dot_dimension_numbers<[1], [0], [0], [1], [0, 0, 1, 1], [], []>} : vector<8x128xbf16>, vector<128x256xbf16>, vector<8x256xf32> -> vector<8x256xf32>
      %c0_14 = arith.constant 0 : index
      %c0_15 = arith.constant 0 : index
      %19 = vector.load %arg4[%c0_14, %c0_15] : memref<1x256xf32, #tpu.memory_space<vmem>>, vector<1x256xf32>
      %c0_16 = arith.constant 0 : index
      %c0_17 = arith.constant 0 : index
      %20 = vector.load %arg5[%c0_16, %c0_17] : memref<1x256xf32, #tpu.memory_space<vmem>>, vector<1x256xf32>
      %cst_18 = arith.constant dense<0.000000e+00> : vector<256xf32>
      %21 = vector.multi_reduction <add>, %18, %cst_18 [0] : vector<8x256xf32> to vector<256xf32>
      %22 = vector.shape_cast %21 : vector<256xf32> to vector<1x256xf32>
      %cst_19 = arith.constant 8.000000e+00 : f32
      %23 = vector.broadcast %cst_19 : f32 to vector<1x256xf32>
      %24 = arith.divf %22, %23 : vector<1x256xf32>
      %25 = vector.broadcast %24 : vector<1x256xf32> to vector<8x256xf32>
      %26 = arith.subf %18, %25 : vector<8x256xf32>
      %27 = arith.mulf %26, %26 : vector<8x256xf32>
      %cst_20 = arith.constant dense<0.000000e+00> : vector<256xf32>
      %28 = vector.multi_reduction <add>, %27, %cst_20 [0] : vector<8x256xf32> to vector<256xf32>
      %29 = vector.shape_cast %28 : vector<256xf32> to vector<1x256xf32>
      %cst_21 = arith.constant 8.000000e+00 : f32
      %30 = vector.broadcast %cst_21 : f32 to vector<1x256xf32>
      %31 = arith.divf %29, %30 : vector<1x256xf32>
      %32 = vector.broadcast %24 : vector<1x256xf32> to vector<8x256xf32>
      %33 = arith.subf %18, %32 : vector<8x256xf32>
      %cst_22 = arith.constant 9.99999974E-6 : f32
      %34 = vector.broadcast %cst_22 : f32 to vector<1x256xf32>
      %35 = arith.addf %31, %34 : vector<1x256xf32>
      %36 = math.rsqrt %35 : vector<1x256xf32>
      %37 = vector.broadcast %36 : vector<1x256xf32> to vector<8x256xf32>
      %38 = arith.mulf %33, %37 : vector<8x256xf32>
      %39 = vector.broadcast %19 : vector<1x256xf32> to vector<8x256xf32>
      %40 = arith.mulf %38, %39 : vector<8x256xf32>
      %41 = vector.broadcast %20 : vector<1x256xf32> to vector<8x256xf32>
      %42 = arith.addf %40, %41 : vector<8x256xf32>
      %cst_23 = arith.constant 0.000000e+00 : f32
      %43 = vector.broadcast %cst_23 : f32 to vector<8x256xf32>
      %44 = arith.maximumf %42, %43 : vector<8x256xf32>
      %45 = arith.truncf %44 : vector<8x256xf32> to vector<8x256xbf16>
      %c0_24 = arith.constant 0 : index
      %c0_25 = arith.constant 0 : index
      %46 = vector.load %arg6[%c0_24, %c0_25] : memref<256x512xbf16, #tpu.memory_space<vmem>>, vector<256x512xbf16>
      %cst_26 = arith.constant dense<0.000000e+00> : vector<8x512xf32>
      %47 = tpu.matmul %45, %46, %cst_26 {dimension_numbers = #tpu.dot_dimension_numbers<[1], [0], [0], [1], [0, 0, 1, 1], [], []>} : vector<8x256xbf16>, vector<256x512xbf16>, vector<8x512xf32> -> vector<8x512xf32>
      %c0_27 = arith.constant 0 : index
      %c0_28 = arith.constant 0 : index
      %48 = vector.load %arg7[%c0_27, %c0_28] : memref<1x512xf32, #tpu.memory_space<vmem>>, vector<1x512xf32>
      %c0_29 = arith.constant 0 : index
      %c0_30 = arith.constant 0 : index
      %49 = vector.load %arg8[%c0_29, %c0_30] : memref<1x512xf32, #tpu.memory_space<vmem>>, vector<1x512xf32>
      %cst_31 = arith.constant dense<0.000000e+00> : vector<512xf32>
      %50 = vector.multi_reduction <add>, %47, %cst_31 [0] : vector<8x512xf32> to vector<512xf32>
      %51 = vector.shape_cast %50 : vector<512xf32> to vector<1x512xf32>
      %cst_32 = arith.constant 8.000000e+00 : f32
      %52 = vector.broadcast %cst_32 : f32 to vector<1x512xf32>
      %53 = arith.divf %51, %52 : vector<1x512xf32>
      %54 = vector.broadcast %53 : vector<1x512xf32> to vector<8x512xf32>
      %55 = arith.subf %47, %54 : vector<8x512xf32>
      %56 = arith.mulf %55, %55 : vector<8x512xf32>
      %cst_33 = arith.constant dense<0.000000e+00> : vector<512xf32>
      %57 = vector.multi_reduction <add>, %56, %cst_33 [0] : vector<8x512xf32> to vector<512xf32>
      %58 = vector.shape_cast %57 : vector<512xf32> to vector<1x512xf32>
      %cst_34 = arith.constant 8.000000e+00 : f32
      %59 = vector.broadcast %cst_34 : f32 to vector<1x512xf32>
      %60 = arith.divf %58, %59 : vector<1x512xf32>
      %61 = vector.broadcast %53 : vector<1x512xf32> to vector<8x512xf32>
      %62 = arith.subf %47, %61 : vector<8x512xf32>
      %cst_35 = arith.constant 9.99999974E-6 : f32
      %63 = vector.broadcast %cst_35 : f32 to vector<1x512xf32>
      %64 = arith.addf %60, %63 : vector<1x512xf32>
      %65 = math.rsqrt %64 : vector<1x512xf32>
      %66 = vector.broadcast %65 : vector<1x512xf32> to vector<8x512xf32>
      %67 = arith.mulf %62, %66 : vector<8x512xf32>
      %68 = vector.broadcast %48 : vector<1x512xf32> to vector<8x512xf32>
      %69 = arith.mulf %67, %68 : vector<8x512xf32>
      %70 = vector.broadcast %49 : vector<1x512xf32> to vector<8x512xf32>
      %71 = arith.addf %69, %70 : vector<8x512xf32>
      %cst_36 = arith.constant 0.000000e+00 : f32
      %72 = vector.broadcast %cst_36 : f32 to vector<8x512xf32>
      %73 = arith.maximumf %71, %72 : vector<8x512xf32>
      %74 = arith.truncf %73 : vector<8x512xf32> to vector<8x512xbf16>
      %c0_37 = arith.constant 0 : index
      %c0_38 = arith.constant 0 : index
      %75 = vector.load %arg9[%c0_37, %c0_38] : memref<512x1024xbf16, #tpu.memory_space<vmem>>, vector<512x1024xbf16>
      %cst_39 = arith.constant dense<0.000000e+00> : vector<8x1024xf32>
      %76 = tpu.matmul %74, %75, %cst_39 {dimension_numbers = #tpu.dot_dimension_numbers<[1], [0], [0], [1], [0, 0, 1, 1], [], []>} : vector<8x512xbf16>, vector<512x1024xbf16>, vector<8x1024xf32> -> vector<8x1024xf32>
      %c0_40 = arith.constant 0 : index
      %c0_41 = arith.constant 0 : index
      %77 = vector.load %arg10[%c0_40, %c0_41] : memref<1x1024xf32, #tpu.memory_space<vmem>>, vector<1x1024xf32>
      %c0_42 = arith.constant 0 : index
      %c0_43 = arith.constant 0 : index
      %78 = vector.load %arg11[%c0_42, %c0_43] : memref<1x1024xf32, #tpu.memory_space<vmem>>, vector<1x1024xf32>
      %cst_44 = arith.constant dense<0.000000e+00> : vector<1024xf32>
      %79 = vector.multi_reduction <add>, %76, %cst_44 [0] : vector<8x1024xf32> to vector<1024xf32>
      %80 = vector.shape_cast %79 : vector<1024xf32> to vector<1x1024xf32>
      %cst_45 = arith.constant 8.000000e+00 : f32
      %81 = vector.broadcast %cst_45 : f32 to vector<1x1024xf32>
      %82 = arith.divf %80, %81 : vector<1x1024xf32>
      %83 = vector.broadcast %82 : vector<1x1024xf32> to vector<8x1024xf32>
      %84 = arith.subf %76, %83 : vector<8x1024xf32>
      %85 = arith.mulf %84, %84 : vector<8x1024xf32>
      %cst_46 = arith.constant dense<0.000000e+00> : vector<1024xf32>
      %86 = vector.multi_reduction <add>, %85, %cst_46 [0] : vector<8x1024xf32> to vector<1024xf32>
      %87 = vector.shape_cast %86 : vector<1024xf32> to vector<1x1024xf32>
      %cst_47 = arith.constant 8.000000e+00 : f32
      %88 = vector.broadcast %cst_47 : f32 to vector<1x1024xf32>
      %89 = arith.divf %87, %88 : vector<1x1024xf32>
      %90 = vector.broadcast %82 : vector<1x1024xf32> to vector<8x1024xf32>
      %91 = arith.subf %76, %90 : vector<8x1024xf32>
      %cst_48 = arith.constant 9.99999974E-6 : f32
      %92 = vector.broadcast %cst_48 : f32 to vector<1x1024xf32>
      %93 = arith.addf %89, %92 : vector<1x1024xf32>
      %94 = math.rsqrt %93 : vector<1x1024xf32>
      %95 = vector.broadcast %94 : vector<1x1024xf32> to vector<8x1024xf32>
      %96 = arith.mulf %91, %95 : vector<8x1024xf32>
      %97 = vector.broadcast %77 : vector<1x1024xf32> to vector<8x1024xf32>
      %98 = arith.mulf %96, %97 : vector<8x1024xf32>
      %99 = vector.broadcast %78 : vector<1x1024xf32> to vector<8x1024xf32>
      %100 = arith.addf %98, %99 : vector<8x1024xf32>
      %cst_49 = arith.constant 0.000000e+00 : f32
      %101 = vector.broadcast %cst_49 : f32 to vector<8x1024xf32>
      %102 = arith.maximumf %100, %101 : vector<8x1024xf32>
      %c0_50 = arith.constant 0 : index
      %c0_51 = arith.constant 0 : index
      %103 = vector.load %arg15[%c0_50, %c0_51] : memref<8x1024xf32, #tpu.memory_space<vmem>>, vector<8x1024xf32>
      tpu.vector_store %arg15[%c0_50, %c0_51], %102 {strides = array<i32>} : memref<8x1024xf32, #tpu.memory_space<vmem>>, vector<8x1024xf32>,
    } else {
    }
    %c0 = arith.constant 0 : index
    %c0_1 = arith.constant 0 : index
    %3 = vector.load %arg15[%c0, %c0_1] : memref<8x1024xf32, #tpu.memory_space<vmem>>, vector<8x1024xf32>
    %4 = arith.truncf %3 : vector<8x1024xf32> to vector<8x1024xbf16>
    %c0_2 = arith.constant 0 : index
    %c0_3 = arith.constant 0 : index
    %5 = vector.load %arg12[%c0_2, %c0_3] : memref<1024x256xbf16, #tpu.memory_space<vmem>>, vector<1024x256xbf16>
    %cst = arith.constant dense<0.000000e+00> : vector<8x256xf32>
    %6 = tpu.matmul %4, %5, %cst {dimension_numbers = #tpu.dot_dimension_numbers<[1], [0], [0], [1], [0, 0, 1, 1], [], []>} : vector<8x1024xbf16>, vector<1024x256xbf16>, vector<8x256xf32> -> vector<8x256xf32>
    %c0_4 = arith.constant 0 : index
    %c0_5 = arith.constant 0 : index
    %7 = vector.load %arg13[%c0_4, %c0_5] : memref<1x256xf32, #tpu.memory_space<vmem>>, vector<1x256xf32>
    %8 = vector.broadcast %7 : vector<1x256xf32> to vector<8x256xf32>
    %9 = arith.addf %6, %8 : vector<8x256xf32>
    %10 = arith.negf %9 : vector<8x256xf32>
    %11 = math.exp %10 : vector<8x256xf32>
    %cst_6 = arith.constant 1.000000e+00 : f32
    %12 = vector.broadcast %cst_6 : f32 to vector<8x256xf32>
    %13 = arith.addf %12, %11 : vector<8x256xf32>
    %14 = arith.divf %12, %13 : vector<8x256xf32>
    %c0_7 = arith.constant 0 : index
    %c0_8 = arith.constant 0 : index
    %15 = vector.load %arg14[%c0_7, %c0_8] : memref<8x256xf32, #tpu.memory_space<vmem>>, vector<8x256xf32>
    tpu.vector_store %arg14[%c0_7, %c0_8], %14 {strides = array<i32>} : memref<8x256xf32, #tpu.memory_space<vmem>>, vector<8x256xf32>,
    return
  }
  func.func @transform_0(%arg0: i32, %arg1: i32) -> (i32, i32) {
    %c0_i32 = arith.constant 0 : i32
    %c0_i32_0 = arith.constant 0 : i32
    %c0_i32_1 = arith.constant 0 : i32
    return %c0_i32, %c0_i32_0 : i32, i32
  }
  func.func @transform_1(%arg0: i32, %arg1: i32) -> (i32, i32) {
    %c0_i32 = arith.constant 0 : i32
    %c0_i32_0 = arith.constant 0 : i32
    %c0_i32_1 = arith.constant 0 : i32
    return %c0_i32, %c0_i32_0 : i32, i32
  }
  func.func @transform_2(%arg0: i32, %arg1: i32) -> (i32, i32) {
    %c0_i32 = arith.constant 0 : i32
    %c0_i32_0 = arith.constant 0 : i32
    %c0_i32_1 = arith.constant 0 : i32
    return %c0_i32, %c0_i32_0 : i32, i32
  }
  func.func @transform_3(%arg0: i32, %arg1: i32) -> (i32, i32) {
    %c0_i32 = arith.constant 0 : i32
    %c0_i32_0 = arith.constant 0 : i32
    %c0_i32_1 = arith.constant 0 : i32
    return %c0_i32, %c0_i32_0 : i32, i32
  }
  func.func @transform_4(%arg0: i32, %arg1: i32) -> (i32, i32) {
    %c0_i32 = arith.constant 0 : i32
    %c0_i32_0 = arith.constant 0 : i32
    %c0_i32_1 = arith.constant 0 : i32
    return %c0_i32, %c0_i32_0 : i32, i32
  }
  func.func @transform_5(%arg0: i32, %arg1: i32) -> (i32, i32) {
    %c0_i32 = arith.constant 0 : i32
    %c0_i32_0 = arith.constant 0 : i32
    %c0_i32_1 = arith.constant 0 : i32
    return %c0_i32, %c0_i32_0 : i32, i32
  }
  func.func @transform_6(%arg0: i32, %arg1: i32) -> (i32, i32) {
    %c0_i32 = arith.constant 0 : i32
    %c0_i32_0 = arith.constant 0 : i32
    %c0_i32_1 = arith.constant 0 : i32
    return %c0_i32, %c0_i32_0 : i32, i32
  }
  func.func @transform_7(%arg0: i32, %arg1: i32) -> (i32, i32) {
    %c0_i32 = arith.constant 0 : i32
    %c0_i32_0 = arith.constant 0 : i32
    %c0_i32_1 = arith.constant 0 : i32
    return %c0_i32, %c0_i32_0 : i32, i32
  }
  func.func @transform_8(%arg0: i32, %arg1: i32) -> (i32, i32) {
    %c0_i32 = arith.constant 0 : i32
    %c0_i32_0 = arith.constant 0 : i32
    %c0_i32_1 = arith.constant 0 : i32
    return %c0_i32, %c0_i32_0 : i32, i32
  }
  func.func @transform_9(%arg0: i32, %arg1: i32) -> (i32, i32) {
    %c0_i32 = arith.constant 0 : i32
    %c0_i32_0 = arith.constant 0 : i32
    %c0_i32_1 = arith.constant 0 : i32
    return %c0_i32, %c0_i32_0 : i32, i32
  }
  func.func @transform_10(%arg0: i32, %arg1: i32) -> (i32, i32) {
    %c4_i32 = arith.constant 4 : i32
    %0 = arith.muli %arg0, %c4_i32 : i32
    %1 = arith.addi %0, %arg1 : i32
    %c0_i32 = arith.constant 0 : i32
    %c0_i32_0 = arith.constant 0 : i32
    return %c0_i32, %1 : i32, i32
  }
  func.func @transform_11(%arg0: i32, %arg1: i32) -> (i32, i32) {
    %c4_i32 = arith.constant 4 : i32
    %0 = arith.muli %arg0, %c4_i32 : i32
    %1 = arith.addi %0, %arg1 : i32
    %c0_i32 = arith.constant 0 : i32
    %c0_i32_0 = arith.constant 0 : i32
    return %c0_i32, %1 : i32, i32
  }
  func.func @transform_12(%arg0: i32, %arg1: i32) -> (i32, i32) {
    %c4_i32 = arith.constant 4 : i32
    %0 = arith.muli %arg0, %c4_i32 : i32
    %1 = arith.addi %0, %arg1 : i32
    %c0_i32 = arith.constant 0 : i32
    %c0_i32_0 = arith.constant 0 : i32
    return %c0_i32, %1 : i32, i32
  }
}

</mosaic_0001>

<bundles_post_ra>
// kernel: tpu_custom_call.1
= control target key start
LH: loop header
LB: loop body
LE: loop exit
PB: predicated region body
PF: predicated region fallthrough
CT: control target
= control target key end

     0   :  { %s6860_s0 = inlined_call_operand.hbm [shape: bf16[8,128], index: 0, kind: input, shape index: {}]   ;;  %s6861_s1 = inlined_call_operand.hbm [shape: bf16[128,256], index: 1, kind: input, shape index: {}]   ;;  %s6862_s2 = inlined_call_operand.hbm [shape: f32[1,256], index: 2, kind: input, shape index: {}]   ;;  %s6863_s3 = inlined_call_operand.hbm [shape: f32[1,256], index: 3, kind: input, shape index: {}]   ;;  %s6864_s4 = inlined_call_operand.hbm [shape: bf16[256,512], index: 4, kind: input, shape index: {}]   ;;  %s6865_s5 = inlined_call_operand.hbm [shape: f32[1,512], index: 5, kind: input, shape index: {}]   ;;  %s6866_s6 = inlined_call_operand.hbm [shape: f32[1,512], index: 6, kind: input, shape index: {}]   ;;  %s6867_s7 = inlined_call_operand.hbm [shape: bf16[512,1024], index: 7, kind: input, shape index: {}]   ;;  %s6868_s8 = inlined_call_operand.hbm [shape: f32[1,1024], index: 8, kind: input, shape index: {}]   ;;  %s6869_s9 = inlined_call_operand.hbm [shape: f32[1,1024], index: 9, kind: input, shape index: {}]   ;;  %s6870_s10 = inlined_call_operand.hbm [shape: bf16[1024,1024], index: 10, kind: input, shape index: {}]   ;;  %s6871_s11 = inlined_call_operand.hbm [shape: f32[1,1024], index: 11, kind: input, shape index: {}]   ;;  %s6872_s12 = inlined_call_operand.hbm [shape: f32[8,1024], index: 12, kind: output, shape index: {}]  }
   0x1   :  { %6890 = sst [smem:[#allocation36_spill]] %s6860_s0 }
   0x2   :  { %6891 = sst [smem:[#allocation37_spill]] %s6861_s1 }
   0x3   :  { %6892 = sst [smem:[#allocation38_spill]] %s6863_s3 }
   0x4   :  { %6893 = sst [smem:[#allocation39_spill]] %s6865_s5 }
   0x5   :  { %6894 = sst [smem:[#allocation40_spill]] %s6867_s7 }
   0x6   :  { %6895 = sst [smem:[#allocation41_spill]] %s6872_s12 }
   0x7   :  { %17 = vsyncpa [#allocation4], 0 }
   0x8   :  { %18 = vsyncpa [#allocation7], 0 }
   0x9   :  { %19 = vsyncpa [#allocation10], 0 }
   0xa   :  { %20 = vsyncpa [#allocation13], 0 }
   0xb   :  { %21 = vsyncpa [#allocation16], 0 }
   0xc   :  { %22 = vsyncpa [#allocation19], 0 }
   0xd   :  { %23 = vsyncpa [#allocation5], 0 }
   0xe   :  { %25 = vsyncpa [#allocation5 + $0x1], 0  ;;  %s6310_s21 = smov 0   ;;  %s6312_s22 = smov 0  }
   0xf   :  { %s6314_s23 = smov 0   ;;  %s6316_s24 = smov 0  }
  0x10   :  { %s6318_s25 = smov 0   ;;  %s6320_s26 = smov 0  }
  0x11 LB: > { %6896 = sst [smem:[#allocation31_spill]] %s6203_s21  ;;  %s6341_s27 = sadd.s32 4294967295, %s6223_s26   ;;  %s6223_s26 = sphi %s6320_s26, %s31_s26   ;;  %s6219_s25 = sphi %s6318_s25, %s6947_s25   ;;  %s6215_s24 = sphi %s6316_s24, %s6946_s24   ;;  %s6211_s23 = sphi %s6314_s23, %s6945_s23   ;;  %s6207_s22 = sphi %s6312_s22, %s6944_s22   ;;  %s6203_s21 = sphi %s6310_s21, %s6943_s21  }
  0x12   : > { %p4773_p0 = scmp.ge.s32.totalorder %s6223_s26, 1  ;;  %p6873_p1 = scmp.eq.s32.totalorder %s6341_s27, 0 }
  0x13   : > { %p348_p2 = scmp.lt.s32.totalorder %s6223_s26, 5  ;;  %s6225_s29 = smov [#allocation3]  }
  0x14   : > { %s361_s30 = sshll.u32 %s6225_s29, 4  ;;  %s6226_s13 = smov [#allocation6]   ;;  %s362_s30 = int_to_ptr.vmem [resolvable:$true] %s361_s30 }
  0x15   : > { %p6346_p3 = pnand %p4773_p0, %p348_p2  ;;  %s371_s14 = sshll.u32 %s6226_s13, 4  ;;  %s372_s14 = int_to_ptr.vmem [resolvable:$true] %s371_s14 }
  0x16   : > { %s6227_s16 = smov [#allocation9]   ;;  %s5814_s19 = scalar_lea.vmem %s362_s30, 64 }
  0x17   : > { %s6897_s28 = scalar_select %p6346_p3, 1, 0 }
  0x18   : > { %p5326_p4 = pneg %p6346_p3  ;;  %s396_s17 = sshll.u32 %s6227_s16, 4  ;;  %s397_s17 = int_to_ptr.vmem [resolvable:$true] %s396_s17 }
  0x19   : > { %p5815_p7 = scmp.ne.s32.totalorder %s362_s30, %s5814_s19  ;;  %p5822_p10 = scmp.lt.s32.totalorder %s362_s30, %s362_s30 }
  0x1a   : > { %p6354_p5 = pnand %p5326_p4, %p6873_p1  ;;  %p5823_p11 = scmp.lt.s32.totalorder %s5814_s19, %s5814_s19 }
  0x1c   : > { %p6360_p6 = pneg %p6354_p5  ;;  %p5824_p12 = por %p5823_p11, %p5822_p10 }
  0x1e   : > { %p5817_p8 = pnand %p5815_p7, %p6360_p6 }
  0x20   : > { %p5818_p9 = pneg %p5817_p8 }
  0x22   : > { %p5825_p13 = pnand %p5824_p12, %p5818_p9 }
  0x24   : > { %5828 = shalt.err (!%p5825_p13)
}
  0x25   : > { %s6900_s0 = sld [smem:[#allocation36_spill]]  ;;  %s5840_s13 = scalar_lea.vmem %s372_s14, 2048 }
  0x26   : > { %p5841_p0 = scmp.ne.s32.totalorder %s372_s14, %s5840_s13  ;;  %p5848_p1 = scmp.lt.s32.totalorder %s372_s14, %s372_s14 }
  0x27   : > { %p5849_p7 = scmp.lt.s32.totalorder %s5840_s13, %s5840_s13 }
  0x28   : > { %p5843_p2 = pnand %p5841_p0, %p6360_p6 }
  0x29   : > { %p5850_p8 = por %p5849_p7, %p5848_p1 }
  0x2a   : > { %p5844_p4 = pneg %p5843_p2 }
  0x2b   : > { %5329 = dma.hbm_to_vmem [thread:$0]  (!%p6354_p5), %s6900_s0, 64, %s362_s30, [#allocation4]  }
  0x2c   : > { %p5851_p3 = pnand %p5850_p8, %p5844_p4 }
  0x2e   : > { %5854 = shalt.err (!%p5851_p3)
}
  0x2f   : > { %s6875_s16 = smov 128   ;;  %s6876_s19 = smov 8  }
  0x30   : > { %s6901_s1 = sld [smem:[#allocation37_spill]]  ;;  %s5866_s29 = scalar_lea.vmem %s397_s17, 32 }
  0x31   : > { %p5867_p9 = scmp.ne.s32.totalorder %s397_s17, %s5866_s29  ;;  %p5874_p11 = scmp.lt.s32.totalorder %s397_s17, %s397_s17 }
  0x32   : > { %p5875_p3 = scmp.lt.s32.totalorder %s5866_s29, %s5866_s29 }
  0x33   : > { %p5869_p10 = pnand %p5867_p9, %p6360_p6 }
  0x34   : > { %p5876_p12 = por %p5875_p3, %p5874_p11 }
  0x35   : > { %p5870_p1 = pneg %p5869_p10 }
  0x36   : > { %5332 = dma.hbm_to_vmem [thread:$0]  (!%p6354_p5), %s6901_s1, 2048, %s372_s14, [#allocation7], %s6875_s16, %s6875_s16, %s6876_s19  }
  0x37   : > { %p5877_p13 = pnand %p5876_p12, %p5870_p1 }
  0x39   : > { %5880 = shalt.err (!%p5877_p13)
}
  0x3a   : > { %s6902_s3 = sld [smem:[#allocation38_spill]]  ;;  %s6230_s20 = smov [#allocation12]  }
  0x3b   : > { %s420_s14 = sshll.u32 %s6230_s20, 4  ;;  %s6231_s30 = smov [#allocation15]   ;;  %s421_s14 = int_to_ptr.vmem [resolvable:$true] %s420_s14 }
  0x3c   : > { %s441_s16 = sshll.u32 %s6231_s30, 4  ;;  %s5892_s19 = scalar_lea.vmem %s421_s14, 64  ;;  %s442_s16 = int_to_ptr.vmem [resolvable:$true] %s441_s16 }
  0x3d   : > { %p5893_p0 = scmp.ne.s32.totalorder %s421_s14, %s5892_s19  ;;  %p5900_p7 = scmp.lt.s32.totalorder %s421_s14, %s421_s14 }
  0x3e   : > { %p5901_p8 = scmp.lt.s32.totalorder %s5892_s19, %s5892_s19 }
  0x3f   : > { %p5895_p2 = pnand %p5893_p0, %p6360_p6 }
  0x40   : > { %5338 = dma.hbm_to_vmem [thread:$0]  (!%p6354_p5), %s6902_s3, 32, %s397_s17, [#allocation10]  }
  0x41   : > { %p5896_p4 = pneg %p5895_p2  ;;  %p5902_p9 = por %p5901_p8, %p5900_p7 }
  0x43   : > { %p5903_p10 = pnand %p5902_p9, %p5896_p4 }
  0x45   : > { %5906 = shalt.err (!%p5903_p10)
}
  0x46   : > { %s6903_s5 = sld [smem:[#allocation39_spill]]  ;;  %s5918_s17 = scalar_lea.vmem %s442_s16, 32768 }
  0x47   : > { %p5919_p1 = scmp.ne.s32.totalorder %s442_s16, %s5918_s17  ;;  %p5926_p12 = scmp.lt.s32.totalorder %s442_s16, %s442_s16 }
  0x48   : > { %p5927_p13 = scmp.lt.s32.totalorder %s5918_s17, %s5918_s17 }
  0x49   : > { %p5921_p11 = pnand %p5919_p1, %p6360_p6 }
  0x4a   : > { %p5928_p0 = por %p5927_p13, %p5926_p12 }
  0x4b   : > { %p5922_p3 = pneg %p5921_p11 }
  0x4c   : > { %5344 = dma.hbm_to_vmem [thread:$0]  (!%p6354_p5), %s6903_s5, 64, %s421_s14, [#allocation13]  }
  0x4d   : > { %p5929_p2 = pnand %p5928_p0, %p5922_p3 }
  0x4f   : > { %5932 = shalt.err (!%p5929_p2)
}
  0x50   : > { %s6877_s19 = smov 512   ;;  %s6233_s13 = smov 32  }
  0x51   : > { %s6904_s7 = sld [smem:[#allocation40_spill]]  ;;  %s4772_s30 = sadd.s32 4294967294, %s6223_s26  }
  0x52   : > { %s40_s0 = sadd.s32 1, %s6219_s25  ;;  %s264_s29 = sadd.s32 1, %s6211_s23 }
  0x53   : > { %p41_p4 = scmp.ge.s32.totalorder %s40_s0, 4  ;;  %p271_p7 = scmp.ne.s32.totalorder %s6211_s23, %s6207_s22 }
  0x54   : > { %p272_p8 = scmp.eq.s32.totalorder %s6223_s26, 0  ;;  %p277_p9 = scmp.ne.s32.totalorder %s6207_s22, %s6203_s21 }
  0x55   : > { %s6949_s0 = smov (%p41_p4, %s40_s0), 0  ;;  %p6907_p1 = scmp.eq.s32.totalorder %s6341_s27, 0 }
  0x56   : > { %6905 = sst [smem:[#allocation32_spill]] %s6949_s0  ;;  %p6414_p10 = por %p272_p8, %p271_p7 }
  0x57   : > { %5350 = dma.hbm_to_vmem [thread:$0]  (!%p6354_p5), %s6904_s7, 32768, %s442_s16, [#allocation16], %s6877_s19, %s6877_s19, %s6233_s13  }
  0x58   : > { %p6420_p11 = por %p6907_p1, %p277_p9  ;;  %s261_s13 = ssub.s32 %s6219_s25, %s6949_s0 }
  0x59   : > { %p335_p3 = scmp.eq.s32.totalorder %s6341_s27, 3  ;;  %p262_p12 = scmp.eq.s32.totalorder %s261_s13, 0 }
  0x5a   : > { %s6908_s16 = scalar_select %p6420_p11, 1, 0 }
  0x5b   : > { %p341_p13 = scmp.eq.s32.totalorder %s4772_s30, 3  ;;  %p6427_p0 = por %p335_p3, %p271_p7 }
  0x5c   : > { %p5378_p2 = scmp.lt.s32.totalorder %s6223_s26, 4  ;;  %s477_s1 = sand.u32 1, %s6223_s26  }
  0x5d   : > { %s6909_s20 = scalar_select %p6427_p0, 1, 0 }
  0x5e   : > { %s6433_s14 = scalar_select %p262_p12, %s6211_s23, %s264_s29  }
  0x5f   : > { %6910 = sst [smem:[#allocation33_spill]] %s6909_s20  ;;  %p6435_p4 = por %p341_p13, %p277_p9 }
  0x60   : > { %6911 = sst [smem:[#allocation34_spill]] %s6433_s14  ;;  %s6884_s3 = sand.u32 1, %s6211_s23  }
  0x61   : > { %s6912_s19 = scalar_select %p6435_p4, 1, 0 }
  0x62   : > { %s4785_s5 = sshll.u32 %s6884_s3, 10  ;;  %s5277_s7 = sshll.u32 %s6219_s25, 7 }
  0x63   : > { %6913 = sst [smem:[#allocation35_spill]] %s6912_s19  ;;  %s489_s30 = scalar_lea.hbm %s6870_s10, %s5277_s7 }
  0x64   : > { %s481_s13 = scalar_lea.vmem [#allocation20], %s4785_s5  ;;  %p6449_p7 = pnand %p5378_p2, %p6414_p10 }
  0x65   : > { %s490_s12 = sshll.u32 %s481_s13, 4  ;;  %s6234_s29 = smov [#allocation8]   ;;  %s491_s12 = int_to_ptr.vmem [resolvable:$true] %s490_s12 }
  0x66   : > { %s6914_s20 = scalar_select %p6449_p7, 1, 0 }
  0x67   : > { %s385_s14 = sshll.u32 %s6234_s29, 4  ;;  %s6453_s19 = scalar_lea.sflag [#allocation4], %s477_s1  ;;  %s386_s14 = int_to_ptr.vmem [resolvable:$true] %s385_s14 }
  0x68   : > { %p6885_p8 = pneg %p6449_p7  ;;  %s5946_s3 = scalar_lea.vmem %s491_s12, 16384 }
  0x69   : > { %p5947_p9 = scmp.ne.s32.totalorder %s491_s12, %s5946_s3  ;;  %s6235_s5 = smov [#allocation20]  }
  0x6a   : > { %s5951_s7 = sshll.u32 %s6235_s5, 4  ;;  %s5952_s7 = int_to_ptr.vmem [resolvable:$false] %s5951_s7 }
  0x6b   : > { %p5949_p1 = pnand %p5947_p9, %p6885_p8  ;;  %s5953_s21 = scalar_lea.vmem %s5952_s7, 32768 }
  0x6c   : > { %p5954_p10 = scmp.lt.s32.totalorder %s491_s12, %s5952_s7  ;;  %p5955_p12 = scmp.lt.s32.totalorder %s5953_s21, %s5946_s3 }
  0x6d   : > { %p5950_p3 = pneg %p5949_p1 }
  0x6e   : > { %p5956_p13 = por %p5955_p12, %p5954_p10 }
  0x70   : > { %p5957_p2 = pnand %p5956_p13, %p5950_p3 }
  0x72   : > { %5960 = shalt.err (!%p5957_p2)
}
  0x73   : > { %s6915_s1 = smov 8   ;;  %s6916_s0 = smov 128  }
  0x74   : > { %s6917_s17 = smov 512   ;;  %s5972_s13 = scalar_lea.vmem %s386_s14, 32 }
  0x75   : > { %5360 = dma.hbm_to_vmem [thread:$0]  (!%p6449_p7), %s489_s30, 16384, %s491_s12, %s6453_s19, %s6917_s17, %s6916_s0, %s6915_s1  }
  0x76   : > { %p5973_p9 = scmp.ne.s32.totalorder %s386_s14, %s5972_s13  ;;  %p5980_p4 = scmp.lt.s32.totalorder %s386_s14, %s386_s14 }
  0x77   : > { %p5981_p0 = scmp.lt.s32.totalorder %s5972_s13, %s5972_s13 }
  0x78   : > { %p5975_p1 = pnand %p5973_p9, %p6360_p6 }
  0x79   : > { %p5982_p11 = por %p5981_p0, %p5980_p4 }
  0x7a   : > { %p5976_p8 = pneg %p5975_p1 }
  0x7c   : > { %p5983_p10 = pnand %p5982_p11, %p5976_p8 }
  0x7e   : > { %5986 = shalt.err (!%p5983_p10)
}
  0x7f   : > { %5335 = dma.hbm_to_vmem [thread:$0]  (!%p6354_p5), %s6862_s2, 32, %s386_s14, [#allocation7]  }
  0x80   : > { %s6236_s5 = smov [#allocation11]  }
  0x81   : > { %s406_s12 = sshll.u32 %s6236_s5, 4  ;;  %s407_s12 = int_to_ptr.vmem [resolvable:$true] %s406_s12 }
  0x82   : > { %s5998_s30 = scalar_lea.vmem %s407_s12, 8192  ;;  %p6006_p2 = scmp.lt.s32.totalorder %s407_s12, %s407_s12 }
  0x83   : > { %p5999_p3 = scmp.ne.s32.totalorder %s407_s12, %s5998_s30  ;;  %p6007_p9 = scmp.lt.s32.totalorder %s5998_s30, %s5998_s30 }
  0x85   : > { %p6001_p12 = pnand %p5999_p3, %p6360_p6  ;;  %p6008_p0 = por %p6007_p9, %p6006_p2 }
  0x87   : > { %p6002_p13 = pneg %p6001_p12 }
  0x89   : > { %p6009_p11 = pnand %p6008_p0, %p6002_p13 }
  0x8b   : > { %6012 = shalt.err (!%p6009_p11)
}
  0x8c   : > { %s6237_s7 = smov 256   ;;  %s6238_s21 = smov 16  }
  0x8d   : > { %5341 = dma.hbm_to_vmem [thread:$0]  (!%p6354_p5), %s6864_s4, 8192, %s407_s12, [#allocation10], %s6237_s7, %s6237_s7, %s6238_s21  }
  0x8e   : > { %s6239_s0 = smov [#allocation14]   ;;  %s6240_s13 = smov [#allocation17]  }
  0x8f   : > { %s431_s17 = sshll.u32 %s6239_s0, 4  ;;  %s455_s3 = sshll.u32 %s6240_s13, 4  ;;  %s432_s17 = int_to_ptr.vmem [resolvable:$true] %s431_s17  ;;  %s456_s3 = int_to_ptr.vmem [resolvable:$true] %s455_s3 }
  0x90   : > { %s6024_s29 = scalar_lea.vmem %s432_s17, 64  ;;  %p6032_p10 = scmp.lt.s32.totalorder %s432_s17, %s432_s17 }
  0x91   : > { %p6025_p4 = scmp.ne.s32.totalorder %s432_s17, %s6024_s29  ;;  %p6033_p3 = scmp.lt.s32.totalorder %s6024_s29, %s6024_s29 }
  0x93   : > { %p6027_p8 = pnand %p6025_p4, %p6360_p6  ;;  %p6034_p12 = por %p6033_p3, %p6032_p10 }
  0x95   : > { %p6028_p1 = pneg %p6027_p8 }
  0x97   : > { %p6035_p13 = pnand %p6034_p12, %p6028_p1 }
  0x99   : > { %6038 = shalt.err (!%p6035_p13)
}
  0x9a   : > { %5347 = dma.hbm_to_vmem [thread:$0]  (!%p6354_p5), %s6866_s6, 64, %s432_s17, [#allocation13]  }
  0x9b   : > { %s6050_s30 = scalar_lea.vmem %s456_s3, 128  ;;  %p6058_p11 = scmp.lt.s32.totalorder %s456_s3, %s456_s3 }
  0x9c   : > { %p6051_p2 = scmp.ne.s32.totalorder %s456_s3, %s6050_s30  ;;  %p6059_p4 = scmp.lt.s32.totalorder %s6050_s30, %s6050_s30 }
  0x9e   : > { %p6053_p9 = pnand %p6051_p2, %p6360_p6  ;;  %p6060_p8 = por %p6059_p4, %p6058_p11 }
  0xa0   : > { %p6054_p0 = pneg %p6053_p9 }
  0xa2   : > { %p6061_p7 = pnand %p6060_p8, %p6054_p0 }
  0xa4   : > { %6064 = shalt.err (!%p6061_p7)
}
  0xa5   : > { %5353 = dma.hbm_to_vmem [thread:$0]  (!%p6354_p5), %s6868_s8, 128, %s456_s3, [#allocation16]  }
  0xa6   : > { %s6918_s1 = sand.u32 1, %s6211_s23   ;;  %s6241_s0 = smov [#allocation18]  }
  0xa7   : > { %s4788_s14 = sshll.u32 %s6918_s1, 1  ;;  %s466_s17 = sshll.u32 %s6241_s0, 4  ;;  %s467_s17 = int_to_ptr.vmem [resolvable:$true] %s466_s17 }
  0xa8   : > { %s5278_s13 = sshll.u32 %s6219_s25, 5  ;;  %s6076_s29 = scalar_lea.vmem %s467_s17, 128 }
  0xa9   : > { %p6077_p1 = scmp.ne.s32.totalorder %s467_s17, %s6076_s29  ;;  %p6084_p3 = scmp.lt.s32.totalorder %s467_s17, %s467_s17 }
  0xaa   : > { %p6085_p12 = scmp.lt.s32.totalorder %s6076_s29, %s6076_s29 }
  0xab   : > { %p6079_p10 = pnand %p6077_p1, %p6360_p6 }
  0xac   : > { %p6086_p13 = por %p6085_p12, %p6084_p3 }
  0xad   : > { %p6080_p7 = pneg %p6079_p10 }
  0xaf   : > { %p6087_p2 = pnand %p6086_p13, %p6080_p7 }
  0xb1   : > { %6090 = shalt.err (!%p6087_p2)
}
  0xb2   : > { %5356 = dma.hbm_to_vmem [thread:$0]  (!%p6354_p5), %s6869_s9, 128, %s467_s17, [#allocation19]  }
  0xb3   : > { %s512_s7 = scalar_lea.hbm %s6871_s11, %s5278_s13  ;;  %s504_s21 = scalar_lea.vmem [#allocation21], %s4788_s14 }
  0xb4   : > { %s514_s18 = sshll.u32 %s504_s21, 4  ;;  %p6919_p9 = scmp.ne.s32.totalorder %s6914_s20, 0  ;;  %s515_s18 = int_to_ptr.vmem [resolvable:$true] %s514_s18 }
  0xb5   : > { %s6104_s1 = scalar_lea.vmem %s515_s18, 32  ;;  %s6242_s0 = smov [#allocation21]  }
  0xb6   : > { %p6105_p6 = scmp.ne.s32.totalorder %s515_s18, %s6104_s1  ;;  %p6920_p0 = pneg %p6919_p9 }
  0xb7   : > { %s6109_s15 = sshll.u32 %s6242_s0, 4  ;;  %s6110_s15 = int_to_ptr.vmem [resolvable:$false] %s6109_s15 }
  0xb8   : > { %p6107_p11 = pnand %p6105_p6, %p6920_p0  ;;  %s6111_s29 = scalar_lea.vmem %s6110_s15, 64 }
  0xb9   : > { %p6112_p8 = scmp.lt.s32.totalorder %s515_s18, %s6110_s15  ;;  %p6113_p1 = scmp.lt.s32.totalorder %s6111_s29, %s6104_s1 }
  0xba   : > { %p6108_p4 = pneg %p6107_p11 }
  0xbb   : > { %p6114_p5 = por %p6113_p1, %p6112_p8 }
  0xbd   : > { %p6115_p10 = pnand %p6114_p5, %p6108_p4 }
  0xbf   : > { %6118 = shalt.err (!%p6115_p10)
}
  0xc0   : > { %5363 = dma.hbm_to_vmem [thread:$0]  (!%p6919_p9), %s512_s7, 32, %s515_s18, %s6453_s19  }
  0xc1   : > { %p6921_p7 = scmp.ne.s32.totalorder %s6897_s28, 0 }
  0xc2   : > { %p6922_p3 = scmp.eq.s32.totalorder (!%p6921_p7), %s6341_s27, 0 }
  0xc3   : > { %523 = sbr.rel (%p6921_p7) target bundleno = 1592 (0x638), region = 68 }
  0xc8   : > { %6170 = dma.done.wait (%p6922_p3), [#allocation4], 64   ;;  %p6923_p12 = pmov %p6922_p3 }
  0xc9   : > { %p6924_p13 = pmov %p6922_p3 }
  0xca   : > { %6172 = vsyncadd (%p6923_p12), [#allocation4], 4294967232 }
  0xcb   : > { %6174 = dma.done.wait (%p6924_p13), [#allocation7], 2080   ;;  %p6925_p2 = pmov %p6922_p3 }
  0xcd   : > { %6176 = vsyncadd (%p6925_p2), [#allocation7], 4294965216  ;;  %p6926_p6 = pmov %p6925_p2 }
  0xce   : > { %p6927_p9 = pmov %p6925_p2 }
  0xcf   : > { %6178 = dma.done.wait (%p6926_p6), [#allocation10], 8224  }
  0xd0   : > { %6180 = vsyncadd (%p6927_p9), [#allocation10], 4294959072  ;;  %p6928_p0 = pmov %p6925_p2 }
  0xd2   : > { %6182 = dma.done.wait (%p6928_p0), [#allocation13], 128   ;;  %p6929_p11 = pmov %p6928_p0 }
  0xd3   : > { %p6930_p4 = pmov %p6928_p0 }
  0xd4   : > { %6184 = vsyncadd (%p6929_p11), [#allocation13], 4294967168 }
  0xd5   : > { %6186 = dma.done.wait (%p6930_p4), [#allocation16], 32896   ;;  %p6931_p8 = pmov %p6928_p0 }
  0xd6   : > { %p6932_p1 = pmov %p6928_p0 }
  0xd7   : > { %6188 = vsyncadd (%p6931_p8), [#allocation16], 4294934400 }
  0xd8   : > { %6190 = dma.done.wait (%p6932_p1), [#allocation19], 128   ;;  %p6933_p5 = pmov %p6928_p0 }
  0xd9   : > { %s565_s28 = sand.u32 1, %s6341_s27   ;;  %s6541_s19 = sand.u32 1, %s6207_s22  }
  0xda   : > { %6192 = vsyncadd (%p6933_p5), [#allocation19], 4294967168  ;;  %s4802_s20 = sshll.u32 %s6541_s19, 10  ;;  %s566_s14 = scalar_lea.sflag [#allocation4], %s565_s28 }
  0xdb   : > { %s6544_s17 = scalar_lea.vmem [#allocation20], %s4802_s20  ;;  %p6934_p10 = scmp.ne.s32.totalorder %s6908_s16, 0 }
  0xdd   : > { %6194 = dma.done.wait (%p6934_p10), %s566_s14, 16416  }
  0xde   : > { %6196 = vsyncadd (%p6934_p10), %s566_s14, 4294950880  ;;  %s4803_s13 = sshll.u32 %s6541_s19, 1  ;;  %s4804_s5 = sshll.u32 %s6541_s19, 4 }
  0xdf   : > { %s6552_s3 = scalar_lea.vmem [#allocation21], %s4803_s13  ;;  %s6554_s12 = scalar_lea.vmem [#allocation22], %s4804_s5 }
  0xe0   : > { %p4805_p7 = scmp.ne.s32.totalorder %s6215_s24, 0 }
  0xe2   : > { %637 = sbr.rel (%p4805_p7) target bundleno = 1219 (0x4c3), region = 120 }
  0xe7   : > { %v5455_v0 = vld [vmem:[#allocation6 + $0x74] ss:$8 sps:$4 sm:$0xff]   ;;  %v5457_v1 = vld [vmem:[#allocation6 + $0x70] ss:$8 sps:$4 sm:$0xff]   ;;  %v6243_v2 = vmov 0  }
  0xe8   : > { %767 = vmatprep.mubr.bf16.mxu0 %v6243_v2  ;;  %735 = vmatprep.subr.bf16.mxu0 %v5455_v0  ;;  %v5458_v3 = vld [vmem:[#allocation6 + $0x64] ss:$8 sps:$4 sm:$0xff]   ;;  %v5460_v4 = vld [vmem:[#allocation6 + $0x60] ss:$8 sps:$4 sm:$0xff]   ;;  %v5461_v5 = vld [vmem:[#allocation6 + $0x54] ss:$8 sps:$4 sm:$0xff]  }
  0xe9   : > { %736 = vmatpush1.bf16.msra.mxu0 %v5457_v1  ;;  %v5463_v6 = vld [vmem:[#allocation6 + $0x50] ss:$8 sps:$4 sm:$0xff]   ;;  %v5464_v7 = vld [vmem:[#allocation6 + $0x44] ss:$8 sps:$4 sm:$0xff]   ;;  %v5466_v8 = vld [vmem:[#allocation6 + $0x40] ss:$8 sps:$4 sm:$0xff]  }
  0xea   : > { %737 = vmatprep.subr.bf16.mxu0 %v5458_v3  ;;  %v5479_v9 = vld [vmem:[#allocation11 + $0xe4] ss:$16 sps:$4 sm:$0xff]   ;;  %v5467_v10 = vld [vmem:[#allocation6 + $0x34] ss:$8 sps:$4 sm:$0xff]   ;;  %v5470_v13 = vld [vmem:[#allocation6 + $0x24] ss:$8 sps:$4 sm:$0xff]  }
  0xeb   : > { %v5469_v11 = vld [vmem:[#allocation6 + $0x30] ss:$8 sps:$4 sm:$0xff]   ;;  %1231 = vmatprep.subr.bf16.mxu1 %v5479_v9  ;;  %v5484_v12 = vld [vmem:[#allocation11 + $0xe0] ss:$16 sps:$4 sm:$0xff]   ;;  %v5472_v14 = vld [vmem:[#allocation6 + $0x20] ss:$8 sps:$4 sm:$0xff]  }
  0xec   : > { %1232 = vmatpush1.bf16.msra.mxu1 %v5484_v12  ;;  %v5473_v15 = vld [vmem:[#allocation6 + $0x14] ss:$8 sps:$4 sm:$0xff]   ;;  %v5475_v16 = vld [vmem:[#allocation6 + $0x10] ss:$8 sps:$4 sm:$0xff]   ;;  %v5476_v17 = vld [vmem:[#allocation6 + $0x4] ss:$8 sps:$4 sm:$0xff]  }
  0xed   : > { %738 = vmatpush1.bf16.msra.mxu0 %v5460_v4  ;;  %v5478_v18 = vld [vmem:[#allocation6] ss:$8 sps:$4 sm:$0xff]   ;;  %v638_v20 = vld [vmem:[#allocation3] sm:$0xf]  ;;  %v5490_v25 = vld [vmem:[#allocation11 + $0xc0] ss:$16 sps:$4 sm:$0xff]  }
  0xee   : > { %739 = vmatprep.subr.bf16.mxu0 %v5461_v5  ;;  %v5483_v19 = vld [vmem:[#allocation11 + $0xec] ss:$16 sps:$4 sm:$0xff]   ;;  %v5481_v21 = vld [vmem:[#allocation11 + $0xe8] ss:$16 sps:$4 sm:$0xff]   ;;  %v5485_v22 = vld [vmem:[#allocation11 + $0xc4] ss:$16 sps:$4 sm:$0xff]  }
  0xef   : > { %v5489_v23 = vld [vmem:[#allocation11 + $0xcc] ss:$16 sps:$4 sm:$0xff]   ;;  %v5487_v24 = vld [vmem:[#allocation11 + $0xc8] ss:$16 sps:$4 sm:$0xff]   ;;  %1233 = vmatprep.subr.bf16.mxu1 %v5485_v22  ;;  %v5491_v26 = vld [vmem:[#allocation11 + $0xa4] ss:$16 sps:$4 sm:$0xff]  }
  0xf0   : > { %1234 = vmatpush1.bf16.msra.mxu1 %v5490_v25  ;;  %v5495_v27 = vld [vmem:[#allocation11 + $0xac] ss:$16 sps:$4 sm:$0xff]   ;;  %v5493_v28 = vld [vmem:[#allocation11 + $0xa8] ss:$16 sps:$4 sm:$0xff]   ;;  %v5496_v29 = vld [vmem:[#allocation11 + $0xa0] ss:$16 sps:$4 sm:$0xff]  }
  0xf1   : > { %740 = vmatpush1.bf16.msra.mxu0 %v5463_v6  ;;  %1235 = vmatprep.subr.bf16.mxu1 %v5491_v26  ;;  %v5497_v30 = vld [vmem:[#allocation11 + $0x84] ss:$16 sps:$4 sm:$0xff]   ;;  %v5501_v31 = vld [vmem:[#allocation11 + $0x8c] ss:$16 sps:$4 sm:$0xff]   ;;  %v5499_v32 = vld [vmem:[#allocation11 + $0x88] ss:$16 sps:$4 sm:$0xff]  }
  0xf2   : > { %741 = vmatprep.subr.bf16.mxu0 %v5464_v7  ;;  %v5502_v33 = vld [vmem:[#allocation11 + $0x80] ss:$16 sps:$4 sm:$0xff]   ;;  %v5503_v34 = vld [vmem:[#allocation11 + $0x64] ss:$16 sps:$4 sm:$0xff]   ;;  %v5507_v35 = vld [vmem:[#allocation11 + $0x6c] ss:$16 sps:$4 sm:$0xff]  }
  0xf3   : > { %v5505_v36 = vld [vmem:[#allocation11 + $0x68] ss:$16 sps:$4 sm:$0xff]   ;;  %v5508_v37 = vld [vmem:[#allocation11 + $0x60] ss:$16 sps:$4 sm:$0xff]   ;;  %v5509_v38 = vld [vmem:[#allocation11 + $0x44] ss:$16 sps:$4 sm:$0xff]  }
  0xf4   : > { %1236 = vmatpush1.bf16.msra.mxu1 %v5496_v29  ;;  %v5513_v39 = vld [vmem:[#allocation11 + $0x4c] ss:$16 sps:$4 sm:$0xff]   ;;  %v5511_v40 = vld [vmem:[#allocation11 + $0x48] ss:$16 sps:$4 sm:$0xff]   ;;  %v5514_v41 = vld [vmem:[#allocation11 + $0x40] ss:$16 sps:$4 sm:$0xff]  }
  0xf5   : > { %742 = vmatpush1.bf16.msra.mxu0 %v5466_v8  ;;  %1237 = vmatprep.subr.bf16.mxu1 %v5497_v30  ;;  %v5515_v42 = vld [vmem:[#allocation11 + $0x24] ss:$16 sps:$4 sm:$0xff]   ;;  %v5519_v43 = vld [vmem:[#allocation11 + $0x2c] ss:$16 sps:$4 sm:$0xff]   ;;  %v5517_v44 = vld [vmem:[#allocation11 + $0x28] ss:$16 sps:$4 sm:$0xff]  }
  0xf6   : > { %743 = vmatprep.subr.bf16.mxu0 %v5467_v10  ;;  %v5520_v45 = vld [vmem:[#allocation11 + $0x20] ss:$16 sps:$4 sm:$0xff]   ;;  %v5521_v46 = vld [vmem:[#allocation11 + $0x4] ss:$16 sps:$4 sm:$0xff]   ;;  %v5525_v47 = vld [vmem:[#allocation11 + $0xc] ss:$16 sps:$4 sm:$0xff]  }
  0xf7   : > { %v5523_v48 = vld [vmem:[#allocation11 + $0x8] ss:$16 sps:$4 sm:$0xff]   ;;  %v5526_v49 = vld [vmem:[#allocation11] ss:$16 sps:$4 sm:$0xff]   ;;  %v5527_v50 = vld [vmem:[#allocation11 + $0x1e4] ss:$16 sps:$4 sm:$0xff]  }
  0xf8   : > { %1238 = vmatpush1.bf16.msra.mxu1 %v5502_v33  ;;  %v5531_v51 = vld [vmem:[#allocation11 + $0x1ec] ss:$16 sps:$4 sm:$0xff]   ;;  %v5529_v52 = vld [vmem:[#allocation11 + $0x1e8] ss:$16 sps:$4 sm:$0xff]   ;;  %v5532_v53 = vld [vmem:[#allocation11 + $0x1e0] ss:$16 sps:$4 sm:$0xff]  }
  0xf9   : > { %744 = vmatpush1.bf16.msra.mxu0 %v5469_v11  ;;  %1239 = vmatprep.subr.bf16.mxu1 %v5503_v34  ;;  %v5533_v54 = vld [vmem:[#allocation11 + $0x1c4] ss:$16 sps:$4 sm:$0xff]   ;;  %v5537_v55 = vld [vmem:[#allocation11 + $0x1cc] ss:$16 sps:$4 sm:$0xff]   ;;  %v5535_v56 = vld [vmem:[#allocation11 + $0x1c8] ss:$16 sps:$4 sm:$0xff]  }
  0xfa   : > { %745 = vmatprep.subr.bf16.mxu0 %v5470_v13  ;;  %v5538_v57 = vld [vmem:[#allocation11 + $0x1c0] ss:$16 sps:$4 sm:$0xff]   ;;  %v5539_v58 = vld [vmem:[#allocation11 + $0x1a4] ss:$16 sps:$4 sm:$0xff]   ;;  %v5543_v59 = vld [vmem:[#allocation11 + $0x1ac] ss:$16 sps:$4 sm:$0xff]  }
  0xfb   : > { %v5541_v60 = vld [vmem:[#allocation11 + $0x1a8] ss:$16 sps:$4 sm:$0xff]   ;;  %v5544_v61 = vld [vmem:[#allocation11 + $0x1a0] ss:$16 sps:$4 sm:$0xff]   ;;  %v5545_v62 = vld [vmem:[#allocation11 + $0x184] ss:$16 sps:$4 sm:$0xff]  }
  0xfc   : > { %1240 = vmatpush1.bf16.msra.mxu1 %v5508_v37  ;;  %v5549_v63 = vld [vmem:[#allocation11 + $0x18c] ss:$16 sps:$4 sm:$0xff]   ;;  %v5547_v0 = vld [vmem:[#allocation11 + $0x188] ss:$16 sps:$4 sm:$0xff]   ;;  %v5550_v1 = vld [vmem:[#allocation11 + $0x180] ss:$16 sps:$4 sm:$0xff]  }
  0xfd   : > { %746 = vmatpush1.bf16.msra.mxu0 %v5472_v14  ;;  %1241 = vmatprep.subr.bf16.mxu1 %v5509_v38  ;;  %v5551_v2 = vld [vmem:[#allocation11 + $0x164] ss:$16 sps:$4 sm:$0xff]   ;;  %v5555_v3 = vld [vmem:[#allocation11 + $0x16c] ss:$16 sps:$4 sm:$0xff]   ;;  %v5553_v4 = vld [vmem:[#allocation11 + $0x168] ss:$16 sps:$4 sm:$0xff]  }
  0xfe   : > { %747 = vmatprep.subr.bf16.mxu0 %v5473_v15  ;;  %v5556_v5 = vld [vmem:[#allocation11 + $0x160] ss:$16 sps:$4 sm:$0xff]   ;;  %v5557_v6 = vld [vmem:[#allocation11 + $0x144] ss:$16 sps:$4 sm:$0xff]   ;;  %v5561_v7 = vld [vmem:[#allocation11 + $0x14c] ss:$16 sps:$4 sm:$0xff]  }
  0xff   : > { %v5559_v8 = vld [vmem:[#allocation11 + $0x148] ss:$16 sps:$4 sm:$0xff]   ;;  %v5562_v9 = vld [vmem:[#allocation11 + $0x140] ss:$16 sps:$4 sm:$0xff]   ;;  %v5563_v10 = vld [vmem:[#allocation11 + $0x124] ss:$16 sps:$4 sm:$0xff]  }
 0x100   : > { %1242 = vmatpush1.bf16.msra.mxu1 %v5514_v41  ;;  %v5565_v11 = vld [vmem:[#allocation11 + $0x128] ss:$16 sps:$4 sm:$0xff]   ;;  %v5567_v12 = vld [vmem:[#allocation11 + $0x12c] ss:$16 sps:$4 sm:$0xff]   ;;  %v5568_v13 = vld [vmem:[#allocation11 + $0x120] ss:$16 sps:$4 sm:$0xff]  }
 0x101   : > { %748 = vmatpush1.bf16.msra.mxu0 %v5475_v16  ;;  %1243 = vmatprep.subr.bf16.mxu1 %v5515_v42  ;;  %v5569_v14 = vld [vmem:[#allocation11 + $0x104] ss:$16 sps:$4 sm:$0xff]   ;;  %v5573_v15 = vld [vmem:[#allocation11 + $0x10c] ss:$16 sps:$4 sm:$0xff]   ;;  %v5571_v16 = vld [vmem:[#allocation11 + $0x108] ss:$16 sps:$4 sm:$0xff]  }
 0x102   : > { %749 = vmatprep.subr.bf16.mxu0 %v5476_v17  ;;  %v5574_v17 = vld [vmem:[#allocation11 + $0x100] ss:$16 sps:$4 sm:$0xff]  }
 0x104   : > { %1244 = vmatpush1.bf16.msra.mxu1 %v5520_v45 }
 0x105   : > { %750 = vmatpush1.bf16.msra.mxu0 %v5478_v18  ;;  %1245 = vmatprep.subr.bf16.mxu1 %v5521_v46  ;;  %v6557_v18 = vld [vmem:[#allocation15 + $0x1c0] sm:$0xff] }
 0x106   : > { %1272 = vmatprep.subr.bf16.mxu0 %v5483_v19  ;;  %v6559_v19 = vld [vmem:[#allocation15 + $0x1e0] sm:$0xff] }
 0x107   : > { %v4943_v22 = vcombine.high %v6557_v18, %v6559_v19 }
 0x108   : > { %768 = vmatmul.mubr.bf16.vlgmr.msra.gmra.mxu0 %v638_v20  ;;  %1246 = vmatpush1.bf16.msra.mxu1 %v5526_v49  ;;  %v6561_v20 = vld [vmem:[#allocation15 + $0x5c0] sm:$0xff] }
 0x109   : > { %1273 = vmatpush1.bf16.msra.mxu0 %v5481_v21  ;;  %1247 = vmatprep.subr.bf16.mxu1 %v5527_v50  ;;  %v4942_v21 = vcombine.low %v6557_v18, %v6559_v19  ;;  %v1621_v19 = vld [vmem:[#allocation15 + $0x560] sm:$0xff] }
 0x10a   : > { %1274 = vmatprep.subr.bf16.mxu0 %v5489_v23  ;;  %v6567_v23 = vld [vmem:[#allocation15 + $0x5e0] sm:$0xff] }
 0x10b   : > { %v5071_v25 = vcombine.high %v6561_v20, %v6567_v23 }
 0x10c   : > { %1248 = vmatpush2.bf16.msra.mxu1 %v5532_v53 }
 0x10d   : > { %1275 = vmatpush1.bf16.msra.mxu0 %v5487_v24  ;;  %1249 = vmatprep.subr.bf16.mxu1 %v5533_v54  ;;  %v5070_v24 = vcombine.low %v6561_v20, %v6567_v23 }
 0x10e   : > { %1276 = vmatprep.subr.bf16.mxu0 %v5495_v27 }
 0x110   : > { %1250 = vmatpush2.bf16.msra.mxu1 %v5538_v57 }
 0x111   : > { %1277 = vmatpush1.bf16.msra.mxu0 %v5493_v28  ;;  %1251 = vmatprep.subr.bf16.mxu1 %v5539_v58 }
 0x112   : > { %1278 = vmatprep.subr.bf16.mxu0 %v5501_v31 }
 0x114   : > { %1252 = vmatpush2.bf16.msra.mxu1 %v5544_v61 }
 0x115   : > { %1279 = vmatpush1.bf16.msra.mxu0 %v5499_v32  ;;  %1253 = vmatprep.subr.bf16.mxu1 %v5545_v62 }
 0x116   : > { %1280 = vmatprep.subr.bf16.mxu0 %v5507_v35 }
 0x118   : > { %1254 = vmatpush2.bf16.msra.mxu1 %v5550_v1 }
 0x119   : > { %1281 = vmatpush1.bf16.msra.mxu0 %v5505_v36  ;;  %1255 = vmatprep.subr.bf16.mxu1 %v5551_v2 }
 0x11a   : > { %1282 = vmatprep.subr.bf16.mxu0 %v5513_v39 }
 0x11c   : > { %1256 = vmatpush2.bf16.msra.mxu1 %v5556_v5  ;;  %v777_v5 = vld [vmem:[#allocation9] sm:$0x3] }
 0x11d   : > { %1283 = vmatpush1.bf16.msra.mxu0 %v5511_v40  ;;  %1257 = vmatprep.subr.bf16.mxu1 %v5557_v6 }
 0x11e   : > { %1284 = vmatprep.subr.bf16.mxu0 %v5519_v43 }
 0x120   : > { %1258 = vmatpush2.bf16.msra.mxu1 %v5562_v9 }
 0x121   : > { %1285 = vmatpush1.bf16.msra.mxu0 %v5517_v44  ;;  %1259 = vmatprep.subr.bf16.mxu1 %v5563_v10 }
 0x122   : > { %1286 = vmatprep.subr.bf16.mxu0 %v5525_v47 }
 0x124   : > { %1260 = vmatpush2.bf16.msra.mxu1 %v5568_v13 }
 0x125   : > { %1287 = vmatpush1.bf16.msra.mxu0 %v5523_v48  ;;  %1261 = vmatprep.subr.bf16.mxu1 %v5569_v14 }
 0x126   : > { %1288 = vmatprep.subr.bf16.mxu0 %v5531_v51 }
 0x128   : > { %1262 = vmatpush2.bf16.msra.mxu1 %v5574_v17 }
 0x129   : > { %1289 = vmatpush2.bf16.msra.mxu0 %v5529_v52  ;;  %2985 = vmatprep.subr.bf16.mxu1 %v4943_v22 }
 0x12a   : > { %1290 = vmatprep.subr.bf16.mxu0 %v5537_v55 }
 0x12d   : > { %1291 = vmatpush2.bf16.msra.mxu0 %v5535_v56 }
 0x12e   : > { %1292 = vmatprep.subr.bf16.mxu0 %v5543_v59 }
 0x131   : > { %1293 = vmatpush2.bf16.msra.mxu0 %v5541_v60 }
 0x132   : > { %1294 = vmatprep.subr.bf16.mxu0 %v5549_v63 }
 0x135   : > { %1295 = vmatpush2.bf16.msra.mxu0 %v5547_v0  ;;  %v818_v0 = vlaneseq }
 0x136   : > { %1296 = vmatprep.subr.bf16.mxu0 %v5555_v3  ;;  %v776_v3 = vld [vmem:[#allocation8] sm:$0x3] }
 0x137   : > { %v6573_v1 = vshrl.u32 %v818_v0, 7  ;;  %v1585_v0 = vld [vmem:[#allocation15 + $0x440] sm:$0xff] }
 0x139   : > { %1297 = vmatpush2.bf16.msra.mxu0 %v5553_v4  ;;  %v6576_v2 = vsub.s32 0, %v6573_v1  ;;  %v6579_v4 = vsub.s32 1, %v6573_v1 }
 0x13a   : > { %1298 = vmatprep.subr.bf16.mxu0 %v5561_v7 }
 0x13b   : > { %v821_v6 = vrot.slane %v776_v3, %v6576_v2  ;;  %v825_v9 = vrot.slane %v776_v3, %v6579_v4  ;;  %v834_v10 = vrot.slane %v777_v5, %v6576_v2  ;;  %v838_v13 = vrot.slane %v777_v5, %v6579_v4  ;;  %v1589_v5 = vld [vmem:[#allocation15 + $0x460] sm:$0xff] }
 0x13d   : > { %1299 = vmatpush2.bf16.msra.mxu0 %v5559_v8 }
 0x13e   : > { %1300 = vmatprep.subr.bf16.mxu0 %v5567_v12 }
 0x141   : > { %1301 = vmatpush2.bf16.msra.mxu0 %v5565_v11 }
 0x142   : > { %1302 = vmatprep.subr.bf16.mxu0 %v5573_v15 }
 0x145   : > { %1303 = vmatpush2.bf16.msra.mxu0 %v5571_v16 }
 0x146   : > { %3026 = vmatprep.subr.bf16.mxu0 %v5071_v25 }
 0x1c8   : > { %v769_v26 = vpop.f32.mrf.mxu0 }
 0x1c9   : > { %v778_v27 = vrot.slane %v769_v26, 4 }
 0x1ca   : > { %v771_v28 = vpop.f32.mrf.mxu0 }
 0x1cb   : > { %v779_v29 = vadd.f32 %v778_v27, %v769_v26  ;;  %v784_v30 = vrot.slane %v771_v28, 4 }
 0x1cc   : > { %v773_v31 = vpop.f32.mrf.mxu0 }
 0x1cd   : > { %v780_v32 = vrot.slane %v779_v29, 2  ;;  %v785_v33 = vadd.f32 %v784_v30, %v771_v28  ;;  %v1625_v30 = vld [vmem:[#allocation15 + $0x580] sm:$0xff] }
 0x1ce   : > { %v774_v34 = vpop.f32.mrf.mxu0 }
 0x1cf   : > { %v781_v35 = vadd.f32 %v780_v32, %v779_v29  ;;  %v786_v36 = vrot.slane %v785_v33, 2  ;;  %v1501_v29 = vld [vmem:[#allocation15 + $0x1a0] sm:$0xff] }
 0x1d0   : > { %v1629_v32 = vld [vmem:[#allocation15 + $0x5a0] sm:$0xff] }
 0x1d1   : > { %v782_v37 = vrot.slane %v781_v35, 1  ;;  %v787_v38 = vadd.f32 %v786_v36, %v785_v33  ;;  %v5062_v34 = vcombine.low %v1625_v30, %v1629_v32  ;;  %v1489_v36 = vld [vmem:[#allocation15 + $0x140] sm:$0xff] }
 0x1d3   : > { %v783_v39 = vadd.f32 %v782_v37, %v781_v35  ;;  %v788_v40 = vrot.slane %v787_v38, 1  ;;  %v5063_v35 = vcombine.high %v1625_v30, %v1629_v32  ;;  %v1493_v37 = vld [vmem:[#allocation15 + $0x160] sm:$0xff] }
 0x1d4   : > { %v4927_v18 = vcombine.high %v1489_v36, %v1493_v37  ;;  %v1565_v32 = vld [vmem:[#allocation15 + $0x3a0] sm:$0xff] }
 0x1d5   : > { %v791_v41 = vmul.f32 0.125, %v783_v39  ;;  %v789_v42 = vadd.f32 %v788_v40, %v787_v38  ;;  %v1617_v38 = vld [vmem:[#allocation15 + $0x540] sm:$0xff] }
 0x1d6   : > { %v5054_v20 = vcombine.low %v1617_v38, %v1621_v19  ;;  %v5055_v23 = vcombine.high %v1617_v38, %v1621_v19  ;;  %v1485_v39 = vld [vmem:[#allocation15 + $0x120] sm:$0xff] }
 0x1d7   : > { %v793_v43 = vsub.f32 %v769_v26, %v791_v41  ;;  %v792_v44 = vmul.f32 0.125, %v789_v42  ;;  %v1609_v40 = vld [vmem:[#allocation15 + $0x500] sm:$0xff] }
 0x1d8   : > { %v1613_v42 = vld [vmem:[#allocation15 + $0x520] sm:$0xff] }
 0x1d9   : > { %v795_v45 = vmul.f32 %v793_v43, %v793_v43  ;;  %v794_v46 = vsub.f32 %v771_v28, %v792_v44  ;;  %v1497_v28 = vld [vmem:[#allocation15 + $0x180] sm:$0xff]  ;;  %v5046_v44 = vcombine.low %v1609_v40, %v1613_v42 }
 0x1da   : > { %v4935_v31 = vcombine.high %v1497_v28, %v1501_v29  ;;  %v4934_v33 = vcombine.low %v1497_v28, %v1501_v29  ;;  %v1557_v19 = vld [vmem:[#allocation15 + $0x360] sm:$0xff] }
 0x1db   : > { %v797_v47 = vrot.slane %v795_v45, 4  ;;  %v796_v48 = vmul.f32 %v794_v46, %v794_v46 }
 0x1dd   : > { %v798_v49 = vadd.f32 %v797_v47, %v795_v45  ;;  %v803_v50 = vrot.slane %v796_v48, 4  ;;  %v5047_v45 = vcombine.high %v1609_v40, %v1613_v42  ;;  %v1477_v47 = vld [vmem:[#allocation15 + $0xe0] sm:$0xff] }
 0x1de   : > { %v1549_v42 = vld [vmem:[#allocation15 + $0x320] sm:$0xff] }
 0x1df   : > { %v799_v51 = vrot.slane %v798_v49, 2  ;;  %v804_v52 = vadd.f32 %v803_v50, %v796_v48  ;;  %v1601_v48 = vld [vmem:[#allocation15 + $0x4c0] sm:$0xff] }
 0x1e0   : > { %v1605_v50 = vld [vmem:[#allocation15 + $0x4e0] sm:$0xff] }
 0x1e1   : > { %v800_v53 = vadd.f32 %v799_v51, %v798_v49  ;;  %v805_v54 = vrot.slane %v804_v52, 2 }
 0x1e3   : > { %v801_v55 = vrot.slane %v800_v53, 1  ;;  %v806_v56 = vadd.f32 %v805_v54, %v804_v52  ;;  %v5038_v52 = vcombine.low %v1601_v48, %v1605_v50  ;;  %v1465_v54 = vld [vmem:[#allocation15 + $0x80] sm:$0xff] }
 0x1e5   : > { %v802_v57 = vadd.f32 %v801_v55, %v800_v53  ;;  %v807_v58 = vrot.slane %v806_v56, 1  ;;  %v5039_v53 = vcombine.high %v1601_v48, %v1605_v50  ;;  %v1469_v55 = vld [vmem:[#allocation15 + $0xa0] sm:$0xff] }
 0x1e6   : > { %v1541_v50 = vld [vmem:[#allocation15 + $0x2e0] sm:$0xff] }
 0x1e7   : > { %v809_v59 = vmul.f32 0.125, %v802_v57  ;;  %v808_v60 = vadd.f32 %v807_v58, %v806_v56  ;;  %v1593_v56 = vld [vmem:[#allocation15 + $0x480] sm:$0xff]  ;;  %v4903_v57 = vcombine.high %v1465_v54, %v1469_v55 }
 0x1e8   : > { %v1597_v58 = vld [vmem:[#allocation15 + $0x4a0] sm:$0xff] }
 0x1e9   : > { %v811_v61 = vadd.f32 1e-05, %v809_v59  ;;  %v810_v62 = vmul.f32 0.125, %v808_v60  ;;  %v4902_v59 = vcombine.low %v1465_v54, %v1469_v55  ;;  %v5030_v60 = vcombine.low %v1593_v56, %v1597_v58 }
 0x1eb   : > { %5575 = vrsqrt.f32 %v811_v61  ;;  %v812_v63 = vadd.f32 1e-05, %v810_v62  ;;  %v5031_v61 = vcombine.high %v1593_v56, %v1597_v58  ;;  %v1457_v62 = vld [vmem:[#allocation15 + $0x40] sm:$0xff] }
 0x1ec   : > { %v1533_v58 = vld [vmem:[#allocation15 + $0x2a0] sm:$0xff] }
 0x1ed   : > { %5577 = vrsqrt.f32 %v812_v63  ;;  %v1461_v63 = vld [vmem:[#allocation15 + $0x60] sm:$0xff] }
 0x1ee   : > { %v4895_v3 = vcombine.high %v1457_v62, %v1461_v63 }
 0x1f8   : > { %v5576_v7 = vpop.eup %5575 }
 0x1f9   : > { %v815_v8 = vmul.f32 %v5576_v7, %v793_v43  ;;  %v5022_v7 = vcombine.low %v1585_v0, %v1589_v5 }
 0x1fa   : > { %v5578_v11 = vpop.eup %5577 }
 0x1fb   : > { %v816_v12 = vmul.f32 %v5578_v11, %v794_v46  ;;  %v828_v14 = vmul.f32 %v821_v6, %v815_v8  ;;  %v1473_v46 = vld [vmem:[#allocation15 + $0xc0] sm:$0xff]  ;;  %v4894_v6 = vcombine.low %v1457_v62, %v1461_v63  ;;  %v5023_v8 = vcombine.high %v1585_v0, %v1589_v5 }
 0x1fc   : > { %v4911_v49 = vcombine.high %v1473_v46, %v1477_v47  ;;  %v4910_v51 = vcombine.low %v1473_v46, %v1477_v47  ;;  %v1577_v11 = vld [vmem:[#allocation15 + $0x400] sm:$0xff] }
 0x1fd   : > { %v829_v15 = vmul.f32 %v825_v9, %v816_v12  ;;  %v841_v16 = vadd.f32 %v834_v10, %v828_v14  ;;  %v1449_v9 = vld [vmem:[#allocation15] sm:$0xff] }
 0x1fe   : > { %v1453_v10 = vld [vmem:[#allocation15 + $0x20] sm:$0xff] }
 0x1ff   : > { %v842_v17 = vadd.f32 %v838_v13, %v829_v15  ;;  %v843_v22 = vmax.f32 %v841_v16, 0.0  ;;  %v4887_v12 = vcombine.high %v1449_v9, %v1453_v10  ;;  %v1581_v13 = vld [vmem:[#allocation15 + $0x420] sm:$0xff]  ;;  %v4886_v14 = vcombine.low %v1449_v9, %v1453_v10 }
 0x200   : > { %v5014_v15 = vcombine.low %v1577_v11, %v1581_v13  ;;  %v5015_v16 = vcombine.high %v1577_v11, %v1581_v13  ;;  %v1525_v5 = vld [vmem:[#allocation15 + $0x260] sm:$0xff] }
 0x201   : > { %v844_v25 = vmax.f32 %v842_v17, 0.0  ;;  %v845_v27 = vpack.c.bf16 %v843_v22, %v843_v22  ;;  %v1569_v17 = vld [vmem:[#allocation15 + $0x3c0] sm:$0xff] }
 0x202   : > { %v1573_v22 = vld [vmem:[#allocation15 + $0x3e0] sm:$0xff] }
 0x203   : > { %v846_v26 = vpack.c.bf16 %v844_v25, %v844_v25  ;;  %v1697_v25 = vld [vmem:[#allocation15 + $0x7c0] sm:$0xff]  ;;  %v5006_v28 = vcombine.low %v1569_v17, %v1573_v22 }
 0x204   : > { %v1517_v13 = vld [vmem:[#allocation15 + $0x220] sm:$0xff] }
 0x205   : > { %1263 = vmatprep.mubr.bf16.mxu1 %v846_v26  ;;  %1304 = vmatprep.mubr.bf16.mxu0 %v846_v26  ;;  %v5007_v26 = vcombine.high %v1569_v17, %v1573_v22  ;;  %v1645_v17 = vld [vmem:[#allocation15 + $0x620] sm:$0xff] }
 0x206   : > { %1264 = vmatmul.mubr.bf16.vlgmr.msra.gmra.mxu1 %v845_v27  ;;  %1305 = vmatmul.mubr.bf16.vlgmr.msra.gmra.mxu0 %v845_v27  ;;  %v1701_v27 = vld [vmem:[#allocation15 + $0x7e0] sm:$0xff] }
 0x207   : > { %2986 = vmatpush1.bf16.msra.mxu1 %v4942_v21  ;;  %3027 = vmatpush1.bf16.msra.mxu0 %v5070_v24  ;;  %v4926_v21 = vcombine.low %v1489_v36, %v1493_v37  ;;  %v1481_v24 = vld [vmem:[#allocation15 + $0x100] sm:$0xff]  ;;  %v5134_v29 = vcombine.low %v1697_v25, %v1701_v27  ;;  %v5135_v30 = vcombine.high %v1697_v25, %v1701_v27  ;;  %v6593_v27 = vld [vmem:[#allocation15 + $0x1e8] sm:$0xff] }
 0x208   : > { %2987 = vmatprep.subr.bf16.mxu1 %v4935_v31  ;;  %3028 = vmatprep.subr.bf16.mxu0 %v5063_v35  ;;  %v4919_v41 = vcombine.high %v1481_v24, %v1485_v39  ;;  %v4918_v43 = vcombine.low %v1481_v24, %v1485_v39  ;;  %v1561_v31 = vld [vmem:[#allocation15 + $0x380] sm:$0xff] }
 0x209   : > { %v1693_v35 = vld [vmem:[#allocation15 + $0x7a0] sm:$0xff]  ;;  %v4998_v36 = vcombine.low %v1561_v31, %v1565_v32 }
 0x20b   : > { %2988 = vmatpush1.bf16.msra.mxu1 %v4934_v33  ;;  %3029 = vmatpush1.bf16.msra.mxu0 %v5062_v34  ;;  %v1689_v33 = vld [vmem:[#allocation15 + $0x780] sm:$0xff]  ;;  %v4999_v34 = vcombine.high %v1561_v31, %v1565_v32 }
 0x20c   : > { %2989 = vmatprep.subr.bf16.mxu1 %v4927_v18  ;;  %3030 = vmatprep.subr.bf16.mxu0 %v5055_v23  ;;  %v5126_v37 = vcombine.low %v1689_v33, %v1693_v35  ;;  %v5127_v38 = vcombine.high %v1689_v33, %v1693_v35  ;;  %v1553_v18 = vld [vmem:[#allocation15 + $0x340] sm:$0xff] }
 0x20d   : > { %v1685_v23 = vld [vmem:[#allocation15 + $0x760] sm:$0xff]  ;;  %v4990_v24 = vcombine.low %v1553_v18, %v1557_v19 }
 0x20f   : > { %2990 = vmatpush1.bf16.msra.mxu1 %v4926_v21  ;;  %3031 = vmatpush1.bf16.msra.mxu0 %v5054_v20  ;;  %v1681_v21 = vld [vmem:[#allocation15 + $0x740] sm:$0xff]  ;;  %v4991_v20 = vcombine.high %v1553_v18, %v1557_v19 }
 0x210   : > { %2991 = vmatprep.subr.bf16.mxu1 %v4919_v41  ;;  %3032 = vmatprep.subr.bf16.mxu0 %v5047_v45  ;;  %v5118_v39 = vcombine.low %v1681_v21, %v1685_v23  ;;  %v5119_v40 = vcombine.high %v1681_v21, %v1685_v23  ;;  %v1545_v41 = vld [vmem:[#allocation15 + $0x300] sm:$0xff] }
 0x211   : > { %v1677_v45 = vld [vmem:[#allocation15 + $0x720] sm:$0xff]  ;;  %v4982_v46 = vcombine.low %v1545_v41, %v1549_v42 }
 0x213   : > { %2992 = vmatpush1.bf16.msra.mxu1 %v4918_v43  ;;  %3033 = vmatpush1.bf16.msra.mxu0 %v5046_v44  ;;  %v1673_v43 = vld [vmem:[#allocation15 + $0x700] sm:$0xff]  ;;  %v4983_v44 = vcombine.high %v1545_v41, %v1549_v42 }
 0x214   : > { %2993 = vmatprep.subr.bf16.mxu1 %v4911_v49  ;;  %3034 = vmatprep.subr.bf16.mxu0 %v5039_v53  ;;  %v5110_v47 = vcombine.low %v1673_v43, %v1677_v45  ;;  %v5111_v48 = vcombine.high %v1673_v43, %v1677_v45  ;;  %v1537_v49 = vld [vmem:[#allocation15 + $0x2c0] sm:$0xff] }
 0x215   : > { %v1669_v53 = vld [vmem:[#allocation15 + $0x6e0] sm:$0xff]  ;;  %v4974_v54 = vcombine.low %v1537_v49, %v1541_v50 }
 0x217   : > { %2994 = vmatpush1.bf16.msra.mxu1 %v4910_v51  ;;  %3035 = vmatpush1.bf16.msra.mxu0 %v5038_v52  ;;  %v1665_v51 = vld [vmem:[#allocation15 + $0x6c0] sm:$0xff]  ;;  %v4975_v52 = vcombine.high %v1537_v49, %v1541_v50 }
 0x218   : > { %2995 = vmatprep.subr.bf16.mxu1 %v4903_v57  ;;  %3036 = vmatprep.subr.bf16.mxu0 %v5031_v61  ;;  %v5102_v55 = vcombine.low %v1665_v51, %v1669_v53  ;;  %v5103_v56 = vcombine.high %v1665_v51, %v1669_v53  ;;  %v1529_v57 = vld [vmem:[#allocation15 + $0x280] sm:$0xff] }
 0x219   : > { %v1661_v61 = vld [vmem:[#allocation15 + $0x6a0] sm:$0xff]  ;;  %v4966_v62 = vcombine.low %v1529_v57, %v1533_v58 }
 0x21b   : > { %2996 = vmatpush1.bf16.msra.mxu1 %v4902_v59  ;;  %3037 = vmatpush1.bf16.msra.mxu0 %v5030_v60  ;;  %v1657_v59 = vld [vmem:[#allocation15 + $0x680] sm:$0xff]  ;;  %v4967_v60 = vcombine.high %v1529_v57, %v1533_v58 }
 0x21c   : > { %2997 = vmatprep.subr.bf16.mxu1 %v4895_v3  ;;  %3038 = vmatprep.subr.bf16.mxu0 %v5023_v8  ;;  %v5094_v63 = vcombine.low %v1657_v59, %v1661_v61  ;;  %v5095_v0 = vcombine.high %v1657_v59, %v1661_v61  ;;  %v1521_v3 = vld [vmem:[#allocation15 + $0x240] sm:$0xff] }
 0x21d   : > { %v1653_v8 = vld [vmem:[#allocation15 + $0x660] sm:$0xff]  ;;  %v4958_v9 = vcombine.low %v1521_v3, %v1525_v5 }
 0x21f   : > { %2998 = vmatpush1.bf16.msra.mxu1 %v4894_v6  ;;  %3039 = vmatpush1.bf16.msra.mxu0 %v5022_v7  ;;  %v1649_v6 = vld [vmem:[#allocation15 + $0x640] sm:$0xff]  ;;  %v4959_v7 = vcombine.high %v1521_v3, %v1525_v5 }
 0x220   : > { %2999 = vmatprep.subr.bf16.mxu1 %v4887_v12  ;;  %3040 = vmatprep.subr.bf16.mxu0 %v5015_v16  ;;  %v5086_v10 = vcombine.low %v1649_v6, %v1653_v8  ;;  %v5087_v11 = vcombine.high %v1649_v6, %v1653_v8  ;;  %v1513_v12 = vld [vmem:[#allocation15 + $0x200] sm:$0xff] }
 0x221   : > { %v4951_v16 = vcombine.high %v1513_v12, %v1517_v13 }
 0x223   : > { %3000 = vmatpush1.bf16.msra.mxu1 %v4886_v14  ;;  %3041 = vmatpush1.bf16.msra.mxu0 %v5014_v15  ;;  %v1641_v14 = vld [vmem:[#allocation15 + $0x600] sm:$0xff]  ;;  %v4950_v15 = vcombine.low %v1513_v12, %v1517_v13 }
 0x224   : > { %3001 = vmatprep.subr.bf16.mxu1 %v5007_v26  ;;  %3042 = vmatprep.subr.bf16.mxu0 %v5135_v30  ;;  %v5078_v22 = vcombine.low %v1641_v14, %v1645_v17  ;;  %v5079_v25 = vcombine.high %v1641_v14, %v1645_v17  ;;  %v6591_v26 = vld [vmem:[#allocation15 + $0x1c8] sm:$0xff] }
 0x225   : > { %v6599_v30 = vld [vmem:[#allocation15 + $0x5e8] sm:$0xff]  ;;  %v4944_v31 = vcombine.low %v6591_v26, %v6593_v27 }
 0x227   : > { %3002 = vmatpush2.bf16.msra.mxu1 %v5006_v28  ;;  %3043 = vmatpush2.bf16.msra.mxu0 %v5134_v29  ;;  %v6595_v28 = vld [vmem:[#allocation15 + $0x5c8] sm:$0xff]  ;;  %v4945_v29 = vcombine.high %v6591_v26, %v6593_v27 }
 0x228   : > { %3003 = vmatprep.subr.bf16.mxu1 %v4999_v34  ;;  %3044 = vmatprep.subr.bf16.mxu0 %v5127_v38  ;;  %v5072_v32 = vcombine.low %v6595_v28, %v6599_v30  ;;  %v5073_v33 = vcombine.high %v6595_v28, %v6599_v30 }
 0x22b   : > { %3004 = vmatpush2.bf16.msra.mxu1 %v4998_v36  ;;  %3045 = vmatpush2.bf16.msra.mxu0 %v5126_v37 }
 0x22c   : > { %3005 = vmatprep.subr.bf16.mxu1 %v4991_v20  ;;  %3046 = vmatprep.subr.bf16.mxu0 %v5119_v40 }
 0x22f   : > { %3006 = vmatpush2.bf16.msra.mxu1 %v4990_v24  ;;  %3047 = vmatpush2.bf16.msra.mxu0 %v5118_v39 }
 0x230   : > { %3007 = vmatprep.subr.bf16.mxu1 %v4983_v44  ;;  %3048 = vmatprep.subr.bf16.mxu0 %v5111_v48 }
 0x233   : > { %3008 = vmatpush2.bf16.msra.mxu1 %v4982_v46  ;;  %3049 = vmatpush2.bf16.msra.mxu0 %v5110_v47 }
 0x234   : > { %3009 = vmatprep.subr.bf16.mxu1 %v4975_v52  ;;  %3050 = vmatprep.subr.bf16.mxu0 %v5103_v56 }
 0x237   : > { %3010 = vmatpush2.bf16.msra.mxu1 %v4974_v54  ;;  %3051 = vmatpush2.bf16.msra.mxu0 %v5102_v55 }
 0x238   : > { %3011 = vmatprep.subr.bf16.mxu1 %v4967_v60  ;;  %3052 = vmatprep.subr.bf16.mxu0 %v5095_v0 }
 0x23b   : > { %3012 = vmatpush2.bf16.msra.mxu1 %v4966_v62  ;;  %3053 = vmatpush2.bf16.msra.mxu0 %v5094_v63 }
 0x23c   : > { %3013 = vmatprep.subr.bf16.mxu1 %v4959_v7  ;;  %3054 = vmatprep.subr.bf16.mxu0 %v5087_v11 }
 0x23f   : > { %3014 = vmatpush2.bf16.msra.mxu1 %v4958_v9  ;;  %3055 = vmatpush2.bf16.msra.mxu0 %v5086_v10 }
 0x240   : > { %3015 = vmatprep.subr.bf16.mxu1 %v4951_v16  ;;  %3056 = vmatprep.subr.bf16.mxu0 %v5079_v25 }
 0x243   : > { %3016 = vmatpush2.bf16.msra.mxu1 %v4950_v15  ;;  %3057 = vmatpush2.bf16.msra.mxu0 %v5078_v22 }
 0x244   : > { %3067 = vmatprep.subr.bf16.mxu1 %v4945_v29  ;;  %3108 = vmatprep.subr.bf16.mxu0 %v5073_v33 }
 0x2c6   : > { %v1265_v34 = vpop.f32.mrf.mxu1  ;;  %v1306_v35 = vpop.f32.mrf.mxu0 }
 0x2c7   : > { %v1315_v36 = vrot.slane %v1265_v34, 4  ;;  %v1327_v37 = vrot.slane %v1306_v35, 4 }
 0x2c8   : > { %v1267_v38 = vpop.f32.mrf.mxu1  ;;  %v1308_v18 = vpop.f32.mrf.mxu0 }
 0x2c9   : > { %v1316_v19 = vadd.f32 %v1315_v36, %v1265_v34  ;;  %v1328_v21 = vadd.f32 %v1327_v37, %v1306_v35  ;;  %v1321_v20 = vrot.slane %v1267_v38, 4  ;;  %v1333_v23 = vrot.slane %v1308_v18, 4 }
 0x2ca   : > { %v1269_v24 = vpop.f32.mrf.mxu1  ;;  %v1310_v39 = vpop.f32.mrf.mxu0 }
 0x2cb   : > { %v1317_v40 = vrot.slane %v1316_v19, 2  ;;  %v1329_v41 = vrot.slane %v1328_v21, 2  ;;  %v1322_v42 = vadd.f32 %v1321_v20, %v1267_v38  ;;  %v1334_v43 = vadd.f32 %v1333_v23, %v1308_v18 }
 0x2cc   : > { %v1270_v44 = vpop.f32.mrf.mxu1  ;;  %v1311_v45 = vpop.f32.mrf.mxu0 }
 0x2cd   : > { %v1318_v46 = vadd.f32 %v1317_v40, %v1316_v19  ;;  %v1330_v47 = vadd.f32 %v1329_v41, %v1328_v21  ;;  %v1323_v48 = vrot.slane %v1322_v42, 2  ;;  %v1335_v49 = vrot.slane %v1334_v43, 2 }
 0x2cf   : > { %v1319_v50 = vrot.slane %v1318_v46, 1  ;;  %v1331_v51 = vrot.slane %v1330_v47, 1  ;;  %v1324_v52 = vadd.f32 %v1323_v48, %v1322_v42  ;;  %v1336_v53 = vadd.f32 %v1335_v49, %v1334_v43  ;;  %v1313_v49 = vld [vmem:[#allocation12] sm:$0xf] }
 0x2d1   : > { %v1320_v54 = vadd.f32 %v1319_v50, %v1318_v46  ;;  %v1332_v55 = vadd.f32 %v1331_v51, %v1330_v47  ;;  %v1325_v56 = vrot.slane %v1324_v52, 1  ;;  %v1337_v57 = vrot.slane %v1336_v53, 1 }
 0x2d2   : > { %v6608_v50 = vsub.s32 2, %v6573_v1  ;;  %v6611_v51 = vsub.s32 3, %v6573_v1 }
 0x2d3   : > { %v1339_v58 = vmul.f32 0.125, %v1320_v54  ;;  %v1341_v59 = vmul.f32 0.125, %v1332_v55  ;;  %v1326_v60 = vadd.f32 %v1325_v56, %v1324_v52  ;;  %v1338_v61 = vadd.f32 %v1337_v57, %v1336_v53  ;;  %v1314_v52 = vld [vmem:[#allocation14] sm:$0xf] }
 0x2d4   : > { %v1395_v53 = vrot.slane %v1313_v49, %v6576_v2  ;;  %v1403_v55 = vrot.slane %v1313_v49, %v6608_v50 }
 0x2d5   : > { %v1343_v62 = vsub.f32 %v1265_v34, %v1339_v58  ;;  %v1345_v63 = vsub.f32 %v1306_v35, %v1341_v59  ;;  %v1340_v0 = vmul.f32 0.125, %v1326_v60  ;;  %v1342_v3 = vmul.f32 0.125, %v1338_v61 }
 0x2d6   : > { %v1399_v58 = vrot.slane %v1313_v49, %v6579_v4  ;;  %v1420_v59 = vrot.slane %v1314_v52, %v6576_v2 }
 0x2d7   : > { %v1347_v5 = vmul.f32 %v1343_v62, %v1343_v62  ;;  %v1349_v6 = vmul.f32 %v1345_v63, %v1345_v63  ;;  %v1344_v7 = vsub.f32 %v1267_v38, %v1340_v0  ;;  %v1346_v8 = vsub.f32 %v1308_v18, %v1342_v3 }
 0x2d8   : > { %v1407_v0 = vrot.slane %v1313_v49, %v6611_v51  ;;  %v1428_v3 = vrot.slane %v1314_v52, %v6608_v50  ;;  %v1606_v49 = vld [vmem:[#allocation15 + $0x4e8] sm:$0xff] }
 0x2d9   : > { %v1351_v9 = vrot.slane %v1347_v5, 4  ;;  %v1363_v10 = vrot.slane %v1349_v6, 4  ;;  %v1348_v11 = vmul.f32 %v1344_v7, %v1344_v7  ;;  %v1350_v12 = vmul.f32 %v1346_v8, %v1346_v8 }
 0x2db   : > { %v1352_v13 = vadd.f32 %v1351_v9, %v1347_v5  ;;  %v1364_v14 = vadd.f32 %v1363_v10, %v1349_v6  ;;  %v1357_v15 = vrot.slane %v1348_v11, 4  ;;  %v1369_v16 = vrot.slane %v1350_v12, 4 }
 0x2dc   : > { %v1424_v10 = vrot.slane %v1314_v52, %v6579_v4 }
 0x2dd   : > { %v1353_v17 = vrot.slane %v1352_v13, 2  ;;  %v1365_v22 = vrot.slane %v1364_v14, 2  ;;  %v1358_v25 = vadd.f32 %v1357_v15, %v1348_v11  ;;  %v1370_v29 = vadd.f32 %v1369_v16, %v1350_v12 }
 0x2df   : > { %v1354_v33 = vadd.f32 %v1353_v17, %v1352_v13  ;;  %v1366_v34 = vadd.f32 %v1365_v22, %v1364_v14  ;;  %v1359_v35 = vrot.slane %v1358_v25, 2  ;;  %v1371_v36 = vrot.slane %v1370_v29, 2 }
 0x2e0   : > { %v1432_v13 = vrot.slane %v1314_v52, %v6611_v51 }
 0x2e1   : > { %v1355_v37 = vrot.slane %v1354_v33, 1  ;;  %v1367_v19 = vrot.slane %v1366_v34, 1  ;;  %v1360_v38 = vadd.f32 %v1359_v35, %v1358_v25  ;;  %v1372_v18 = vadd.f32 %v1371_v36, %v1370_v29  ;;  %v1502_v35 = vld [vmem:[#allocation15 + $0x1a8] sm:$0xff] }
 0x2e3   : > { %v1356_v21 = vadd.f32 %v1355_v37, %v1354_v33  ;;  %v1368_v20 = vadd.f32 %v1367_v19, %v1366_v34  ;;  %v1361_v23 = vrot.slane %v1360_v38, 1  ;;  %v1373_v24 = vrot.slane %v1372_v18, 1  ;;  %v1498_v34 = vld [vmem:[#allocation15 + $0x188] sm:$0xff] }
 0x2e4   : > { %v1630_v37 = vld [vmem:[#allocation15 + $0x5a8] sm:$0xff] }
 0x2e5   : > { %v1375_v39 = vmul.f32 0.125, %v1356_v21  ;;  %v1377_v40 = vmul.f32 0.125, %v1368_v20  ;;  %v1362_v41 = vadd.f32 %v1361_v23, %v1360_v38  ;;  %v1374_v42 = vadd.f32 %v1373_v24, %v1372_v18  ;;  %v1490_v21 = vld [vmem:[#allocation15 + $0x148] sm:$0xff] }
 0x2e6   : > { %v4937_v18 = vcombine.high %v1498_v34, %v1502_v35  ;;  %v1494_v20 = vld [vmem:[#allocation15 + $0x168] sm:$0xff] }
 0x2e7   : > { %v1379_v43 = vadd.f32 1e-05, %v1375_v39  ;;  %v1381_v44 = vadd.f32 1e-05, %v1377_v40  ;;  %v1376_v45 = vmul.f32 0.125, %v1362_v41  ;;  %v1378_v46 = vmul.f32 0.125, %v1374_v42 }
 0x2e8   : > { %v1618_v24 = vld [vmem:[#allocation15 + $0x548] sm:$0xff]  ;;  %v4936_v40 = vcombine.low %v1498_v34, %v1502_v35  ;;  %v4929_v42 = vcombine.high %v1490_v21, %v1494_v20  ;;  %v4928_v26 = vcombine.low %v1490_v21, %v1494_v20 }
 0x2e9   : > { %5579 = vrsqrt.f32 %v1379_v43  ;;  %v1380_v47 = vadd.f32 1e-05, %v1376_v45  ;;  %v1382_v48 = vadd.f32 1e-05, %v1378_v46  ;;  %v1622_v39 = vld [vmem:[#allocation15 + $0x568] sm:$0xff] }
 0x2ea   : > { %5581 = vrsqrt.f32 %v1381_v44  ;;  %v5057_v43 = vcombine.high %v1618_v24, %v1622_v39  ;;  %v1482_v44 = vld [vmem:[#allocation15 + $0x108] sm:$0xff]  ;;  %v5056_v27 = vcombine.low %v1618_v24, %v1622_v39 }
 0x2eb   : > { %5583 = vrsqrt.f32 %v1380_v47  ;;  %v1486_v45 = vld [vmem:[#allocation15 + $0x128] sm:$0xff] }
 0x2ec   : > { %5585 = vrsqrt.f32 %v1382_v48  ;;  %v1610_v46 = vld [vmem:[#allocation15 + $0x508] sm:$0xff]  ;;  %v4921_v28 = vcombine.high %v1482_v44, %v1486_v45  ;;  %v4920_v52 = vcombine.low %v1482_v44, %v1486_v45 }
 0x2ed   : > { %v1614_v47 = vld [vmem:[#allocation15 + $0x528] sm:$0xff] }
 0x2ee   : > { %v5049_v30 = vcombine.high %v1610_v46, %v1614_v47  ;;  %v1602_v48 = vld [vmem:[#allocation15 + $0x4c8] sm:$0xff] }
 0x2ef   : > { %v1574_v34 = vld [vmem:[#allocation15 + $0x3e8] sm:$0xff] }
 0x2f0   : > { %v1698_v35 = vld [vmem:[#allocation15 + $0x7c8] sm:$0xff] }
 0x2f1   : > { %v1566_v24 = vld [vmem:[#allocation15 + $0x3a8] sm:$0xff] }
 0x2f2   : > { %v1690_v39 = vld [vmem:[#allocation15 + $0x788] sm:$0xff] }
 0x2f3   : > { %v1554_v45 = vld [vmem:[#allocation15 + $0x348] sm:$0xff] }
 0x2f6   : > { %v5580_v54 = vpop.eup %5579 }
 0x2f7   : > { %v5582_v56 = vpop.eup %5581  ;;  %v1387_v57 = vmul.f32 %v5580_v54, %v1343_v62 }
 0x2f8   : > { %v5584_v60 = vpop.eup %5583  ;;  %v1389_v61 = vmul.f32 %v5582_v56, %v1345_v63  ;;  %v1466_v56 = vld [vmem:[#allocation15 + $0x88] sm:$0xff] }
 0x2f9   : > { %v5586_v5 = vpop.eup %5585  ;;  %v1412_v6 = vmul.f32 %v1395_v53, %v1387_v57  ;;  %v1388_v9 = vmul.f32 %v5584_v60, %v1344_v7  ;;  %v1626_v7 = vld [vmem:[#allocation15 + $0x588] sm:$0xff]  ;;  %v5048_v53 = vcombine.low %v1610_v46, %v1614_v47 }
 0x2fa   : > { %v1414_v11 = vmul.f32 %v1403_v55, %v1389_v61  ;;  %v1390_v12 = vmul.f32 %v5586_v5, %v1346_v8  ;;  %v5065_v23 = vcombine.high %v1626_v7, %v1630_v37  ;;  %v5064_v41 = vcombine.low %v1626_v7, %v1630_v37  ;;  %v1470_v57 = vld [vmem:[#allocation15 + $0xa8] sm:$0xff] }
 0x2fb   : > { %v1413_v62 = vmul.f32 %v1399_v58, %v1388_v9  ;;  %v1437_v14 = vadd.f32 %v1420_v59, %v1412_v6  ;;  %v5041_v55 = vcombine.high %v1602_v48, %v1606_v49  ;;  %v1594_v58 = vld [vmem:[#allocation15 + $0x488] sm:$0xff]  ;;  %v5040_v61 = vcombine.low %v1602_v48, %v1606_v49 }
 0x2fc   : > { %v1415_v15 = vmul.f32 %v1407_v0, %v1390_v12  ;;  %v1439_v16 = vadd.f32 %v1428_v3, %v1414_v11  ;;  %v1598_v59 = vld [vmem:[#allocation15 + $0x4a8] sm:$0xff]  ;;  %v4905_v0 = vcombine.high %v1466_v56, %v1470_v57  ;;  %v4904_v11 = vcombine.low %v1466_v56, %v1470_v57 }
 0x2fd   : > { %v1438_v17 = vadd.f32 %v1424_v10, %v1413_v62  ;;  %v1441_v63 = vmax.f32 %v1437_v14, 0.0  ;;  %v5033_v3 = vcombine.high %v1594_v58, %v1598_v59  ;;  %v1458_v5 = vld [vmem:[#allocation15 + $0x48] sm:$0xff]  ;;  %v5032_v12 = vcombine.low %v1594_v58, %v1598_v59 }
 0x2fe   : > { %v1440_v22 = vadd.f32 %v1432_v13, %v1415_v15  ;;  %v1443_v29 = vmax.f32 %v1439_v16, 0.0  ;;  %v1462_v6 = vld [vmem:[#allocation15 + $0x68] sm:$0xff] }
 0x2ff   : > { %v1442_v25 = vmax.f32 %v1438_v17, 0.0  ;;  %v6625_v8 = vpack.c.bf16 %v1441_v63, %v1441_v63  ;;  %v1586_v9 = vld [vmem:[#allocation15 + $0x448] sm:$0xff]  ;;  %v4897_v13 = vcombine.high %v1458_v5, %v1462_v6 }
 0x300   : > { %v1444_v33 = vmax.f32 %v1440_v22, 0.0  ;;  %v6628_v38 = vpack.c.bf16 %v1443_v29, %v1443_v29  ;;  %v1590_v10 = vld [vmem:[#allocation15 + $0x468] sm:$0xff]  ;;  %v4896_v22 = vcombine.low %v1458_v5, %v1462_v6 }
 0x301   : > { %v6621_v36 = vpack.c.bf16 %v1442_v25, %v1442_v25  ;;  %v5025_v62 = vcombine.high %v1586_v9, %v1590_v10  ;;  %v1450_v14 = vld [vmem:[#allocation15 + $0x8] sm:$0xff]  ;;  %v5024_v63 = vcombine.low %v1586_v9, %v1590_v10 }
 0x302   : > { %v6623_v19 = vpack.c.bf16 %v1444_v33, %v1444_v33  ;;  %v1454_v15 = vld [vmem:[#allocation15 + $0x28] sm:$0xff] }
 0x303   : > { %3017 = vmatprep.mubr.bf16.mxu1 %v6621_v36  ;;  %v1578_v16 = vld [vmem:[#allocation15 + $0x408] sm:$0xff]  ;;  %v4889_v25 = vcombine.high %v1450_v14, %v1454_v15  ;;  %v4888_v37 = vcombine.low %v1450_v14, %v1454_v15 }
 0x304   : > { %3058 = vmatprep.mubr.bf16.mxu0 %v6623_v19  ;;  %3018 = vmatmul.mubr.bf16.vlgmr.msra.gmra.mxu1 %v6625_v8  ;;  %v1582_v17 = vld [vmem:[#allocation15 + $0x428] sm:$0xff] }
 0x305   : > { %3059 = vmatmul.mubr.bf16.vlgmr.msra.gmra.mxu0 %v6628_v38  ;;  %3068 = vmatpush1.bf16.msra.mxu1 %v4944_v31  ;;  %v1474_v31 = vld [vmem:[#allocation15 + $0xc8] sm:$0xff]  ;;  %v5017_v29 = vcombine.high %v1578_v16, %v1582_v17 }
 0x306   : > { %3109 = vmatpush1.bf16.msra.mxu0 %v5072_v32  ;;  %3099 = vmatprep.mubr.bf16.mxu1 %v6621_v36  ;;  %v1478_v32 = vld [vmem:[#allocation15 + $0xe8] sm:$0xff] }
 0x307   : > { %3140 = vmatprep.mubr.bf16.mxu0 %v6623_v19  ;;  %3069 = vmatprep.subr.bf16.mxu1 %v4937_v18  ;;  %v4913_v54 = vcombine.high %v1474_v31, %v1478_v32  ;;  %v4912_v60 = vcombine.low %v1474_v31, %v1478_v32  ;;  %v1570_v33 = vld [vmem:[#allocation15 + $0x3c8] sm:$0xff]  ;;  %v5016_v18 = vcombine.low %v1578_v16, %v1582_v17 }
 0x308   : > { %3110 = vmatprep.subr.bf16.mxu0 %v5065_v23  ;;  %v1702_v7 = vld [vmem:[#allocation15 + $0x7e8] sm:$0xff]  ;;  %v5009_v21 = vcombine.high %v1570_v33, %v1574_v34 }
 0x309   : > { %3070 = vmatpush1.bf16.msra.mxu1 %v4936_v40  ;;  %v5137_v20 = vcombine.high %v1698_v35, %v1702_v7  ;;  %v1562_v23 = vld [vmem:[#allocation15 + $0x388] sm:$0xff] }
 0x30a   : > { %3111 = vmatpush1.bf16.msra.mxu0 %v5064_v41  ;;  %3071 = vmatprep.subr.bf16.mxu1 %v4929_v42  ;;  %v1694_v40 = vld [vmem:[#allocation15 + $0x7a8] sm:$0xff]  ;;  %v5008_v41 = vcombine.low %v1570_v33, %v1574_v34  ;;  %v5136_v42 = vcombine.low %v1698_v35, %v1702_v7 }
 0x30b   : > { %3112 = vmatprep.subr.bf16.mxu0 %v5057_v43  ;;  %v5001_v43 = vcombine.high %v1562_v23, %v1566_v24  ;;  %v5129_v44 = vcombine.high %v1690_v39, %v1694_v40  ;;  %v1558_v46 = vld [vmem:[#allocation15 + $0x368] sm:$0xff] }
 0x30c   : > { %v1682_v47 = vld [vmem:[#allocation15 + $0x748] sm:$0xff] }
 0x30d   : > { %3072 = vmatpush1.bf16.msra.mxu1 %v4928_v26  ;;  %v1686_v26 = vld [vmem:[#allocation15 + $0x768] sm:$0xff] }
 0x30e   : > { %3113 = vmatpush1.bf16.msra.mxu0 %v5056_v27  ;;  %3073 = vmatprep.subr.bf16.mxu1 %v4921_v28  ;;  %v5000_v27 = vcombine.low %v1562_v23, %v1566_v24  ;;  %v5128_v28 = vcombine.low %v1690_v39, %v1694_v40  ;;  %v5121_v31 = vcombine.high %v1682_v47, %v1686_v26  ;;  %v1546_v32 = vld [vmem:[#allocation15 + $0x308] sm:$0xff]  ;;  %v1507_v24 = vld [vmem:[#allocation15 + $0x1d0] sm:$0xff] }
 0x30f   : > { %3114 = vmatprep.subr.bf16.mxu0 %v5049_v30  ;;  %v4993_v30 = vcombine.high %v1554_v45, %v1558_v46  ;;  %v1550_v48 = vld [vmem:[#allocation15 + $0x328] sm:$0xff]  ;;  %v1511_v39 = vld [vmem:[#allocation15 + $0x1f0] sm:$0xff] }
 0x310   : > { %v1674_v49 = vld [vmem:[#allocation15 + $0x708] sm:$0xff]  ;;  %v1635_v40 = vld [vmem:[#allocation15 + $0x5d0] sm:$0xff] }
 0x311   : > { %3074 = vmatpush1.bf16.msra.mxu1 %v4920_v52  ;;  %v1678_v52 = vld [vmem:[#allocation15 + $0x728] sm:$0xff] }
 0x312   : > { %3115 = vmatpush1.bf16.msra.mxu0 %v5048_v53  ;;  %3075 = vmatprep.subr.bf16.mxu1 %v4913_v54  ;;  %v4992_v53 = vcombine.low %v1554_v45, %v1558_v46  ;;  %v5120_v54 = vcombine.low %v1682_v47, %v1686_v26  ;;  %v5113_v56 = vcombine.high %v1674_v49, %v1678_v52  ;;  %v1538_v57 = vld [vmem:[#allocation15 + $0x2c8] sm:$0xff]  ;;  %v1499_v46 = vld [vmem:[#allocation15 + $0x190] sm:$0xff] }
 0x313   : > { %3116 = vmatprep.subr.bf16.mxu0 %v5041_v55  ;;  %v4985_v55 = vcombine.high %v1546_v32, %v1550_v48  ;;  %v1542_v58 = vld [vmem:[#allocation15 + $0x2e8] sm:$0xff]  ;;  %v1503_v47 = vld [vmem:[#allocation15 + $0x1b0] sm:$0xff]  ;;  %v4946_v26 = vcombine.low %v1507_v24, %v1511_v39 }
 0x314   : > { %v1666_v59 = vld [vmem:[#allocation15 + $0x6c8] sm:$0xff] }
 0x315   : > { %3076 = vmatpush1.bf16.msra.mxu1 %v4912_v60  ;;  %v1670_v60 = vld [vmem:[#allocation15 + $0x6e8] sm:$0xff] }
 0x316   : > { %3117 = vmatpush1.bf16.msra.mxu0 %v5040_v61  ;;  %3077 = vmatprep.subr.bf16.mxu1 %v4905_v0  ;;  %v4984_v61 = vcombine.low %v1546_v32, %v1550_v48  ;;  %v5112_v0 = vcombine.low %v1674_v49, %v1678_v52  ;;  %v5105_v5 = vcombine.high %v1666_v59, %v1670_v60  ;;  %v1530_v6 = vld [vmem:[#allocation15 + $0x288] sm:$0xff]  ;;  %v1491_v32 = vld [vmem:[#allocation15 + $0x150] sm:$0xff] }
 0x317   : > { %3118 = vmatprep.subr.bf16.mxu0 %v5033_v3  ;;  %v4977_v3 = vcombine.high %v1538_v57, %v1542_v58  ;;  %v1534_v9 = vld [vmem:[#allocation15 + $0x2a8] sm:$0xff]  ;;  %v1495_v48 = vld [vmem:[#allocation15 + $0x170] sm:$0xff] }
 0x318   : > { %v1658_v10 = vld [vmem:[#allocation15 + $0x688] sm:$0xff]  ;;  %v1619_v52 = vld [vmem:[#allocation15 + $0x550] sm:$0xff] }
 0x319   : > { %3078 = vmatpush1.bf16.msra.mxu1 %v4904_v11  ;;  %v1662_v11 = vld [vmem:[#allocation15 + $0x6a8] sm:$0xff] }
 0x31a   : > { %3119 = vmatpush1.bf16.msra.mxu0 %v5032_v12  ;;  %3079 = vmatprep.subr.bf16.mxu1 %v4897_v13  ;;  %v4976_v12 = vcombine.low %v1538_v57, %v1542_v58  ;;  %v5104_v13 = vcombine.low %v1666_v59, %v1670_v60  ;;  %v5097_v14 = vcombine.high %v1658_v10, %v1662_v11  ;;  %v1522_v15 = vld [vmem:[#allocation15 + $0x248] sm:$0xff]  ;;  %v1483_v58 = vld [vmem:[#allocation15 + $0x110] sm:$0xff] }
 0x31b   : > { %3120 = vmatprep.subr.bf16.mxu0 %v5025_v62  ;;  %v4969_v62 = vcombine.high %v1530_v6, %v1534_v9  ;;  %v1526_v16 = vld [vmem:[#allocation15 + $0x268] sm:$0xff]  ;;  %v1487_v59 = vld [vmem:[#allocation15 + $0x130] sm:$0xff] }
 0x31c   : > { %v1650_v17 = vld [vmem:[#allocation15 + $0x648] sm:$0xff]  ;;  %v1611_v60 = vld [vmem:[#allocation15 + $0x510] sm:$0xff] }
 0x31d   : > { %3080 = vmatpush1.bf16.msra.mxu1 %v4896_v22  ;;  %v1654_v22 = vld [vmem:[#allocation15 + $0x668] sm:$0xff] }
 0x31e   : > { %3121 = vmatpush1.bf16.msra.mxu0 %v5024_v63  ;;  %3081 = vmatprep.subr.bf16.mxu1 %v4889_v25  ;;  %v4968_v63 = vcombine.low %v1530_v6, %v1534_v9  ;;  %v5096_v25 = vcombine.low %v1658_v10, %v1662_v11  ;;  %v5089_v33 = vcombine.high %v1650_v17, %v1654_v22  ;;  %v1514_v34 = vld [vmem:[#allocation15 + $0x208] sm:$0xff]  ;;  %v1475_v9 = vld [vmem:[#allocation15 + $0xd0] sm:$0xff] }
 0x31f   : > { %3122 = vmatprep.subr.bf16.mxu0 %v5017_v29  ;;  %v4961_v29 = vcombine.high %v1522_v15, %v1526_v16  ;;  %v1518_v35 = vld [vmem:[#allocation15 + $0x228] sm:$0xff]  ;;  %v1479_v10 = vld [vmem:[#allocation15 + $0xf0] sm:$0xff] }
 0x320   : > { %v1642_v7 = vld [vmem:[#allocation15 + $0x608] sm:$0xff]  ;;  %v1603_v11 = vld [vmem:[#allocation15 + $0x4d0] sm:$0xff] }
 0x321   : > { %3082 = vmatpush1.bf16.msra.mxu1 %v4888_v37  ;;  %v1646_v37 = vld [vmem:[#allocation15 + $0x628] sm:$0xff] }
 0x322   : > { %3123 = vmatpush1.bf16.msra.mxu0 %v5016_v18  ;;  %3083 = vmatprep.subr.bf16.mxu1 %v5009_v21  ;;  %v4960_v18 = vcombine.low %v1522_v15, %v1526_v16  ;;  %v5088_v21 = vcombine.low %v1650_v17, %v1654_v22  ;;  %v5081_v23 = vcombine.high %v1642_v7, %v1646_v37  ;;  %v1467_v16 = vld [vmem:[#allocation15 + $0x90] sm:$0xff] }
 0x323   : > { %3124 = vmatprep.subr.bf16.mxu0 %v5137_v20  ;;  %v4953_v20 = vcombine.high %v1514_v34, %v1518_v35  ;;  %v1471_v17 = vld [vmem:[#allocation15 + $0xb0] sm:$0xff] }
 0x324   : > { %v1595_v22 = vld [vmem:[#allocation15 + $0x490] sm:$0xff] }
 0x325   : > { %3084 = vmatpush2.bf16.msra.mxu1 %v5008_v41  ;;  %v1639_v41 = vld [vmem:[#allocation15 + $0x5f0] sm:$0xff] }
 0x326   : > { %3125 = vmatpush2.bf16.msra.mxu0 %v5136_v42  ;;  %3085 = vmatprep.subr.bf16.mxu1 %v5001_v43  ;;  %v4952_v42 = vcombine.low %v1514_v34, %v1518_v35  ;;  %v5080_v43 = vcombine.low %v1642_v7, %v1646_v37  ;;  %v5075_v45 = vcombine.high %v1635_v40, %v1639_v41  ;;  %v1459_v35 = vld [vmem:[#allocation15 + $0x50] sm:$0xff] }
 0x327   : > { %3126 = vmatprep.subr.bf16.mxu0 %v5129_v44  ;;  %v4947_v44 = vcombine.high %v1507_v24, %v1511_v39  ;;  %v1463_v7 = vld [vmem:[#allocation15 + $0x70] sm:$0xff] }
 0x328   : > { %v1587_v37 = vld [vmem:[#allocation15 + $0x450] sm:$0xff] }
 0x329   : > { %3086 = vmatpush2.bf16.msra.mxu1 %v5000_v27  ;;  %v1627_v27 = vld [vmem:[#allocation15 + $0x590] sm:$0xff] }
 0x32a   : > { %3127 = vmatpush2.bf16.msra.mxu0 %v5128_v28  ;;  %3087 = vmatprep.subr.bf16.mxu1 %v4993_v30  ;;  %v1631_v28 = vld [vmem:[#allocation15 + $0x5b0] sm:$0xff]  ;;  %v5074_v30 = vcombine.low %v1635_v40, %v1639_v41 }
 0x32b   : > { %3128 = vmatprep.subr.bf16.mxu0 %v5121_v31  ;;  %v4939_v31 = vcombine.high %v1499_v46, %v1503_v47  ;;  %v5067_v49 = vcombine.high %v1627_v27, %v1631_v28  ;;  %v1451_v39 = vld [vmem:[#allocation15 + $0x10] sm:$0xff] }
 0x32c   : > { %v1455_v40 = vld [vmem:[#allocation15 + $0x30] sm:$0xff] }
 0x32d   : > { %3088 = vmatpush2.bf16.msra.mxu1 %v4992_v53  ;;  %v1623_v53 = vld [vmem:[#allocation15 + $0x570] sm:$0xff] }
 0x32e   : > { %3129 = vmatpush2.bf16.msra.mxu0 %v5120_v54  ;;  %3089 = vmatprep.subr.bf16.mxu1 %v4985_v55  ;;  %v4938_v54 = vcombine.low %v1499_v46, %v1503_v47  ;;  %v5066_v55 = vcombine.low %v1627_v27, %v1631_v28  ;;  %v5059_v57 = vcombine.high %v1619_v52, %v1623_v53  ;;  %v1579_v41 = vld [vmem:[#allocation15 + $0x410] sm:$0xff] }
 0x32f   : > { %3130 = vmatprep.subr.bf16.mxu0 %v5113_v56  ;;  %v4931_v56 = vcombine.high %v1491_v32, %v1495_v48  ;;  %v1571_v47 = vld [vmem:[#allocation15 + $0x3d0] sm:$0xff] }
 0x330   : > { %v1699_v27 = vld [vmem:[#allocation15 + $0x7d0] sm:$0xff] }
 0x331   : > { %3090 = vmatpush2.bf16.msra.mxu1 %v4984_v61  ;;  %v1615_v61 = vld [vmem:[#allocation15 + $0x530] sm:$0xff] }
 0x332   : > { %3131 = vmatpush2.bf16.msra.mxu0 %v5112_v0  ;;  %3091 = vmatprep.subr.bf16.mxu1 %v4977_v3  ;;  %v4930_v0 = vcombine.low %v1491_v32, %v1495_v48  ;;  %v5058_v3 = vcombine.low %v1619_v52, %v1623_v53  ;;  %v5051_v6 = vcombine.high %v1611_v60, %v1615_v61  ;;  %v1703_v28 = vld [vmem:[#allocation15 + $0x7f0] sm:$0xff] }
 0x333   : > { %3132 = vmatprep.subr.bf16.mxu0 %v5105_v5  ;;  %v4923_v5 = vcombine.high %v1483_v58, %v1487_v59  ;;  %v5139_v48 = vcombine.high %v1699_v27, %v1703_v28  ;;  %v1567_v52 = vld [vmem:[#allocation15 + $0x3b0] sm:$0xff] }
 0x334   : > { %v1691_v53 = vld [vmem:[#allocation15 + $0x790] sm:$0xff] }
 0x335   : > { %3092 = vmatpush2.bf16.msra.mxu1 %v4976_v12  ;;  %v1607_v12 = vld [vmem:[#allocation15 + $0x4f0] sm:$0xff] }
 0x336   : > { %3133 = vmatpush2.bf16.msra.mxu0 %v5104_v13  ;;  %3093 = vmatprep.subr.bf16.mxu1 %v4969_v62  ;;  %v4922_v13 = vcombine.low %v1483_v58, %v1487_v59  ;;  %v5050_v62 = vcombine.low %v1611_v60, %v1615_v61  ;;  %v5043_v15 = vcombine.high %v1603_v11, %v1607_v12  ;;  %v1555_v59 = vld [vmem:[#allocation15 + $0x350] sm:$0xff] }
 0x337   : > { %3134 = vmatprep.subr.bf16.mxu0 %v5097_v14  ;;  %v4915_v14 = vcombine.high %v1475_v9, %v1479_v10  ;;  %v1559_v60 = vld [vmem:[#allocation15 + $0x370] sm:$0xff] }
 0x338   : > { %v1683_v61 = vld [vmem:[#allocation15 + $0x750] sm:$0xff] }
 0x339   : > { %3094 = vmatpush2.bf16.msra.mxu1 %v4968_v63  ;;  %v1599_v63 = vld [vmem:[#allocation15 + $0x4b0] sm:$0xff] }
 0x33a   : > { %3135 = vmatpush2.bf16.msra.mxu0 %v5096_v25  ;;  %3095 = vmatprep.subr.bf16.mxu1 %v4961_v29  ;;  %v4914_v25 = vcombine.low %v1475_v9, %v1479_v10  ;;  %v5042_v29 = vcombine.low %v1603_v11, %v1607_v12  ;;  %v5035_v34 = vcombine.high %v1595_v22, %v1599_v63  ;;  %v1547_v10 = vld [vmem:[#allocation15 + $0x310] sm:$0xff] }
 0x33b   : > { %3136 = vmatprep.subr.bf16.mxu0 %v5089_v33  ;;  %v4907_v33 = vcombine.high %v1467_v16, %v1471_v17  ;;  %v1551_v11 = vld [vmem:[#allocation15 + $0x330] sm:$0xff] }
 0x33c   : > { %v1675_v12 = vld [vmem:[#allocation15 + $0x710] sm:$0xff] }
 0x33d   : > { %3096 = vmatpush2.bf16.msra.mxu1 %v4960_v18  ;;  %v1591_v18 = vld [vmem:[#allocation15 + $0x470] sm:$0xff] }
 0x33e   : > { %3137 = vmatpush2.bf16.msra.mxu0 %v5088_v21  ;;  %3097 = vmatprep.subr.bf16.mxu1 %v4953_v20  ;;  %v4906_v21 = vcombine.low %v1467_v16, %v1471_v17  ;;  %v5034_v20 = vcombine.low %v1595_v22, %v1599_v63  ;;  %v5027_v24 = vcombine.high %v1587_v37, %v1591_v18  ;;  %v1539_v17 = vld [vmem:[#allocation15 + $0x2d0] sm:$0xff] }
 0x33f   : > { %3138 = vmatprep.subr.bf16.mxu0 %v5081_v23  ;;  %v4899_v23 = vcombine.high %v1459_v35, %v1463_v7  ;;  %v1543_v22 = vld [vmem:[#allocation15 + $0x2f0] sm:$0xff] }
 0x340   : > { %v1667_v63 = vld [vmem:[#allocation15 + $0x6d0] sm:$0xff] }
 0x341   : > { %3098 = vmatpush2.bf16.msra.mxu1 %v4952_v42  ;;  %v1583_v42 = vld [vmem:[#allocation15 + $0x430] sm:$0xff] }
 0x342   : > { %3139 = vmatpush2.bf16.msra.mxu0 %v5080_v43  ;;  %3149 = vmatprep.subr.bf16.mxu1 %v4947_v44  ;;  %v4898_v43 = vcombine.low %v1459_v35, %v1463_v7  ;;  %v5026_v44 = vcombine.low %v1587_v37, %v1591_v18  ;;  %v5019_v46 = vcombine.high %v1579_v41, %v1583_v42  ;;  %v1531_v7 = vld [vmem:[#allocation15 + $0x290] sm:$0xff] }
 0x343   : > { %3190 = vmatprep.subr.bf16.mxu0 %v5075_v45  ;;  %v4891_v45 = vcombine.high %v1451_v39, %v1455_v40  ;;  %v1535_v37 = vld [vmem:[#allocation15 + $0x2b0] sm:$0xff] }
 0x344   : > { %3100 = vmatmul.mubr.bf16.vlgmr.msra.gmra.mxu1 %v6625_v8  ;;  %v1659_v18 = vld [vmem:[#allocation15 + $0x690] sm:$0xff] }
 0x345   : > { %3141 = vmatmul.mubr.bf16.vlgmr.msra.gmra.mxu0 %v6628_v38  ;;  %3150 = vmatpush1.bf16.msra.mxu1 %v4946_v26  ;;  %v1575_v26 = vld [vmem:[#allocation15 + $0x3f0] sm:$0xff] }
 0x346   : > { %3181 = vmatprep.mubr.bf16.mxu1 %v6621_v36  ;;  %3191 = vmatpush1.bf16.msra.mxu0 %v5074_v30  ;;  %v4890_v30 = vcombine.low %v1451_v39, %v1455_v40  ;;  %v5011_v32 = vcombine.high %v1571_v47, %v1575_v26  ;;  %v1523_v40 = vld [vmem:[#allocation15 + $0x250] sm:$0xff] }
 0x347   : > { %3222 = vmatprep.mubr.bf16.mxu0 %v6623_v19  ;;  %3151 = vmatprep.subr.bf16.mxu1 %v4939_v31  ;;  %v5018_v31 = vcombine.low %v1579_v41, %v1583_v42  ;;  %v1527_v41 = vld [vmem:[#allocation15 + $0x270] sm:$0xff] }
 0x348   : > { %3192 = vmatprep.subr.bf16.mxu0 %v5067_v49  ;;  %v1563_v49 = vld [vmem:[#allocation15 + $0x390] sm:$0xff] }
 0x349   : > { %3152 = vmatpush1.bf16.msra.mxu1 %v4938_v54  ;;  %v1695_v54 = vld [vmem:[#allocation15 + $0x7b0] sm:$0xff] }
 0x34a   : > { %3193 = vmatpush1.bf16.msra.mxu0 %v5066_v55  ;;  %3153 = vmatprep.subr.bf16.mxu1 %v4931_v56  ;;  %v5010_v55 = vcombine.low %v1571_v47, %v1575_v26  ;;  %v5138_v56 = vcombine.low %v1699_v27, %v1703_v28  ;;  %v5131_v58 = vcombine.high %v1691_v53, %v1695_v54  ;;  %v1651_v42 = vld [vmem:[#allocation15 + $0x650] sm:$0xff] }
 0x34b   : > { %3194 = vmatprep.subr.bf16.mxu0 %v5059_v57  ;;  %v5003_v57 = vcombine.high %v1563_v49, %v1567_v52  ;;  %v1515_v26 = vld [vmem:[#allocation15 + $0x210] sm:$0xff] }
 0x34c   : > { %v1519_v27 = vld [vmem:[#allocation15 + $0x230] sm:$0xff] }
 0x34d   : > { %3154 = vmatpush1.bf16.msra.mxu1 %v4930_v0  ;;  %v1687_v0 = vld [vmem:[#allocation15 + $0x770] sm:$0xff] }
 0x34e   : > { %3195 = vmatpush1.bf16.msra.mxu0 %v5058_v3  ;;  %3155 = vmatprep.subr.bf16.mxu1 %v4923_v5  ;;  %v5002_v3 = vcombine.low %v1563_v49, %v1567_v52  ;;  %v5130_v5 = vcombine.low %v1691_v53, %v1695_v54  ;;  %v5123_v9 = vcombine.high %v1683_v61, %v1687_v0  ;;  %v1643_v28 = vld [vmem:[#allocation15 + $0x610] sm:$0xff]  ;;  %v1508_v52 = vld [vmem:[#allocation15 + $0x1d8] sm:$0xff] }
 0x34f   : > { %3196 = vmatprep.subr.bf16.mxu0 %v5051_v6  ;;  %v4995_v6 = vcombine.high %v1555_v59, %v1559_v60  ;;  %v1512_v53 = vld [vmem:[#allocation15 + $0x1f8] sm:$0xff] }
 0x350   : > { %v1636_v54 = vld [vmem:[#allocation15 + $0x5d8] sm:$0xff] }
 0x351   : > { %3156 = vmatpush1.bf16.msra.mxu1 %v4922_v13  ;;  %v1679_v13 = vld [vmem:[#allocation15 + $0x730] sm:$0xff] }
 0x352   : > { %3197 = vmatpush1.bf16.msra.mxu0 %v5050_v62  ;;  %3157 = vmatprep.subr.bf16.mxu1 %v4915_v14  ;;  %v4994_v62 = vcombine.low %v1555_v59, %v1559_v60  ;;  %v5122_v14 = vcombine.low %v1683_v61, %v1687_v0  ;;  %v5115_v16 = vcombine.high %v1675_v12, %v1679_v13  ;;  %v1500_v60 = vld [vmem:[#allocation15 + $0x198] sm:$0xff] }
 0x353   : > { %3198 = vmatprep.subr.bf16.mxu0 %v5043_v15  ;;  %v4987_v15 = vcombine.high %v1547_v10, %v1551_v11  ;;  %v1504_v61 = vld [vmem:[#allocation15 + $0x1b8] sm:$0xff]  ;;  %v4948_v0 = vcombine.low %v1508_v52, %v1512_v53 }
 0x355   : > { %3158 = vmatpush1.bf16.msra.mxu1 %v4914_v25  ;;  %v1671_v25 = vld [vmem:[#allocation15 + $0x6f0] sm:$0xff] }
 0x356   : > { %3199 = vmatpush1.bf16.msra.mxu0 %v5042_v29  ;;  %3159 = vmatprep.subr.bf16.mxu1 %v4907_v33  ;;  %v4986_v29 = vcombine.low %v1547_v10, %v1551_v11  ;;  %v5114_v33 = vcombine.low %v1675_v12, %v1679_v13  ;;  %v5107_v35 = vcombine.high %v1667_v63, %v1671_v25  ;;  %v1492_v10 = vld [vmem:[#allocation15 + $0x158] sm:$0xff] }
 0x357   : > { %3200 = vmatprep.subr.bf16.mxu0 %v5035_v34  ;;  %v4979_v34 = vcombine.high %v1539_v17, %v1543_v22  ;;  %v1496_v11 = vld [vmem:[#allocation15 + $0x178] sm:$0xff] }
 0x358   : > { %v1620_v13 = vld [vmem:[#allocation15 + $0x558] sm:$0xff] }
 0x359   : > { %3160 = vmatpush1.bf16.msra.mxu1 %v4906_v21  ;;  %v1663_v21 = vld [vmem:[#allocation15 + $0x6b0] sm:$0xff] }
 0x35a   : > { %3201 = vmatpush1.bf16.msra.mxu0 %v5034_v20  ;;  %3161 = vmatprep.subr.bf16.mxu1 %v4899_v23  ;;  %v4978_v20 = vcombine.low %v1539_v17, %v1543_v22  ;;  %v5106_v23 = vcombine.low %v1667_v63, %v1671_v25  ;;  %v5099_v39 = vcombine.high %v1659_v18, %v1663_v21  ;;  %v1484_v22 = vld [vmem:[#allocation15 + $0x118] sm:$0xff] }
 0x35b   : > { %3202 = vmatprep.subr.bf16.mxu0 %v5027_v24  ;;  %v4971_v24 = vcombine.high %v1531_v7, %v1535_v37  ;;  %v1488_v63 = vld [vmem:[#allocation15 + $0x138] sm:$0xff] }
 0x35c   : > { %v1612_v25 = vld [vmem:[#allocation15 + $0x518] sm:$0xff] }
 0x35d   : > { %3162 = vmatpush1.bf16.msra.mxu1 %v4898_v43  ;;  %v1655_v43 = vld [vmem:[#allocation15 + $0x670] sm:$0xff] }
 0x35e   : > { %3203 = vmatpush1.bf16.msra.mxu0 %v5026_v44  ;;  %3163 = vmatprep.subr.bf16.mxu1 %v4891_v45  ;;  %v4970_v44 = vcombine.low %v1531_v7, %v1535_v37  ;;  %v5098_v45 = vcombine.low %v1659_v18, %v1663_v21  ;;  %v5091_v47 = vcombine.high %v1651_v42, %v1655_v43  ;;  %v1476_v7 = vld [vmem:[#allocation15 + $0xd8] sm:$0xff] }
 0x35f   : > { %3204 = vmatprep.subr.bf16.mxu0 %v5019_v46  ;;  %v4963_v46 = vcombine.high %v1523_v40, %v1527_v41  ;;  %v1480_v37 = vld [vmem:[#allocation15 + $0xf8] sm:$0xff] }
 0x360   : > { %v1604_v18 = vld [vmem:[#allocation15 + $0x4d8] sm:$0xff] }
 0x361   : > { %3164 = vmatpush1.bf16.msra.mxu1 %v4890_v30  ;;  %v1647_v30 = vld [vmem:[#allocation15 + $0x630] sm:$0xff]  ;;  %v1608_v21 = vld [vmem:[#allocation15 + $0x4f8] sm:$0xff] }
 0x362   : > { %3205 = vmatpush1.bf16.msra.mxu0 %v5018_v31  ;;  %3165 = vmatprep.subr.bf16.mxu1 %v5011_v32  ;;  %v4962_v31 = vcombine.low %v1523_v40, %v1527_v41  ;;  %v5090_v32 = vcombine.low %v1651_v42, %v1655_v43  ;;  %v5083_v49 = vcombine.high %v1643_v28, %v1647_v30  ;;  %v1472_v40 = vld [vmem:[#allocation15 + $0xb8] sm:$0xff] }
 0x363   : > { %3206 = vmatprep.subr.bf16.mxu0 %v5139_v48  ;;  %v4955_v48 = vcombine.high %v1515_v26, %v1519_v27  ;;  %v1596_v41 = vld [vmem:[#allocation15 + $0x498] sm:$0xff]  ;;  %v4916_v43 = vcombine.low %v1476_v7, %v1480_v37 }
 0x364   : > { %v1600_v42 = vld [vmem:[#allocation15 + $0x4b8] sm:$0xff] }
 0x365   : > { %3166 = vmatpush2.bf16.msra.mxu1 %v5010_v55  ;;  %v1640_v55 = vld [vmem:[#allocation15 + $0x5f8] sm:$0xff] }
 0x366   : > { %3207 = vmatpush2.bf16.msra.mxu0 %v5138_v56  ;;  %3167 = vmatprep.subr.bf16.mxu1 %v5003_v57  ;;  %v4954_v56 = vcombine.low %v1515_v26, %v1519_v27  ;;  %v5082_v57 = vcombine.low %v1643_v28, %v1647_v30  ;;  %v5077_v59 = vcombine.high %v1636_v54, %v1640_v55  ;;  %v1464_v26 = vld [vmem:[#allocation15 + $0x78] sm:$0xff] }
 0x367   : > { %3208 = vmatprep.subr.bf16.mxu0 %v5131_v58  ;;  %v4949_v58 = vcombine.high %v1508_v52, %v1512_v53  ;;  %v1588_v27 = vld [vmem:[#allocation15 + $0x458] sm:$0xff] }
 0x368   : > { %v1592_v28 = vld [vmem:[#allocation15 + $0x478] sm:$0xff] }
 0x369   : > { %3168 = vmatpush2.bf16.msra.mxu1 %v5002_v3  ;;  %v1628_v3 = vld [vmem:[#allocation15 + $0x598] sm:$0xff] }
 0x36a   : > { %3209 = vmatpush2.bf16.msra.mxu0 %v5130_v5  ;;  %3169 = vmatprep.subr.bf16.mxu1 %v4995_v6  ;;  %v1632_v5 = vld [vmem:[#allocation15 + $0x5b8] sm:$0xff]  ;;  %v5076_v6 = vcombine.low %v1636_v54, %v1640_v55 }
 0x36b   : > { %3210 = vmatprep.subr.bf16.mxu0 %v5123_v9  ;;  %v4941_v9 = vcombine.high %v1500_v60, %v1504_v61  ;;  %v5069_v12 = vcombine.high %v1628_v3, %v1632_v5  ;;  %v1456_v52 = vld [vmem:[#allocation15 + $0x38] sm:$0xff] }
 0x36c   : > { %v1580_v53 = vld [vmem:[#allocation15 + $0x418] sm:$0xff] }
 0x36d   : > { %3170 = vmatpush2.bf16.msra.mxu1 %v4994_v62  ;;  %v1624_v62 = vld [vmem:[#allocation15 + $0x578] sm:$0xff] }
 0x36e   : > { %3211 = vmatpush2.bf16.msra.mxu0 %v5122_v14  ;;  %3171 = vmatprep.subr.bf16.mxu1 %v4987_v15  ;;  %v4940_v14 = vcombine.low %v1500_v60, %v1504_v61  ;;  %v5068_v15 = vcombine.low %v1628_v3, %v1632_v5  ;;  %v5061_v17 = vcombine.high %v1620_v13, %v1624_v62  ;;  %v1584_v54 = vld [vmem:[#allocation15 + $0x438] sm:$0xff] }
 0x36f   : > { %3212 = vmatprep.subr.bf16.mxu0 %v5115_v16  ;;  %v4933_v16 = vcombine.high %v1492_v10, %v1496_v11  ;;  %v1576_v60 = vld [vmem:[#allocation15 + $0x3f8] sm:$0xff]  ;;  %v5020_v5 = vcombine.low %v1580_v53, %v1584_v54 }
 0x370   : > { %v1700_v61 = vld [vmem:[#allocation15 + $0x7d8] sm:$0xff] }
 0x371   : > { %3172 = vmatpush2.bf16.msra.mxu1 %v4986_v29  ;;  %v1616_v29 = vld [vmem:[#allocation15 + $0x538] sm:$0xff] }
 0x372   : > { %3213 = vmatpush2.bf16.msra.mxu0 %v5114_v33  ;;  %3173 = vmatprep.subr.bf16.mxu1 %v4979_v34  ;;  %v4932_v33 = vcombine.low %v1492_v10, %v1496_v11  ;;  %v5060_v34 = vcombine.low %v1620_v13, %v1624_v62  ;;  %v1564_v10 = vld [vmem:[#allocation15 + $0x398] sm:$0xff] }
 0x373   : > { %3214 = vmatprep.subr.bf16.mxu0 %v5107_v35  ;;  %v4925_v35 = vcombine.high %v1484_v22, %v1488_v63  ;;  %v1568_v11 = vld [vmem:[#allocation15 + $0x3b8] sm:$0xff] }
 0x374   : > { %v1696_v13 = vld [vmem:[#allocation15 + $0x7b8] sm:$0xff] }
 0x375   : > { %3174 = vmatpush2.bf16.msra.mxu1 %v4978_v20  ;;  %v5052_v20 = vcombine.low %v1612_v25, %v1616_v29 }
 0x376   : > { %3215 = vmatpush2.bf16.msra.mxu0 %v5106_v23  ;;  %3175 = vmatprep.subr.bf16.mxu1 %v4971_v24  ;;  %v4917_v23 = vcombine.high %v1476_v7, %v1480_v37  ;;  %v5045_v24 = vcombine.high %v1604_v18, %v1608_v21  ;;  %v1552_v7 = vld [vmem:[#allocation15 + $0x338] sm:$0xff] }
 0x377   : > { %3216 = vmatprep.subr.bf16.mxu0 %v5099_v39  ;;  %v1468_v39 = vld [vmem:[#allocation15 + $0x98] sm:$0xff] }
 0x378   : > { %v4908_v30 = vcombine.low %v1468_v39, %v1472_v40  ;;  %v1676_v37 = vld [vmem:[#allocation15 + $0x718] sm:$0xff] }
 0x379   : > { %3176 = vmatpush2.bf16.msra.mxu1 %v4970_v44  ;;  %v5044_v44 = vcombine.low %v1604_v18, %v1608_v21  ;;  %v1680_v18 = vld [vmem:[#allocation15 + $0x738] sm:$0xff] }
 0x37a   : > { %3217 = vmatpush2.bf16.msra.mxu0 %v5098_v45  ;;  %3177 = vmatprep.subr.bf16.mxu1 %v4963_v46  ;;  %v4909_v45 = vcombine.high %v1468_v39, %v1472_v40  ;;  %v5037_v46 = vcombine.high %v1596_v41, %v1600_v42  ;;  %v1544_v39 = vld [vmem:[#allocation15 + $0x2f8] sm:$0xff] }
 0x37b   : > { %3218 = vmatprep.subr.bf16.mxu0 %v5091_v47  ;;  %v1460_v47 = vld [vmem:[#allocation15 + $0x58] sm:$0xff] }
 0x37c   : > { %v4900_v55 = vcombine.low %v1460_v47, %v1464_v26  ;;  %v1668_v40 = vld [vmem:[#allocation15 + $0x6d8] sm:$0xff] }
 0x37d   : > { %3178 = vmatpush2.bf16.msra.mxu1 %v4962_v31  ;;  %v5036_v31 = vcombine.low %v1596_v41, %v1600_v42  ;;  %v1672_v41 = vld [vmem:[#allocation15 + $0x6f8] sm:$0xff] }
 0x37e   : > { %3219 = vmatpush2.bf16.msra.mxu0 %v5090_v32  ;;  %3179 = vmatprep.subr.bf16.mxu1 %v4955_v48  ;;  %v4901_v32 = vcombine.high %v1460_v47, %v1464_v26  ;;  %v5029_v48 = vcombine.high %v1588_v27, %v1592_v28  ;;  %v1536_v47 = vld [vmem:[#allocation15 + $0x2b8] sm:$0xff] }
 0x37f   : > { %3220 = vmatprep.subr.bf16.mxu0 %v5083_v49  ;;  %v1452_v49 = vld [vmem:[#allocation15 + $0x18] sm:$0xff] }
 0x380   : > { %v4892_v3 = vcombine.low %v1452_v49, %v1456_v52  ;;  %v1660_v26 = vld [vmem:[#allocation15 + $0x698] sm:$0xff] }
 0x381   : > { %3180 = vmatpush2.bf16.msra.mxu1 %v4954_v56  ;;  %v5028_v56 = vcombine.low %v1588_v27, %v1592_v28  ;;  %v1664_v27 = vld [vmem:[#allocation15 + $0x6b8] sm:$0xff] }
 0x382   : > { %3221 = vmatpush2.bf16.msra.mxu0 %v5082_v57  ;;  %3231 = vmatprep.subr.bf16.mxu1 %v4949_v58  ;;  %v4893_v57 = vcombine.high %v1452_v49, %v1456_v52  ;;  %v5021_v58 = vcombine.high %v1580_v53, %v1584_v54  ;;  %v1528_v49 = vld [vmem:[#allocation15 + $0x278] sm:$0xff] }
 0x383   : > { %3272 = vmatprep.subr.bf16.mxu0 %v5077_v59  ;;  %v1572_v59 = vld [vmem:[#allocation15 + $0x3d8] sm:$0xff] }
 0x384   : > { %3182 = vmatmul.mubr.bf16.vlgmr.msra.gmra.mxu1 %v6625_v8  ;;  %v5012_v62 = vcombine.low %v1572_v59, %v1576_v60  ;;  %v1652_v52 = vld [vmem:[#allocation15 + $0x658] sm:$0xff] }
 0x385   : > { %3223 = vmatmul.mubr.bf16.vlgmr.msra.gmra.mxu0 %v6628_v38  ;;  %3232 = vmatpush1.bf16.msra.mxu1 %v4948_v0  ;;  %v1704_v0 = vld [vmem:[#allocation15 + $0x7f8] sm:$0xff] }
 0x386   : > { %3263 = vmatprep.mubr.bf16.mxu1 %v6621_v36  ;;  %3273 = vmatpush1.bf16.msra.mxu0 %v5076_v6  ;;  %v5053_v36 = vcombine.high %v1612_v25, %v1616_v29  ;;  %v5013_v6 = vcombine.high %v1572_v59, %v1576_v60  ;;  %v1688_v25 = vld [vmem:[#allocation15 + $0x778] sm:$0xff]  ;;  %v5004_v29 = vcombine.low %v1564_v10, %v1568_v11 }
 0x387   : > { %3304 = vmatprep.mubr.bf16.mxu0 %v6623_v19  ;;  %3233 = vmatprep.subr.bf16.mxu1 %v4941_v9  ;;  %v4924_v19 = vcombine.low %v1484_v22, %v1488_v63  ;;  %v5141_v9 = vcombine.high %v1700_v61, %v1704_v0  ;;  %v1560_v22 = vld [vmem:[#allocation15 + $0x378] sm:$0xff] }
 0x388   : > { %3274 = vmatprep.subr.bf16.mxu0 %v5069_v12  ;;  %v1692_v12 = vld [vmem:[#allocation15 + $0x798] sm:$0xff] }
 0x389   : > { %3234 = vmatpush1.bf16.msra.mxu1 %v4940_v14  ;;  %v5140_v14 = vcombine.low %v1700_v61, %v1704_v0  ;;  %v1684_v63 = vld [vmem:[#allocation15 + $0x758] sm:$0xff] }
 0x38a   : > { %3275 = vmatpush1.bf16.msra.mxu0 %v5068_v15  ;;  %3235 = vmatprep.subr.bf16.mxu1 %v4933_v16  ;;  %v5005_v15 = vcombine.high %v1564_v10, %v1568_v11  ;;  %v5133_v16 = vcombine.high %v1692_v12, %v1696_v13  ;;  %v1656_v53 = vld [vmem:[#allocation15 + $0x678] sm:$0xff] }
 0x38b   : > { %3276 = vmatprep.subr.bf16.mxu0 %v5061_v17  ;;  %v1556_v17 = vld [vmem:[#allocation15 + $0x358] sm:$0xff] }
 0x38c   : > { %v4996_v21 = vcombine.low %v1556_v17, %v1560_v22  ;;  %v1520_v59 = vld [vmem:[#allocation15 + $0x238] sm:$0xff] }
 0x38d   : > { %3236 = vmatpush1.bf16.msra.mxu1 %v4932_v33  ;;  %v5132_v33 = vcombine.low %v1692_v12, %v1696_v13  ;;  %v1644_v60 = vld [vmem:[#allocation15 + $0x618] sm:$0xff] }
 0x38e   : > { %3277 = vmatpush1.bf16.msra.mxu0 %v5060_v34  ;;  %3237 = vmatprep.subr.bf16.mxu1 %v4925_v35  ;;  %v4997_v34 = vcombine.high %v1556_v17, %v1560_v22  ;;  %v5125_v35 = vcombine.high %v1684_v63, %v1688_v25  ;;  %v1648_v61 = vld [vmem:[#allocation15 + $0x638] sm:$0xff] }
 0x38f   : > { %3278 = vmatprep.subr.bf16.mxu0 %v5053_v36  ;;  %v1548_v36 = vld [vmem:[#allocation15 + $0x318] sm:$0xff]  ;;  %v5084_v10 = vcombine.low %v1644_v60, %v1648_v61 }
 0x390   : > { %v4988_v42 = vcombine.low %v1548_v36, %v1552_v7 }
 0x391   : > { %3238 = vmatpush1.bf16.msra.mxu1 %v4924_v19  ;;  %v5124_v19 = vcombine.low %v1684_v63, %v1688_v25 }
 0x392   : > { %3279 = vmatpush1.bf16.msra.mxu0 %v5052_v20  ;;  %3239 = vmatprep.subr.bf16.mxu1 %v4917_v23  ;;  %v4989_v20 = vcombine.high %v1548_v36, %v1552_v7  ;;  %v5117_v23 = vcombine.high %v1676_v37, %v1680_v18 }
 0x393   : > { %3280 = vmatprep.subr.bf16.mxu0 %v5045_v24  ;;  %v1540_v24 = vld [vmem:[#allocation15 + $0x2d8] sm:$0xff] }
 0x394   : > { %v4980_v28 = vcombine.low %v1540_v24, %v1544_v39 }
 0x395   : > { %3240 = vmatpush1.bf16.msra.mxu1 %v4916_v43  ;;  %v5116_v43 = vcombine.low %v1676_v37, %v1680_v18 }
 0x396   : > { %3281 = vmatpush1.bf16.msra.mxu0 %v5044_v44  ;;  %3241 = vmatprep.subr.bf16.mxu1 %v4909_v45  ;;  %v4981_v44 = vcombine.high %v1540_v24, %v1544_v39  ;;  %v5109_v45 = vcombine.high %v1668_v40, %v1672_v41 }
 0x397   : > { %3282 = vmatprep.subr.bf16.mxu0 %v5037_v46  ;;  %v1532_v46 = vld [vmem:[#allocation15 + $0x298] sm:$0xff] }
 0x398   : > { %v4972_v54 = vcombine.low %v1532_v46, %v1536_v47 }
 0x399   : > { %3242 = vmatpush1.bf16.msra.mxu1 %v4908_v30  ;;  %v5108_v30 = vcombine.low %v1668_v40, %v1672_v41 }
 0x39a   : > { %3283 = vmatpush1.bf16.msra.mxu0 %v5036_v31  ;;  %3243 = vmatprep.subr.bf16.mxu1 %v4901_v32  ;;  %v4973_v31 = vcombine.high %v1532_v46, %v1536_v47  ;;  %v5101_v32 = vcombine.high %v1660_v26, %v1664_v27 }
 0x39b   : > { %3284 = vmatprep.subr.bf16.mxu0 %v5029_v48  ;;  %v1524_v48 = vld [vmem:[#allocation15 + $0x258] sm:$0xff] }
 0x39c   : > { %v4964_v0 = vcombine.low %v1524_v48, %v1528_v49 }
 0x39d   : > { %3244 = vmatpush1.bf16.msra.mxu1 %v4900_v55  ;;  %v5100_v55 = vcombine.low %v1660_v26, %v1664_v27 }
 0x39e   : > { %3285 = vmatpush1.bf16.msra.mxu0 %v5028_v56  ;;  %3245 = vmatprep.subr.bf16.mxu1 %v4893_v57  ;;  %v4965_v56 = vcombine.high %v1524_v48, %v1528_v49  ;;  %v5093_v57 = vcombine.high %v1652_v52, %v1656_v53 }
 0x39f   : > { %3286 = vmatprep.subr.bf16.mxu0 %v5021_v58  ;;  %v1516_v58 = vld [vmem:[#allocation15 + $0x218] sm:$0xff] }
 0x3a1   : > { %3246 = vmatpush1.bf16.msra.mxu1 %v4892_v3  ;;  %v5092_v3 = vcombine.low %v1652_v52, %v1656_v53  ;;  %v6651_v53 = vld [vmem:[#allocation17] sm:$0xff] }
 0x3a2   : > { %3287 = vmatpush1.bf16.msra.mxu0 %v5020_v5  ;;  %3247 = vmatprep.subr.bf16.mxu1 %v5013_v6  ;;  %v4957_v5 = vcombine.high %v1516_v58, %v1520_v59  ;;  %v5085_v6 = vcombine.high %v1644_v60, %v1648_v61 }
 0x3a3   : > { %3288 = vmatprep.subr.bf16.mxu0 %v5141_v9  ;;  %v4956_v9 = vcombine.low %v1516_v58, %v1520_v59  ;;  %v3475_v59 = vrot.slane %v6651_v53, %v6579_v4 }
 0x3a5   : > { %3248 = vmatpush2.bf16.msra.mxu1 %v5012_v62 }
 0x3a6   : > { %3289 = vmatpush2.bf16.msra.mxu0 %v5140_v14  ;;  %3249 = vmatprep.subr.bf16.mxu1 %v5005_v15 }
 0x3a7   : > { %3290 = vmatprep.subr.bf16.mxu0 %v5133_v16 }
 0x3a9   : > { %3250 = vmatpush2.bf16.msra.mxu1 %v5004_v29 }
 0x3aa   : > { %3291 = vmatpush2.bf16.msra.mxu0 %v5132_v33  ;;  %3251 = vmatprep.subr.bf16.mxu1 %v4997_v34 }
 0x3ab   : > { %3292 = vmatprep.subr.bf16.mxu0 %v5125_v35 }
 0x3ad   : > { %3252 = vmatpush2.bf16.msra.mxu1 %v4996_v21 }
 0x3ae   : > { %3293 = vmatpush2.bf16.msra.mxu0 %v5124_v19  ;;  %3253 = vmatprep.subr.bf16.mxu1 %v4989_v20 }
 0x3af   : > { %3294 = vmatprep.subr.bf16.mxu0 %v5117_v23 }
 0x3b1   : > { %3254 = vmatpush2.bf16.msra.mxu1 %v4988_v42 }
 0x3b2   : > { %3295 = vmatpush2.bf16.msra.mxu0 %v5116_v43  ;;  %3255 = vmatprep.subr.bf16.mxu1 %v4981_v44 }
 0x3b3   : > { %3296 = vmatprep.subr.bf16.mxu0 %v5109_v45 }
 0x3b5   : > { %3256 = vmatpush2.bf16.msra.mxu1 %v4980_v28 }
 0x3b6   : > { %3297 = vmatpush2.bf16.msra.mxu0 %v5108_v30  ;;  %3257 = vmatprep.subr.bf16.mxu1 %v4973_v31 }
 0x3b7   : > { %3298 = vmatprep.subr.bf16.mxu0 %v5101_v32 }
 0x3b9   : > { %3258 = vmatpush2.bf16.msra.mxu1 %v4972_v54  ;;  %v6653_v54 = vld [vmem:[#allocation18] sm:$0xff] }
 0x3ba   : > { %3299 = vmatpush2.bf16.msra.mxu0 %v5100_v55  ;;  %3259 = vmatprep.subr.bf16.mxu1 %v4965_v56  ;;  %v3471_v55 = vrot.slane %v6651_v53, %v6576_v2  ;;  %v3520_v58 = vrot.slane %v6653_v54, %v6576_v2 }
 0x3bb   : > { %3300 = vmatprep.subr.bf16.mxu0 %v5093_v57 }
 0x3bd   : > { %3260 = vmatpush2.bf16.msra.mxu1 %v4964_v0 }
 0x3be   : > { %3301 = vmatpush2.bf16.msra.mxu0 %v5092_v3  ;;  %3261 = vmatprep.subr.bf16.mxu1 %v4957_v5  ;;  %v3524_v3 = vrot.slane %v6653_v54, %v6579_v4 }
 0x3bf   : > { %3302 = vmatprep.subr.bf16.mxu0 %v5085_v6 }
 0x3c1   : > { %3262 = vmatpush2.bf16.msra.mxu1 %v4956_v9 }
 0x3c2   : > { %3303 = vmatpush2.bf16.msra.mxu0 %v5084_v10 }
 0x3c4   : > { %3264 = vmatmul.mubr.bf16.vlgmr.msra.gmra.mxu1 %v6625_v8  ;;  %v3019_v11 = vpop.f32.mrf.mxu1 }
 0x3c5   : > { %3305 = vmatmul.mubr.bf16.vlgmr.msra.gmra.mxu0 %v6628_v38  ;;  %v3060_v12 = vpop.f32.mrf.mxu0 }
 0x3c6   : > { %v3061_v13 = vadd.f32 %v3060_v12, %v3019_v11  ;;  %v3021_v62 = vpop.f32.mrf.mxu1 }
 0x3c7   : > { %v3062_v14 = vpop.f32.mrf.mxu0 }
 0x3c8   : > { %v3315_v15 = vrot.slane %v3061_v13, 4  ;;  %v3063_v16 = vadd.f32 %v3062_v14, %v3021_v62  ;;  %v3023_v17 = vpop.f32.mrf.mxu1 }
 0x3c9   : > { %v3064_v22 = vpop.f32.mrf.mxu0 }
 0x3ca   : > { %v3316_v63 = vadd.f32 %v3315_v15, %v3061_v13  ;;  %v3321_v25 = vrot.slane %v3063_v16, 4  ;;  %v3024_v29 = vpop.f32.mrf.mxu1 }
 0x3cb   : > { %v3065_v33 = vpop.f32.mrf.mxu0 }
 0x3cc   : > { %v3317_v34 = vrot.slane %v3316_v63, 2  ;;  %v3322_v35 = vadd.f32 %v3321_v25, %v3063_v16 }
 0x3ce   : > { %v3318_v36 = vadd.f32 %v3317_v34, %v3316_v63  ;;  %v3323_v7 = vrot.slane %v3322_v35, 2 }
 0x3d0   : > { %v3319_v8 = vrot.slane %v3318_v36, 1  ;;  %v3324_v37 = vadd.f32 %v3323_v7, %v3322_v35 }
 0x3d2   : > { %v3320_v18 = vadd.f32 %v3319_v8, %v3318_v36  ;;  %v3325_v38 = vrot.slane %v3324_v37, 1 }
 0x3d4   : > { %v3363_v21 = vmul.f32 0.125, %v3320_v18  ;;  %v3326_v19 = vadd.f32 %v3325_v38, %v3324_v37 }
 0x3d6   : > { %v3371_v20 = vsub.f32 %v3061_v13, %v3363_v21  ;;  %v3364_v23 = vmul.f32 0.125, %v3326_v19 }
 0x3d8   : > { %v3379_v24 = vmul.f32 %v3371_v20, %v3371_v20  ;;  %v3372_v39 = vsub.f32 %v3063_v16, %v3364_v23 }
 0x3da   : > { %v3387_v40 = vrot.slane %v3379_v24, 4  ;;  %v3380_v41 = vmul.f32 %v3372_v39, %v3372_v39 }
 0x3dc   : > { %v3388_v42 = vadd.f32 %v3387_v40, %v3379_v24  ;;  %v3393_v43 = vrot.slane %v3380_v41, 4 }
 0x3de   : > { %v3389_v44 = vrot.slane %v3388_v42, 2  ;;  %v3394_v45 = vadd.f32 %v3393_v43, %v3380_v41 }
 0x3e0   : > { %v3390_v46 = vadd.f32 %v3389_v44, %v3388_v42  ;;  %v3395_v47 = vrot.slane %v3394_v45, 2 }
 0x3e2   : > { %v3391_v26 = vrot.slane %v3390_v46, 1  ;;  %v3396_v27 = vadd.f32 %v3395_v47, %v3394_v45 }
 0x3e4   : > { %v3392_v28 = vadd.f32 %v3391_v26, %v3390_v46  ;;  %v3397_v30 = vrot.slane %v3396_v27, 1 }
 0x3e6   : > { %v3435_v31 = vmul.f32 0.125, %v3392_v28  ;;  %v3398_v32 = vadd.f32 %v3397_v30, %v3396_v27 }
 0x3e8   : > { %v3443_v48 = vadd.f32 1e-05, %v3435_v31  ;;  %v3436_v49 = vmul.f32 0.125, %v3398_v32 }
 0x3ea   : > { %5587 = vrsqrt.f32 %v3443_v48  ;;  %v3444_v52 = vadd.f32 1e-05, %v3436_v49 }
 0x3ec   : > { %5589 = vrsqrt.f32 %v3444_v52  ;;  %v3479_v52 = vrot.slane %v6651_v53, %v6608_v50 }
 0x3f7   : > { %v5588_v56 = vpop.eup %5587 }
 0x3f8   : > { %v3459_v57 = vmul.f32 %v5588_v56, %v3371_v20 }
 0x3f9   : > { %v5590_v60 = vpop.eup %5589 }
 0x3fa   : > { %v3508_v61 = vmul.f32 %v3471_v55, %v3459_v57  ;;  %v3460_v0 = vmul.f32 %v5590_v60, %v3372_v39  ;;  %v3528_v57 = vrot.slane %v6653_v54, %v6608_v50 }
 0x3fc   : > { %v3557_v5 = vadd.f32 %v3520_v58, %v3508_v61  ;;  %v3509_v6 = vmul.f32 %v3475_v59, %v3460_v0  ;;  %v3483_v58 = vrot.slane %v6651_v53, %v6611_v51  ;;  %v3532_v0 = vrot.slane %v6653_v54, %v6611_v51 }
 0x3fe   : > { %v3565_v9 = vmax.f32 %v3557_v5, 0.0  ;;  %v3558_v10 = vadd.f32 %v3524_v3, %v3509_v6 }
 0x400   : > { %3573 = vst [vmem:[#allocation2 + $0x30] sm:$0xff] %v3565_v9  ;;  %v3566_v11 = vmax.f32 %v3558_v10, 0.0 }
 0x402   : > { %3574 = vst [vmem:[#allocation2] sm:$0xff] %v3566_v11 }
 0x404   : > { %v3101_v12 = vpop.f32.mrf.mxu1 }
 0x405   : > { %v3142_v13 = vpop.f32.mrf.mxu0 }
 0x406   : > { %v3143_v62 = vadd.f32 %v3142_v13, %v3101_v12  ;;  %v3103_v2 = vpop.f32.mrf.mxu1 }
 0x407   : > { %v3144_v14 = vpop.f32.mrf.mxu0 }
 0x408   : > { %v3327_v15 = vrot.slane %v3143_v62, 4  ;;  %v3145_v16 = vadd.f32 %v3144_v14, %v3103_v2  ;;  %v3105_v17 = vpop.f32.mrf.mxu1 }
 0x409   : > { %v3146_v22 = vpop.f32.mrf.mxu0 }
 0x40a   : > { %v3328_v63 = vadd.f32 %v3327_v15, %v3143_v62  ;;  %v3333_v25 = vrot.slane %v3145_v16, 4  ;;  %v3106_v29 = vpop.f32.mrf.mxu1 }
 0x40b   : > { %v3147_v4 = vpop.f32.mrf.mxu0 }
 0x40c   : > { %v3329_v33 = vrot.slane %v3328_v63, 2  ;;  %v3334_v34 = vadd.f32 %v3333_v25, %v3145_v16 }
 0x40e   : > { %v3330_v35 = vadd.f32 %v3329_v33, %v3328_v63  ;;  %v3335_v36 = vrot.slane %v3334_v34, 2 }
 0x410   : > { %v3331_v7 = vrot.slane %v3330_v35, 1  ;;  %v3336_v8 = vadd.f32 %v3335_v36, %v3334_v34 }
 0x412   : > { %v3332_v37 = vadd.f32 %v3331_v7, %v3330_v35  ;;  %v3337_v18 = vrot.slane %v3336_v8, 1 }
 0x414   : > { %v3365_v38 = vmul.f32 0.125, %v3332_v37  ;;  %v3338_v21 = vadd.f32 %v3337_v18, %v3336_v8 }
 0x416   : > { %v3373_v19 = vsub.f32 %v3143_v62, %v3365_v38  ;;  %v3366_v20 = vmul.f32 0.125, %v3338_v21 }
 0x418   : > { %v3381_v23 = vmul.f32 %v3373_v19, %v3373_v19  ;;  %v3374_v24 = vsub.f32 %v3145_v16, %v3366_v20 }
 0x41a   : > { %v3399_v39 = vrot.slane %v3381_v23, 4  ;;  %v3382_v40 = vmul.f32 %v3374_v24, %v3374_v24 }
 0x41c   : > { %v3400_v41 = vadd.f32 %v3399_v39, %v3381_v23  ;;  %v3405_v42 = vrot.slane %v3382_v40, 4 }
 0x41e   : > { %v3401_v43 = vrot.slane %v3400_v41, 2  ;;  %v3406_v44 = vadd.f32 %v3405_v42, %v3382_v40 }
 0x420   : > { %v3402_v45 = vadd.f32 %v3401_v43, %v3400_v41  ;;  %v3407_v46 = vrot.slane %v3406_v44, 2 }
 0x422   : > { %v3403_v47 = vrot.slane %v3402_v45, 1  ;;  %v3408_v26 = vadd.f32 %v3407_v46, %v3406_v44 }
 0x424   : > { %v3404_v27 = vadd.f32 %v3403_v47, %v3402_v45  ;;  %v3409_v28 = vrot.slane %v3408_v26, 1 }
 0x426   : > { %v3437_v30 = vmul.f32 0.125, %v3404_v27  ;;  %v3410_v31 = vadd.f32 %v3409_v28, %v3408_v26 }
 0x428   : > { %v3445_v32 = vadd.f32 1e-05, %v3437_v30  ;;  %v3438_v48 = vmul.f32 0.125, %v3410_v31 }
 0x42a   : > { %5591 = vrsqrt.f32 %v3445_v32  ;;  %v3446_v49 = vadd.f32 1e-05, %v3438_v48  ;;  %v3486_v32 = vsub.s32 4, %v6573_v1  ;;  %v3490_v48 = vsub.s32 5, %v6573_v1 }
 0x42c   : > { %5593 = vrsqrt.f32 %v3446_v49  ;;  %v3487_v49 = vrot.slane %v6651_v53, %v3486_v32 }
 0x437   : > { %v5592_v55 = vpop.eup %5591 }
 0x438   : > { %v3461_v56 = vmul.f32 %v5592_v55, %v3373_v19 }
 0x439   : > { %v5594_v59 = vpop.eup %5593 }
 0x43a   : > { %v3510_v60 = vmul.f32 %v3479_v52, %v3461_v56  ;;  %v3462_v61 = vmul.f32 %v5594_v59, %v3374_v24  ;;  %v3536_v56 = vrot.slane %v6653_v54, %v3486_v32  ;;  %v3498_v32 = vsub.s32 7, %v6573_v1 }
 0x43c   : > { %v3559_v3 = vadd.f32 %v3528_v57, %v3510_v60  ;;  %v3511_v5 = vmul.f32 %v3483_v58, %v3462_v61  ;;  %v3491_v57 = vrot.slane %v6651_v53, %v3490_v48  ;;  %v3540_v61 = vrot.slane %v6653_v54, %v3490_v48 }
 0x43e   : > { %v3567_v6 = vmax.f32 %v3559_v3, 0.0  ;;  %v3560_v9 = vadd.f32 %v3532_v0, %v3511_v5 }
 0x440   : > { %3575 = vst [vmem:[#allocation2 + $0x18] sm:$0xff] %v3567_v6  ;;  %v3568_v10 = vmax.f32 %v3560_v9, 0.0 }
 0x442   : > { %3576 = vst [vmem:[#allocation2 + $0x10] sm:$0xff] %v3568_v10 }
 0x444   : > { %v3183_v11 = vpop.f32.mrf.mxu1 }
 0x445   : > { %v3224_v12 = vpop.f32.mrf.mxu0 }
 0x446   : > { %v3225_v13 = vadd.f32 %v3224_v12, %v3183_v11  ;;  %v3185_v50 = vpop.f32.mrf.mxu1 }
 0x447   : > { %v3226_v62 = vpop.f32.mrf.mxu0 }
 0x448   : > { %v3339_v2 = vrot.slane %v3225_v13, 4  ;;  %v3227_v14 = vadd.f32 %v3226_v62, %v3185_v50  ;;  %v3187_v15 = vpop.f32.mrf.mxu1 }
 0x449   : > { %v3228_v16 = vpop.f32.mrf.mxu0 }
 0x44a   : > { %v3340_v17 = vadd.f32 %v3339_v2, %v3225_v13  ;;  %v3345_v22 = vrot.slane %v3227_v14, 4  ;;  %v3188_v63 = vpop.f32.mrf.mxu1 }
 0x44b   : > { %v3229_v51 = vpop.f32.mrf.mxu0 }
 0x44c   : > { %v3341_v25 = vrot.slane %v3340_v17, 2  ;;  %v3346_v29 = vadd.f32 %v3345_v22, %v3227_v14 }
 0x44e   : > { %v3342_v4 = vadd.f32 %v3341_v25, %v3340_v17  ;;  %v3347_v33 = vrot.slane %v3346_v29, 2 }
 0x450   : > { %v3343_v34 = vrot.slane %v3342_v4, 1  ;;  %v3348_v35 = vadd.f32 %v3347_v33, %v3346_v29 }
 0x452   : > { %v3344_v36 = vadd.f32 %v3343_v34, %v3342_v4  ;;  %v3349_v7 = vrot.slane %v3348_v35, 1 }
 0x454   : > { %v3367_v8 = vmul.f32 0.125, %v3344_v36  ;;  %v3350_v37 = vadd.f32 %v3349_v7, %v3348_v35 }
 0x456   : > { %v3375_v18 = vsub.f32 %v3225_v13, %v3367_v8  ;;  %v3368_v38 = vmul.f32 0.125, %v3350_v37 }
 0x458   : > { %v3383_v21 = vmul.f32 %v3375_v18, %v3375_v18  ;;  %v3376_v19 = vsub.f32 %v3227_v14, %v3368_v38 }
 0x45a   : > { %v3411_v20 = vrot.slane %v3383_v21, 4  ;;  %v3384_v23 = vmul.f32 %v3376_v19, %v3376_v19 }
 0x45c   : > { %v3412_v24 = vadd.f32 %v3411_v20, %v3383_v21  ;;  %v3417_v39 = vrot.slane %v3384_v23, 4 }
 0x45e   : > { %v3413_v40 = vrot.slane %v3412_v24, 2  ;;  %v3418_v41 = vadd.f32 %v3417_v39, %v3384_v23 }
 0x460   : > { %v3414_v42 = vadd.f32 %v3413_v40, %v3412_v24  ;;  %v3419_v43 = vrot.slane %v3418_v41, 2 }
 0x462   : > { %v3415_v44 = vrot.slane %v3414_v42, 1  ;;  %v3420_v45 = vadd.f32 %v3419_v43, %v3418_v41 }
 0x464   : > { %v3416_v46 = vadd.f32 %v3415_v44, %v3414_v42  ;;  %v3421_v47 = vrot.slane %v3420_v45, 1 }
 0x466   : > { %v3439_v26 = vmul.f32 0.125, %v3416_v46  ;;  %v3422_v27 = vadd.f32 %v3421_v47, %v3420_v45 }
 0x468   : > { %v3447_v28 = vadd.f32 1e-05, %v3439_v26  ;;  %v3440_v30 = vmul.f32 0.125, %v3422_v27 }
 0x46a   : > { %5595 = vrsqrt.f32 %v3447_v28  ;;  %v3448_v31 = vadd.f32 1e-05, %v3440_v30 }
 0x46c   : > { %5597 = vrsqrt.f32 %v3448_v31  ;;  %v3494_v31 = vsub.s32 6, %v6573_v1 }
 0x46e   : > { %v3495_v48 = vrot.slane %v6651_v53, %v3494_v31 }
 0x477   : > { %v5596_v52 = vpop.eup %5595 }
 0x478   : > { %v3463_v55 = vmul.f32 %v5596_v52, %v3375_v18 }
 0x479   : > { %v5598_v58 = vpop.eup %5597 }
 0x47a   : > { %v3512_v59 = vmul.f32 %v3487_v49, %v3463_v55  ;;  %v3464_v60 = vmul.f32 %v5598_v58, %v3376_v19  ;;  %v3544_v55 = vrot.slane %v6653_v54, %v3494_v31 }
 0x47c   : > { %v3561_v0 = vadd.f32 %v3536_v56, %v3512_v59  ;;  %v3513_v3 = vmul.f32 %v3491_v57, %v3464_v60  ;;  %v3499_v56 = vrot.slane %v6651_v53, %v3498_v32  ;;  %v3548_v60 = vrot.slane %v6653_v54, %v3498_v32 }
 0x47e   : > { %v3569_v5 = vmax.f32 %v3561_v0, 0.0  ;;  %v3562_v6 = vadd.f32 %v3540_v61, %v3513_v3 }
 0x480   : > { %3577 = vst [vmem:[#allocation2 + $0x8] sm:$0xff] %v3569_v5  ;;  %v3570_v9 = vmax.f32 %v3562_v6, 0.0 }
 0x482   : > { %3578 = vst [vmem:[#allocation2 + $0x20] sm:$0xff] %v3570_v9 }
 0x484   : > { %v3265_v10 = vpop.f32.mrf.mxu1 }
 0x485   : > { %v3306_v11 = vpop.f32.mrf.mxu0 }
 0x486   : > { %v3307_v12 = vadd.f32 %v3306_v11, %v3265_v10  ;;  %v3267_v13 = vpop.f32.mrf.mxu1 }
 0x487   : > { %v3308_v50 = vpop.f32.mrf.mxu0 }
 0x488   : > { %v3351_v62 = vrot.slane %v3307_v12, 4  ;;  %v3309_v2 = vadd.f32 %v3308_v50, %v3267_v13  ;;  %v3269_v14 = vpop.f32.mrf.mxu1 }
 0x489   : > { %v3310_v15 = vpop.f32.mrf.mxu0 }
 0x48a   : > { %v3352_v16 = vadd.f32 %v3351_v62, %v3307_v12  ;;  %v3357_v17 = vrot.slane %v3309_v2, 4  ;;  %v3270_v22 = vpop.f32.mrf.mxu1 }
 0x48b   : > { %v3311_v63 = vpop.f32.mrf.mxu0 }
 0x48c   : > { %v3353_v51 = vrot.slane %v3352_v16, 2  ;;  %v3358_v25 = vadd.f32 %v3357_v17, %v3309_v2 }
 0x48e   : > { %v3354_v29 = vadd.f32 %v3353_v51, %v3352_v16  ;;  %v3359_v4 = vrot.slane %v3358_v25, 2 }
 0x490   : > { %v3355_v33 = vrot.slane %v3354_v29, 1  ;;  %v3360_v34 = vadd.f32 %v3359_v4, %v3358_v25 }
 0x492   : > { %v3356_v35 = vadd.f32 %v3355_v33, %v3354_v29  ;;  %v3361_v36 = vrot.slane %v3360_v34, 1 }
 0x494   : > { %v3369_v7 = vmul.f32 0.125, %v3356_v35  ;;  %v3362_v8 = vadd.f32 %v3361_v36, %v3360_v34 }
 0x496   : > { %v3377_v37 = vsub.f32 %v3307_v12, %v3369_v7  ;;  %v3370_v18 = vmul.f32 0.125, %v3362_v8 }
 0x498   : > { %v3385_v38 = vmul.f32 %v3377_v37, %v3377_v37  ;;  %v3378_v21 = vsub.f32 %v3309_v2, %v3370_v18 }
 0x49a   : > { %v3423_v19 = vrot.slane %v3385_v38, 4  ;;  %v3386_v20 = vmul.f32 %v3378_v21, %v3378_v21 }
 0x49c   : > { %v3424_v23 = vadd.f32 %v3423_v19, %v3385_v38  ;;  %v3429_v24 = vrot.slane %v3386_v20, 4 }
 0x49e   : > { %v3425_v39 = vrot.slane %v3424_v23, 2  ;;  %v3430_v40 = vadd.f32 %v3429_v24, %v3386_v20 }
 0x4a0   : > { %v3426_v41 = vadd.f32 %v3425_v39, %v3424_v23  ;;  %v3431_v42 = vrot.slane %v3430_v40, 2 }
 0x4a2   : > { %v3427_v43 = vrot.slane %v3426_v41, 1  ;;  %v3432_v44 = vadd.f32 %v3431_v42, %v3430_v40 }
 0x4a4   : > { %v3428_v45 = vadd.f32 %v3427_v43, %v3426_v41  ;;  %v3433_v46 = vrot.slane %v3432_v44, 1 }
 0x4a6   : > { %v3441_v47 = vmul.f32 0.125, %v3428_v45  ;;  %v3434_v26 = vadd.f32 %v3433_v46, %v3432_v44 }
 0x4a8   : > { %v3449_v27 = vadd.f32 1e-05, %v3441_v47  ;;  %v3442_v28 = vmul.f32 0.125, %v3434_v26 }
 0x4aa   : > { %5599 = vrsqrt.f32 %v3449_v27  ;;  %v3450_v30 = vadd.f32 1e-05, %v3442_v28 }
 0x4ac   : > { %5601 = vrsqrt.f32 %v3450_v30 }
 0x4b7   : > { %v5600_v49 = vpop.eup %5599 }
 0x4b8   : > { %v3465_v52 = vmul.f32 %v5600_v49, %v3377_v37 }
 0x4b9   : > { %v5602_v57 = vpop.eup %5601 }
 0x4ba   : > { %v3514_v58 = vmul.f32 %v3495_v48, %v3465_v52  ;;  %v3466_v59 = vmul.f32 %v5602_v57, %v3378_v21 }
 0x4bc   : > { %v3563_v61 = vadd.f32 %v3544_v55, %v3514_v58  ;;  %v3515_v0 = vmul.f32 %v3499_v56, %v3466_v59 }
 0x4be   : > { %v3571_v3 = vmax.f32 %v3563_v61, 0.0  ;;  %v3564_v5 = vadd.f32 %v3548_v60, %v3515_v0 }
 0x4c0   : > { %3579 = vst [vmem:[#allocation2 + $0x28] sm:$0xff] %v3571_v3  ;;  %v3572_v6 = vmax.f32 %v3564_v5, 0.0 }
 0x4c2   : > { %3580 = vst [vmem:[#allocation2 + $0x38] sm:$0xff] %v3572_v6 }
 0x4c3 PF: > { %v5603_v1 = vld [vmem:[%s6544_s17 + $0x74] ss:$8 sps:$4 sm:$0xff]   ;;  %v5607_v54 = vld [vmem:[%s6544_s17 + $0x70] ss:$8 sps:$4 sm:$0xff]   ;;  %v5609_v10 = vld [vmem:[%s6544_s17 + $0x64] ss:$8 sps:$4 sm:$0xff]  }
 0x4c4   : > { %v5605_v53 = vld [vmem:[%s6544_s17 + $0x174] ss:$8 sps:$4 sm:$0xff]   ;;  %4377 = vmatprep.subr.bf16.mxu0 %v5603_v1  ;;  %v5608_v9 = vld [vmem:[%s6544_s17 + $0x170] ss:$8 sps:$4 sm:$0xff]   ;;  %v5611_v11 = vld [vmem:[%s6544_s17 + $0x164] ss:$8 sps:$4 sm:$0xff]  }
 0x4c5   : > { %4418 = vmatprep.subr.bf16.mxu1 %v5605_v53  ;;  %4378 = vmatpush1.bf16.msra.mxu0 %v5607_v54  ;;  %v5613_v12 = vld [vmem:[%s6544_s17 + $0x60] ss:$8 sps:$4 sm:$0xff]   ;;  %v5615_v50 = vld [vmem:[%s6544_s17 + $0x54] ss:$8 sps:$4 sm:$0xff]   ;;  %v5619_v2 = vld [vmem:[%s6544_s17 + $0x50] ss:$8 sps:$4 sm:$0xff]  }
 0x4c6   : > { %4419 = vmatpush1.bf16.msra.mxu1 %v5608_v9  ;;  %4379 = vmatprep.subr.bf16.mxu0 %v5609_v10  ;;  %v5614_v13 = vld [vmem:[%s6544_s17 + $0x160] ss:$8 sps:$4 sm:$0xff]   ;;  %v5617_v62 = vld [vmem:[%s6544_s17 + $0x154] ss:$8 sps:$4 sm:$0xff]   ;;  %v5620_v14 = vld [vmem:[%s6544_s17 + $0x150] ss:$8 sps:$4 sm:$0xff]  }
 0x4c7   : > { %4420 = vmatprep.subr.bf16.mxu1 %v5611_v11  ;;  %v5621_v15 = vld [vmem:[%s6544_s17 + $0x44] ss:$8 sps:$4 sm:$0xff]   ;;  %v5625_v17 = vld [vmem:[%s6544_s17 + $0x40] ss:$8 sps:$4 sm:$0xff]   ;;  %v5627_v63 = vld [vmem:[%s6544_s17 + $0x34] ss:$8 sps:$4 sm:$0xff]  }
 0x4c8   : > { %v5623_v16 = vld [vmem:[%s6544_s17 + $0x144] ss:$8 sps:$4 sm:$0xff]   ;;  %v5626_v22 = vld [vmem:[%s6544_s17 + $0x140] ss:$8 sps:$4 sm:$0xff]   ;;  %v5629_v51 = vld [vmem:[%s6544_s17 + $0x134] ss:$8 sps:$4 sm:$0xff]  }
 0x4c9   : > { %4380 = vmatpush1.bf16.msra.mxu0 %v5613_v12  ;;  %v5631_v25 = vld [vmem:[%s6544_s17 + $0x30] ss:$8 sps:$4 sm:$0xff]   ;;  %v5633_v4 = vld [vmem:[%s6544_s17 + $0x24] ss:$8 sps:$4 sm:$0xff]   ;;  %v5637_v34 = vld [vmem:[%s6544_s17 + $0x20] ss:$8 sps:$4 sm:$0xff]  }
 0x4ca   : > { %4421 = vmatpush1.bf16.msra.mxu1 %v5614_v13  ;;  %4381 = vmatprep.subr.bf16.mxu0 %v5615_v50  ;;  %v5632_v29 = vld [vmem:[%s6544_s17 + $0x130] ss:$8 sps:$4 sm:$0xff]   ;;  %v5635_v33 = vld [vmem:[%s6544_s17 + $0x124] ss:$8 sps:$4 sm:$0xff]   ;;  %v5638_v35 = vld [vmem:[%s6544_s17 + $0x120] ss:$8 sps:$4 sm:$0xff]  }
 0x4cb   : > { %4422 = vmatprep.subr.bf16.mxu1 %v5617_v62  ;;  %v5639_v36 = vld [vmem:[%s6544_s17 + $0x14] ss:$8 sps:$4 sm:$0xff]   ;;  %v5643_v8 = vld [vmem:[%s6544_s17 + $0x10] ss:$8 sps:$4 sm:$0xff]   ;;  %v5645_v18 = vld [vmem:[%s6544_s17 + $0x4] ss:$8 sps:$4 sm:$0xff]  }
 0x4cc   : > { %v5641_v7 = vld [vmem:[%s6544_s17 + $0x114] ss:$8 sps:$4 sm:$0xff]   ;;  %v5644_v37 = vld [vmem:[%s6544_s17 + $0x110] ss:$8 sps:$4 sm:$0xff]   ;;  %v5647_v38 = vld [vmem:[%s6544_s17 + $0x104] ss:$8 sps:$4 sm:$0xff]  }
 0x4cd   : > { %4382 = vmatpush1.bf16.msra.mxu0 %v5619_v2  ;;  %v5649_v21 = vld [vmem:[%s6544_s17] ss:$8 sps:$4 sm:$0xff]   ;;  %v5651_v20 = vld [vmem:[%s6544_s17 + $0xf4] ss:$8 sps:$4 sm:$0xff]   ;;  %v5655_v24 = vld [vmem:[%s6544_s17 + $0xf0] ss:$8 sps:$4 sm:$0xff]  }
 0x4ce   : > { %4423 = vmatpush1.bf16.msra.mxu1 %v5620_v14  ;;  %4383 = vmatprep.subr.bf16.mxu0 %v5621_v15  ;;  %v5650_v19 = vld [vmem:[%s6544_s17 + $0x100] ss:$8 sps:$4 sm:$0xff]   ;;  %v5653_v23 = vld [vmem:[%s6544_s17 + $0x1f4] ss:$8 sps:$4 sm:$0xff]   ;;  %v5656_v39 = vld [vmem:[%s6544_s17 + $0x1f0] ss:$8 sps:$4 sm:$0xff]  }
 0x4cf   : > { %4424 = vmatprep.subr.bf16.mxu1 %v5623_v16  ;;  %v5657_v40 = vld [vmem:[%s6544_s17 + $0xe4] ss:$8 sps:$4 sm:$0xff]   ;;  %v5661_v42 = vld [vmem:[%s6544_s17 + $0xe0] ss:$8 sps:$4 sm:$0xff]   ;;  %v5663_v44 = vld [vmem:[%s6544_s17 + $0xd4] ss:$8 sps:$4 sm:$0xff]  }
 0x4d0   : > { %v5659_v41 = vld [vmem:[%s6544_s17 + $0x1e4] ss:$8 sps:$4 sm:$0xff]   ;;  %v5662_v43 = vld [vmem:[%s6544_s17 + $0x1e0] ss:$8 sps:$4 sm:$0xff]   ;;  %v5665_v45 = vld [vmem:[%s6544_s17 + $0x1d4] ss:$8 sps:$4 sm:$0xff]  }
 0x4d1   : > { %4384 = vmatpush1.bf16.msra.mxu0 %v5625_v17  ;;  %v5667_v46 = vld [vmem:[%s6544_s17 + $0xd0] ss:$8 sps:$4 sm:$0xff]   ;;  %v5669_v26 = vld [vmem:[%s6544_s17 + $0xc4] ss:$8 sps:$4 sm:$0xff]   ;;  %v5673_v30 = vld [vmem:[%s6544_s17 + $0xc0] ss:$8 sps:$4 sm:$0xff]  }
 0x4d2   : > { %4425 = vmatpush1.bf16.msra.mxu1 %v5626_v22  ;;  %4385 = vmatprep.subr.bf16.mxu0 %v5627_v63  ;;  %v5668_v47 = vld [vmem:[%s6544_s17 + $0x1d0] ss:$8 sps:$4 sm:$0xff]   ;;  %v5671_v27 = vld [vmem:[%s6544_s17 + $0x1c4] ss:$8 sps:$4 sm:$0xff]   ;;  %v5674_v31 = vld [vmem:[%s6544_s17 + $0x1c0] ss:$8 sps:$4 sm:$0xff]  }
 0x4d3   : > { %4426 = vmatprep.subr.bf16.mxu1 %v5629_v51  ;;  %v3582_v28 = vld [vmem:[#allocation2] sm:$0xff]  ;;  %v3584_v48 = vld [vmem:[#allocation2 + $0x10] sm:$0xff]  ;;  %v3583_v11 = vld [vmem:[#allocation2 + $0x18] sm:$0xff]  ;;  %s6935_s27 = sld [smem:[#allocation33_spill]]  ;;  %s5279_s16 = sshll.u32 %s6215_s24, 8 }
 0x4d4   : > { %v3590_v32 = vpack.c.bf16 %v3582_v28, %v3582_v28  ;;  %v5675_v49 = vld [vmem:[%s6544_s17 + $0xb4] ss:$8 sps:$4 sm:$0xff]   ;;  %v3592_v52 = vpack.c.bf16 %v3584_v48, %v3584_v48  ;;  %v5679_v56 = vld [vmem:[%s6544_s17 + $0xb0] ss:$8 sps:$4 sm:$0xff]   ;;  %v5681_v58 = vld [vmem:[%s6544_s17 + $0xa4] ss:$8 sps:$4 sm:$0xff]   ;;  %v3591_v62 = vpack.c.bf16 %v3583_v11, %v3583_v11 }
 0x4d5   : > { %4386 = vmatpush1.bf16.msra.mxu0 %v5631_v25  ;;  %v5677_v55 = vld [vmem:[%s6544_s17 + $0x1b4] ss:$8 sps:$4 sm:$0xff]   ;;  %v5680_v57 = vld [vmem:[%s6544_s17 + $0x1b0] ss:$8 sps:$4 sm:$0xff]   ;;  %v5683_v59 = vld [vmem:[%s6544_s17 + $0x1a4] ss:$8 sps:$4 sm:$0xff]  }
 0x4d6   : > { %4427 = vmatpush1.bf16.msra.mxu1 %v5632_v29  ;;  %4387 = vmatprep.subr.bf16.mxu0 %v5633_v4  ;;  %v5685_v60 = vld [vmem:[%s6544_s17 + $0xa0] ss:$8 sps:$4 sm:$0xff]   ;;  %v5687_v0 = vld [vmem:[%s6544_s17 + $0x94] ss:$8 sps:$4 sm:$0xff]   ;;  %v5691_v5 = vld [vmem:[%s6544_s17 + $0x90] ss:$8 sps:$4 sm:$0xff]  }
 0x4d7   : > { %4428 = vmatprep.subr.bf16.mxu1 %v5635_v33  ;;  %4409 = vmatprep.mubr.bf16.mxu0 %v3590_v32  ;;  %v5686_v61 = vld [vmem:[%s6544_s17 + $0x1a0] ss:$8 sps:$4 sm:$0xff]   ;;  %v5689_v3 = vld [vmem:[%s6544_s17 + $0x194] ss:$8 sps:$4 sm:$0xff]   ;;  %v5692_v6 = vld [vmem:[%s6544_s17 + $0x190] ss:$8 sps:$4 sm:$0xff]  }
 0x4d8   : > { %4450 = vmatprep.mubr.bf16.mxu1 %v3592_v52  ;;  %v5693_v1 = vld [vmem:[%s6544_s17 + $0x84] ss:$8 sps:$4 sm:$0xff]   ;;  %v5697_v54 = vld [vmem:[%s6544_s17 + $0x80] ss:$8 sps:$4 sm:$0xff]   ;;  %v3581_v10 = vld [vmem:[#allocation2 + $0x30] sm:$0xff]  ;;  %s4572_s30 = sshll.u32 %s6554_s12, 4  ;;  %s4573_s30 = int_to_ptr.vmem [resolvable:$true] %s4572_s30 }
 0x4d9   : > { %4388 = vmatpush1.bf16.msra.mxu0 %v5637_v34  ;;  %v5695_v53 = vld [vmem:[%s6544_s17 + $0x184] ss:$8 sps:$4 sm:$0xff]   ;;  %v5698_v9 = vld [vmem:[%s6544_s17 + $0x180] ss:$8 sps:$4 sm:$0xff]   ;;  %v5701_v12 = vld [vmem:[%s6544_s17 + $0x274] ss:$8 sps:$4 sm:$0xff]   ;;  %v3589_v50 = vpack.c.bf16 %v3581_v10, %v3581_v10 }
 0x4da   : > { %4429 = vmatpush1.bf16.msra.mxu1 %v5638_v35  ;;  %4389 = vmatprep.subr.bf16.mxu0 %v5639_v36  ;;  %v5704_v13 = vld [vmem:[%s6544_s17 + $0x374] ss:$8 sps:$4 sm:$0xff]   ;;  %v5699_v2 = vld [vmem:[%s6544_s17 + $0x270] ss:$8 sps:$4 sm:$0xff]   ;;  %v5707_v15 = vld [vmem:[%s6544_s17 + $0x264] ss:$8 sps:$4 sm:$0xff]  }
 0x4db   : > { %4430 = vmatprep.subr.bf16.mxu1 %v5641_v7  ;;  %v5702_v14 = vld [vmem:[%s6544_s17 + $0x370] ss:$8 sps:$4 sm:$0xff]   ;;  %v5710_v16 = vld [vmem:[%s6544_s17 + $0x364] ss:$8 sps:$4 sm:$0xff]   ;;  %v5705_v17 = vld [vmem:[%s6544_s17 + $0x260] ss:$8 sps:$4 sm:$0xff]  }
 0x4dc   : > { %v5708_v22 = vld [vmem:[%s6544_s17 + $0x360] ss:$8 sps:$4 sm:$0xff]   ;;  %v5713_v63 = vld [vmem:[%s6544_s17 + $0x254] ss:$8 sps:$4 sm:$0xff]   ;;  %v5711_v25 = vld [vmem:[%s6544_s17 + $0x250] ss:$8 sps:$4 sm:$0xff]  }
 0x4dd   : > { %4390 = vmatpush1.bf16.msra.mxu0 %v5643_v8  ;;  %v5716_v51 = vld [vmem:[%s6544_s17 + $0x354] ss:$8 sps:$4 sm:$0xff]   ;;  %v5714_v29 = vld [vmem:[%s6544_s17 + $0x350] ss:$8 sps:$4 sm:$0xff]   ;;  %v5719_v4 = vld [vmem:[%s6544_s17 + $0x244] ss:$8 sps:$4 sm:$0xff]  }
 0x4de   : > { %4431 = vmatpush1.bf16.msra.mxu1 %v5644_v37  ;;  %4391 = vmatprep.subr.bf16.mxu0 %v5645_v18  ;;  %v5722_v33 = vld [vmem:[%s6544_s17 + $0x344] ss:$8 sps:$4 sm:$0xff]   ;;  %v5717_v34 = vld [vmem:[%s6544_s17 + $0x240] ss:$8 sps:$4 sm:$0xff]   ;;  %v5725_v36 = vld [vmem:[%s6544_s17 + $0x234] ss:$8 sps:$4 sm:$0xff]  }
 0x4df   : > { %4432 = vmatprep.subr.bf16.mxu1 %v5647_v38  ;;  %v5720_v35 = vld [vmem:[%s6544_s17 + $0x340] ss:$8 sps:$4 sm:$0xff]   ;;  %v5728_v7 = vld [vmem:[%s6544_s17 + $0x334] ss:$8 sps:$4 sm:$0xff]   ;;  %v5723_v8 = vld [vmem:[%s6544_s17 + $0x230] ss:$8 sps:$4 sm:$0xff]  }
 0x4e0   : > { %v5726_v37 = vld [vmem:[%s6544_s17 + $0x330] ss:$8 sps:$4 sm:$0xff]   ;;  %v5731_v18 = vld [vmem:[%s6544_s17 + $0x224] ss:$8 sps:$4 sm:$0xff]   ;;  %v5753_v48 = vld [vmem:[%s6544_s17 + $0x2e0] ss:$8 sps:$4 sm:$0xff]  }
 0x4e1   : > { %4392 = vmatpush1.bf16.msra.mxu0 %v5649_v21  ;;  %v5734_v38 = vld [vmem:[%s6544_s17 + $0x324] ss:$8 sps:$4 sm:$0xff]   ;;  %v5729_v21 = vld [vmem:[%s6544_s17 + $0x220] ss:$8 sps:$4 sm:$0xff]   ;;  %v5747_v28 = vld [vmem:[%s6544_s17 + $0x2f0] ss:$8 sps:$4 sm:$0xff]  }
 0x4e2   : > { %4433 = vmatpush1.bf16.msra.mxu1 %v5650_v19  ;;  %4393 = vmatprep.subr.bf16.mxu0 %v5651_v20  ;;  %v5732_v19 = vld [vmem:[%s6544_s17 + $0x320] ss:$8 sps:$4 sm:$0xff]   ;;  %v5737_v20 = vld [vmem:[%s6544_s17 + $0x214] ss:$8 sps:$4 sm:$0xff]   ;;  %v5758_v32 = vld [vmem:[%s6544_s17 + $0x3e4] ss:$8 sps:$4 sm:$0xff]  }
 0x4e3   : > { %4434 = vmatprep.subr.bf16.mxu1 %v5653_v23  ;;  %v5740_v23 = vld [vmem:[%s6544_s17 + $0x314] ss:$8 sps:$4 sm:$0xff]   ;;  %s6936_s18 = sld [smem:[#allocation41_spill]]  ;;  %s4556_s0 = scalar_lea.sflag [#allocation5], %s6541_s19 }
 0x4e4   : > { %v5761_v52 = vld [vmem:[%s6544_s17 + $0x2d4] ss:$8 sps:$4 sm:$0xff]   ;;  %s6119_s15 = scalar_lea.vmem %s4573_s30, 256  ;;  %p6937_p12 = scmp.ne.s32.totalorder %s6935_s27, 0 }
 0x4e5   : > { %4394 = vmatpush2.bf16.msra.mxu0 %v5655_v24  ;;  %v3586_v24 = vld [vmem:[#allocation2 + $0x20] sm:$0xff]  ;;  %v5785_v10 = vld [vmem:[%s6544_s17 + $0x294] ss:$8 sps:$4 sm:$0xff]   ;;  %p6120_p3 = scmp.ne.s32.totalorder %s4573_s30, %s6119_s15  ;;  %s6244_s29 = smov [#allocation22]  }
 0x4e6   : > { %4435 = vmatpush2.bf16.msra.mxu1 %v5656_v39  ;;  %4395 = vmatprep.subr.bf16.mxu0 %v5657_v40  ;;  %v3594_v39 = vpack.c.bf16 %v3586_v24, %v3586_v24  ;;  %v3588_v40 = vld [vmem:[#allocation2 + $0x38] sm:$0xff]  ;;  %s6123_s28 = sshll.u32 %s6244_s29, 4  ;;  %s6124_s28 = int_to_ptr.vmem [resolvable:$false] %s6123_s28 }
 0x4e7   : > { %4436 = vmatprep.subr.bf16.mxu1 %v5659_v41  ;;  %v5735_v41 = vld [vmem:[%s6544_s17 + $0x210] ss:$8 sps:$4 sm:$0xff]   ;;  %v5788_v11 = vld [vmem:[%s6544_s17 + $0x394] ss:$8 sps:$4 sm:$0xff]   ;;  %p6121_p13 = pnand %p6120_p3, %p6937_p12  ;;  %s6125_s24 = scalar_lea.vmem %s6124_s28, 512 }
 0x4e8   : > { %p6126_p6 = scmp.lt.s32.totalorder %s4573_s30, %s6124_s28  ;;  %p6127_p9 = scmp.lt.s32.totalorder %s6125_s24, %s6119_s15 }
 0x4e9   : > { %4396 = vmatpush2.bf16.msra.mxu0 %v5661_v42  ;;  %v5738_v42 = vld [vmem:[%s6544_s17 + $0x310] ss:$8 sps:$4 sm:$0xff]   ;;  %s6818_s1 = scalar_lea.hbm %s6936_s18, %s5279_s16  ;;  %p6122_p2 = pneg %p6121_p13 }
 0x4ea   : > { %4437 = vmatpush2.bf16.msra.mxu1 %v5662_v43  ;;  %4397 = vmatprep.subr.bf16.mxu0 %v5663_v44  ;;  %v3596_v43 = vpack.c.bf16 %v3588_v40, %v3588_v40  ;;  %v5743_v44 = vld [vmem:[%s6544_s17 + $0x204] ss:$8 sps:$4 sm:$0xff]   ;;  %p6128_p0 = por %p6127_p9, %p6126_p6 }
 0x4eb   : > { %4438 = vmatprep.subr.bf16.mxu1 %v5665_v45  ;;  %v5746_v45 = vld [vmem:[%s6544_s17 + $0x304] ss:$8 sps:$4 sm:$0xff]  }
 0x4ec   : > { %p6129_p11 = pnand %p6128_p0, %p6122_p2 }
 0x4ed   : > { %4398 = vmatpush2.bf16.msra.mxu0 %v5667_v46  ;;  %v5741_v46 = vld [vmem:[%s6544_s17 + $0x200] ss:$8 sps:$4 sm:$0xff]  }
 0x4ee   : > { %4439 = vmatpush2.bf16.msra.mxu1 %v5668_v47  ;;  %4399 = vmatprep.subr.bf16.mxu0 %v5669_v26  ;;  %v5744_v47 = vld [vmem:[%s6544_s17 + $0x300] ss:$8 sps:$4 sm:$0xff]   ;;  %v5749_v26 = vld [vmem:[%s6544_s17 + $0x2f4] ss:$8 sps:$4 sm:$0xff]  }
 0x4ef   : > { %4440 = vmatprep.subr.bf16.mxu1 %v5671_v27  ;;  %v5752_v27 = vld [vmem:[%s6544_s17 + $0x3f4] ss:$8 sps:$4 sm:$0xff]  }
 0x4f1   : > { %4400 = vmatpush2.bf16.msra.mxu0 %v5673_v30  ;;  %v5750_v30 = vld [vmem:[%s6544_s17 + $0x3f0] ss:$8 sps:$4 sm:$0xff]  }
 0x4f2   : > { %4441 = vmatpush2.bf16.msra.mxu1 %v5674_v31  ;;  %4401 = vmatprep.subr.bf16.mxu0 %v5675_v49  ;;  %v5755_v31 = vld [vmem:[%s6544_s17 + $0x2e4] ss:$8 sps:$4 sm:$0xff]   ;;  %v5756_v49 = vld [vmem:[%s6544_s17 + $0x3e0] ss:$8 sps:$4 sm:$0xff]  }
 0x4f3   : > { %4442 = vmatprep.subr.bf16.mxu1 %v5677_v55  ;;  %v5764_v55 = vld [vmem:[%s6544_s17 + $0x3d4] ss:$8 sps:$4 sm:$0xff]  }
 0x4f5   : > { %4402 = vmatpush2.bf16.msra.mxu0 %v5679_v56  ;;  %v5759_v56 = vld [vmem:[%s6544_s17 + $0x2d0] ss:$8 sps:$4 sm:$0xff]  }
 0x4f6   : > { %4443 = vmatpush2.bf16.msra.mxu1 %v5680_v57  ;;  %4403 = vmatprep.subr.bf16.mxu0 %v5681_v58  ;;  %v5762_v57 = vld [vmem:[%s6544_s17 + $0x3d0] ss:$8 sps:$4 sm:$0xff]   ;;  %v5767_v58 = vld [vmem:[%s6544_s17 + $0x2c4] ss:$8 sps:$4 sm:$0xff]  }
 0x4f7   : > { %4444 = vmatprep.subr.bf16.mxu1 %v5683_v59  ;;  %v5770_v59 = vld [vmem:[%s6544_s17 + $0x3c4] ss:$8 sps:$4 sm:$0xff]  }
 0x4f9   : > { %4404 = vmatpush2.bf16.msra.mxu0 %v5685_v60  ;;  %v5765_v60 = vld [vmem:[%s6544_s17 + $0x2c0] ss:$8 sps:$4 sm:$0xff]  }
 0x4fa   : > { %4445 = vmatpush2.bf16.msra.mxu1 %v5686_v61  ;;  %4405 = vmatprep.subr.bf16.mxu0 %v5687_v0  ;;  %v5768_v61 = vld [vmem:[%s6544_s17 + $0x3c0] ss:$8 sps:$4 sm:$0xff]   ;;  %v5773_v0 = vld [vmem:[%s6544_s17 + $0x2b4] ss:$8 sps:$4 sm:$0xff]  }
 0x4fb   : > { %4446 = vmatprep.subr.bf16.mxu1 %v5689_v3  ;;  %v5776_v3 = vld [vmem:[%s6544_s17 + $0x3b4] ss:$8 sps:$4 sm:$0xff]  }
 0x4fd   : > { %4406 = vmatpush2.bf16.msra.mxu0 %v5691_v5  ;;  %v5771_v5 = vld [vmem:[%s6544_s17 + $0x2b0] ss:$8 sps:$4 sm:$0xff]  }
 0x4fe   : > { %4447 = vmatpush2.bf16.msra.mxu1 %v5692_v6  ;;  %4407 = vmatprep.subr.bf16.mxu0 %v5693_v1  ;;  %v5774_v6 = vld [vmem:[%s6544_s17 + $0x3b0] ss:$8 sps:$4 sm:$0xff]   ;;  %v5779_v1 = vld [vmem:[%s6544_s17 + $0x2a4] ss:$8 sps:$4 sm:$0xff]  }
 0x4ff   : > { %4448 = vmatprep.subr.bf16.mxu1 %v5695_v53  ;;  %v5782_v53 = vld [vmem:[%s6544_s17 + $0x3a4] ss:$8 sps:$4 sm:$0xff]  }
 0x501   : > { %4408 = vmatpush2.bf16.msra.mxu0 %v5697_v54  ;;  %v5777_v54 = vld [vmem:[%s6544_s17 + $0x2a0] ss:$8 sps:$4 sm:$0xff]  }
 0x502   : > { %4449 = vmatpush2.bf16.msra.mxu1 %v5698_v9  ;;  %4459 = vmatprep.subr.bf16.mxu0 %v5701_v12  ;;  %v5780_v9 = vld [vmem:[%s6544_s17 + $0x3a0] ss:$8 sps:$4 sm:$0xff]   ;;  %v5783_v12 = vld [vmem:[%s6544_s17 + $0x290] ss:$8 sps:$4 sm:$0xff]  }
 0x503   : > { %4500 = vmatprep.subr.bf16.mxu1 %v5704_v13  ;;  %v5786_v13 = vld [vmem:[%s6544_s17 + $0x390] ss:$8 sps:$4 sm:$0xff]  }
 0x504   : > { %4410 = vmatmul.mubr.bf16.vlgmr.msra.gmra.mxu0 %v3589_v50  ;;  %v5791_v50 = vld [vmem:[%s6544_s17 + $0x284] ss:$8 sps:$4 sm:$0xff]  }
 0x505   : > { %4451 = vmatmul.mubr.bf16.vlgmr.msra.gmra.mxu1 %v3591_v62  ;;  %4460 = vmatpush1.bf16.msra.mxu0 %v5699_v2  ;;  %v5794_v62 = vld [vmem:[%s6544_s17 + $0x384] ss:$8 sps:$4 sm:$0xff]   ;;  %v5789_v2 = vld [vmem:[%s6544_s17 + $0x280] ss:$8 sps:$4 sm:$0xff]  }
 0x506   : > { %4501 = vmatpush1.bf16.msra.mxu1 %v5702_v14  ;;  %4461 = vmatprep.subr.bf16.mxu0 %v5707_v15  ;;  %v5792_v14 = vld [vmem:[%s6544_s17 + $0x380] ss:$8 sps:$4 sm:$0xff]  }
 0x507   : > { %4502 = vmatprep.subr.bf16.mxu1 %v5710_v16  ;;  %4491 = vmatprep.mubr.bf16.mxu0 %v3594_v39  ;;  %v3585_v15 = vld [vmem:[#allocation2 + $0x8] sm:$0xff] }
 0x508   : > { %4532 = vmatprep.mubr.bf16.mxu1 %v3596_v43  ;;  %v3587_v16 = vld [vmem:[#allocation2 + $0x28] sm:$0xff] }
 0x509   : > { %4462 = vmatpush1.bf16.msra.mxu0 %v5705_v17  ;;  %v3593_v17 = vpack.c.bf16 %v3585_v15, %v3585_v15 }
 0x50a   : > { %4503 = vmatpush1.bf16.msra.mxu1 %v5708_v22  ;;  %4463 = vmatprep.subr.bf16.mxu0 %v5713_v63  ;;  %v3595_v22 = vpack.c.bf16 %v3587_v16, %v3587_v16 }
 0x50b   : > { %4504 = vmatprep.subr.bf16.mxu1 %v5716_v51 }
 0x50d   : > { %4464 = vmatpush1.bf16.msra.mxu0 %v5711_v25 }
 0x50e   : > { %4505 = vmatpush1.bf16.msra.mxu1 %v5714_v29  ;;  %4465 = vmatprep.subr.bf16.mxu0 %v5719_v4 }
 0x50f   : > { %4506 = vmatprep.subr.bf16.mxu1 %v5722_v33 }
 0x511   : > { %4466 = vmatpush1.bf16.msra.mxu0 %v5717_v34 }
 0x512   : > { %4507 = vmatpush1.bf16.msra.mxu1 %v5720_v35  ;;  %4467 = vmatprep.subr.bf16.mxu0 %v5725_v36  ;;  %v3727_v36 = vlaneseq }
 0x513   : > { %4508 = vmatprep.subr.bf16.mxu1 %v5728_v7 }
 0x514   : > { %v3728_v7 = vshrl.u32 %v3727_v36, 7 }
 0x515   : > { %4468 = vmatpush1.bf16.msra.mxu0 %v5723_v8 }
 0x516   : > { %4509 = vmatpush1.bf16.msra.mxu1 %v5726_v37  ;;  %4469 = vmatprep.subr.bf16.mxu0 %v5731_v18  ;;  %v3729_v8 = vsub.s32 0, %v3728_v7  ;;  %v3725_v37 = vld [vmem:[%s6552_s3] sm:$0x3]  ;;  %v3733_v18 = vsub.s32 1, %v3728_v7 }
 0x517   : > { %4510 = vmatprep.subr.bf16.mxu1 %v5734_v38 }
 0x518   : > { %v3730_v38 = vrot.slane %v3725_v37, %v3729_v8 }
 0x519   : > { %4470 = vmatpush1.bf16.msra.mxu0 %v5729_v21  ;;  %v3734_v21 = vrot.slane %v3725_v37, %v3733_v18 }
 0x51a   : > { %4511 = vmatpush1.bf16.msra.mxu1 %v5732_v19  ;;  %4471 = vmatprep.subr.bf16.mxu0 %v5737_v20 }
 0x51b   : > { %4512 = vmatprep.subr.bf16.mxu1 %v5740_v23 }
 0x51d   : > { %4472 = vmatpush1.bf16.msra.mxu0 %v5735_v41 }
 0x51e   : > { %4513 = vmatpush1.bf16.msra.mxu1 %v5738_v42  ;;  %4473 = vmatprep.subr.bf16.mxu0 %v5743_v44 }
 0x51f   : > { %4514 = vmatprep.subr.bf16.mxu1 %v5746_v45 }
 0x521   : > { %4474 = vmatpush1.bf16.msra.mxu0 %v5741_v46 }
 0x522   : > { %4515 = vmatpush1.bf16.msra.mxu1 %v5744_v47  ;;  %4475 = vmatprep.subr.bf16.mxu0 %v5749_v26 }
 0x523   : > { %4516 = vmatprep.subr.bf16.mxu1 %v5752_v27 }
 0x525   : > { %4476 = vmatpush2.bf16.msra.mxu0 %v5747_v28 }
 0x526   : > { %4517 = vmatpush2.bf16.msra.mxu1 %v5750_v30  ;;  %4477 = vmatprep.subr.bf16.mxu0 %v5755_v31 }
 0x527   : > { %4518 = vmatprep.subr.bf16.mxu1 %v5758_v32 }
 0x529   : > { %4478 = vmatpush2.bf16.msra.mxu0 %v5753_v48 }
 0x52a   : > { %4519 = vmatpush2.bf16.msra.mxu1 %v5756_v49  ;;  %4479 = vmatprep.subr.bf16.mxu0 %v5761_v52 }
 0x52b   : > { %4520 = vmatprep.subr.bf16.mxu1 %v5764_v55 }
 0x52d   : > { %4480 = vmatpush2.bf16.msra.mxu0 %v5759_v56 }
 0x52e   : > { %4521 = vmatpush2.bf16.msra.mxu1 %v5762_v57  ;;  %4481 = vmatprep.subr.bf16.mxu0 %v5767_v58 }
 0x52f   : > { %4522 = vmatprep.subr.bf16.mxu1 %v5770_v59 }
 0x531   : > { %4482 = vmatpush2.bf16.msra.mxu0 %v5765_v60 }
 0x532   : > { %4523 = vmatpush2.bf16.msra.mxu1 %v5768_v61  ;;  %4483 = vmatprep.subr.bf16.mxu0 %v5773_v0 }
 0x533   : > { %4524 = vmatprep.subr.bf16.mxu1 %v5776_v3 }
 0x535   : > { %4484 = vmatpush2.bf16.msra.mxu0 %v5771_v5 }
 0x536   : > { %4525 = vmatpush2.bf16.msra.mxu1 %v5774_v6  ;;  %4485 = vmatprep.subr.bf16.mxu0 %v5779_v1 }
 0x537   : > { %4526 = vmatprep.subr.bf16.mxu1 %v5782_v53 }
 0x539   : > { %4486 = vmatpush2.bf16.msra.mxu0 %v5777_v54 }
 0x53a   : > { %4527 = vmatpush2.bf16.msra.mxu1 %v5780_v9  ;;  %4487 = vmatprep.subr.bf16.mxu0 %v5785_v10 }
 0x53b   : > { %4528 = vmatprep.subr.bf16.mxu1 %v5788_v11 }
 0x53d   : > { %4488 = vmatpush2.bf16.msra.mxu0 %v5783_v12 }
 0x53e   : > { %4529 = vmatpush2.bf16.msra.mxu1 %v5786_v13  ;;  %4489 = vmatprep.subr.bf16.mxu0 %v5791_v50 }
 0x53f   : > { %4530 = vmatprep.subr.bf16.mxu1 %v5794_v62 }
 0x541   : > { %4490 = vmatpush2.bf16.msra.mxu0 %v5789_v2 }
 0x542   : > { %4531 = vmatpush2.bf16.msra.mxu1 %v5792_v14 }
 0x544   : > { %4492 = vmatmul.mubr.bf16.vlgmr.msra.gmra.mxu0 %v3593_v17 }
 0x545   : > { %4533 = vmatmul.mubr.bf16.vlgmr.msra.gmra.mxu1 %v3595_v22 }
 0x5c4   : > { %v4411_v63 = vpop.f32.mrf.mxu0 }
 0x5c5   : > { %v4452_v51 = vpop.f32.mrf.mxu1  ;;  %v4412_v19 = vadd.f32 %v4411_v63, %v3730_v38 }
 0x5c6   : > { %v4413_v25 = vpop.f32.mrf.mxu0 }
 0x5c7   : > { %v4454_v29 = vpop.f32.mrf.mxu1  ;;  %v4414_v20 = vadd.f32 %v4413_v25, %v3734_v21  ;;  %v4453_v23 = vadd.f32 %v4452_v51, %v4412_v19 }
 0x5c8   : > { %v4415_v4 = vpop.f32.mrf.mxu0 }
 0x5c9   : > { %v4456_v33 = vpop.f32.mrf.mxu1  ;;  %v4455_v40 = vadd.f32 %v4454_v29, %v4414_v20 }
 0x5ca   : > { %v4416_v34 = vpop.f32.mrf.mxu0 }
 0x5cb   : > { %v4457_v35 = vpop.f32.mrf.mxu1 }
 0x604   : > { %v4493_v24 = vpop.f32.mrf.mxu0 }
 0x605   : > { %v4534_v39 = vpop.f32.mrf.mxu1  ;;  %v4494_v41 = vadd.f32 %v4493_v24, %v4453_v23 }
 0x606   : > { %v4495_v42 = vpop.f32.mrf.mxu0 }
 0x607   : > { %v4536_v43 = vpop.f32.mrf.mxu1  ;;  %v4535_v44 = vadd.f32 %v4534_v39, %v4494_v41  ;;  %v4496_v45 = vadd.f32 %v4495_v42, %v4455_v40 }
 0x608   : > { %v4497_v46 = vpop.f32.mrf.mxu0 }
 0x609   : > { %v4538_v47 = vpop.f32.mrf.mxu1  ;;  %v5270_v26 = vmul.f32 -1.442695, %v4535_v44  ;;  %v4537_v27 = vadd.f32 %v4536_v43, %v4496_v45 }
 0x60a   : > { %v4498_v28 = vpop.f32.mrf.mxu0 }
 0x60b   : > { %v4539_v30 = vpop.f32.mrf.mxu1  ;;  %5795 = vpow2.f32 %v5270_v26  ;;  %v5271_v31 = vmul.f32 -1.442695, %v4537_v27 }
 0x60d   : > { %5797 = vpow2.f32 %v5271_v31 }
 0x618   : > { %v5796_v32 = vpop.eup %5795 }
 0x619   : > { %v4547_v48 = vadd.f32 1.0, %v5796_v32 }
 0x61a   : > { %v5798_v49 = vpop.eup %5797 }
 0x61b   : > { %5799 = vrcp.f32 %v4547_v48  ;;  %v4548_v52 = vadd.f32 1.0, %v5798_v49 }
 0x61d   : > { %5801 = vrcp.f32 %v4548_v52 }
 0x628   : > { %v5800_v55 = vpop.eup %5799 }
 0x629   : > { %4553 = vst [vmem:[%s6554_s12] sm:$0xff] %v5800_v55 }
 0x62a   : > { %v5802_v56 = vpop.eup %5801 }
 0x62b   : > { %4554 = vst [vmem:[%s6554_s12 + $0x8] sm:$0xff] %v5802_v56 }
 0x62c   : > { %6132 = shalt.err (!%p6129_p11)
}
 0x62d   : > { %s6133_s20 = scalar_lea.hbm %s6818_s1, 256  ;;  %s6137_s17 = scalar_lea.hbm %s6936_s18, 1024 }
 0x62e   : > { %p6134_p4 = scmp.ne.s32.totalorder %s6818_s1, %s6133_s20  ;;  %p6138_p5 = scmp.lt.s32.totalorder %s6818_s1, %s6936_s18 }
 0x62f   : > { %p6139_p10 = scmp.lt.s32.totalorder %s6137_s17, %s6133_s20 }
 0x630   : > { %p6135_p8 = pnand %p6134_p4, %p6937_p12 }
 0x631   : > { %p6140_p7 = por %p6139_p10, %p6138_p5 }
 0x632   : > { %p6136_p1 = pneg %p6135_p8 }
 0x634   : > { %p6141_p3 = pnand %p6140_p7, %p6136_p1 }
 0x636   : > { %6144 = shalt.err (!%p6141_p3)
}
 0x637   : > { %5324 = dma.vmem_to_hbm [thread:$0]  (%p6937_p12), %s4573_s30, 256, %s6818_s1, %s4556_s0  }
 0x638 PF: > { %s6938_s3 = sld [smem:[#allocation31_spill]]  ;;  %p5389_p13 = scmp.ge.s32.totalorder %s6223_s26, 2 }
 0x639   : > { %s6939_s12 = sld [smem:[#allocation35_spill]] }
 0x63e   : > { %s4584_s16 = sand.u32 1, %s6938_s3  }
 0x63f   : > { %p6940_p2 = scmp.ne.s32.totalorder %s6939_s12, 0  ;;  %s4585_s7 = scalar_lea.sflag [#allocation5], %s4584_s16 }
 0x641   : > { %p5365_p6 = pnand %p5389_p13, %p6940_p2 }
 0x643   : > { %p5366_p9 = pneg %p5365_p6 }
 0x645   : > { %6198 = dma.done.wait (%p5366_p9), %s4585_s7, 256  }
 0x646   : > { %6200 = vsyncadd (%p5366_p9), %s4585_s7, 4294967040  ;;  %s31_s26 = sadd.s32 1, %s6223_s26   ;;  %s6941_s27 = sld [smem:[#allocation34_spill]] }
 0x647   : > { %p28_p0 = scmp.ge.s32.totalorder %s31_s26, 6   ;;  %s6942_s30 = sld [smem:[#allocation32_spill]] }
 0x648   : > { %s6943_s21 = smov %s6207_s22  ;;  %s6944_s22 = smov %s6211_s23 }
 0x649   : > { %s6946_s24 = smov %s6219_s25  ;;  %30 = sbr.rel (!%p28_p0) target bundleno = 17 (0x11), region = 167 }
 0x64c   : > { %s6945_s23 = smov %s6941_s27 }
 0x64d   : > { %s6947_s25 = smov %s6942_s30 }
 0x64e   :  { %4590 = vsyncpa [#allocation4], 1 }
 0x64f   :  { %4592 = vsyncpa [#allocation4 + $0x1], 1 }
 0x650   :  { %4593 = vsyncpa [#allocation7], 1 }
 0x651   :  { %4594 = vsyncpa [#allocation10], 1 }
 0x652   :  { %4595 = vsyncpa [#allocation13], 1 }
 0x653   :  { %4596 = vsyncpa [#allocation16], 1 }
 0x654   :  { %4597 = vsyncpa [#allocation19], 1 }
 0x655   :  { %4598 = vsyncpa [#allocation5], 1 }
 0x656   :  { %4600 = vsyncpa [#allocation5 + $0x1], 1 }

</bundles_post_ra>
